<compile_context>
chip_gen: v5e
topology: v5e:2x2
jax: 0.10.0
libtpu: 0.0.40
codegen_flags: <defaults>
</compile_context>

<pallas_src>
import functools

import jax
import jax.numpy as jnp
from jax import lax
from jax.experimental import pallas as pl
from jax.experimental.pallas import tpu as pltpu

BN_EPS = 1e-5
LANE = 128
_VMEM_LIMIT = 64 * 1024 * 1024


def _round_up(x, m):
    return (x + m - 1) // m * m


# ----------------------------------------------------------------------------
# Kernel A: tiled GEMM (bf16 inputs, fp32 accumulation) + optional bias,
# optional pre-norm ReLU (UpsampleConv order), optional in-kernel activation
# (only when there is no norm), optionally emitting per-tile BN partial stats
# (row 0 = sum, row 1 = sum of squares) per output channel.
# ----------------------------------------------------------------------------
def _make_gemm_kernel(has_bias, pre_act, act, emit_stats):
    def kernel(*refs):
        i = 0
        p_ref = refs[i]; i += 1            # (TM, K)  bf16 patches tile
        w_ref = refs[i]; i += 1            # (K, TN)  bf16 weight tile
        b_ref = None
        if has_bias:
            b_ref = refs[i]; i += 1        # (1, TN)  f32 bias
        z_ref = refs[i]; i += 1            # (TM, TN) f32 GEMM output tile
        s_ref = None
        if emit_stats:
            s_ref = refs[i]; i += 1        # (8, TN)  f32 [sum; sumsq; zeros]

        z = jnp.dot(p_ref[...], w_ref[...], preferred_element_type=jnp.float32)
        if has_bias:
            z = z + b_ref[...]
        if pre_act == "relu":              # UpsampleConv: relu BEFORE BN stats
            z = jnp.maximum(z, 0.0)
        if act == "relu":
            z = jnp.maximum(z, 0.0)
        elif act == "tanh":
            z = jnp.tanh(z)
        z_ref[...] = z

        if emit_stats:
            psum = jnp.sum(z, axis=0, keepdims=True)
            psq = jnp.sum(z * z, axis=0, keepdims=True)
            pad = jnp.zeros((6, psum.shape[1]), jnp.float32)
            s_ref[...] = jnp.concatenate([psum, psq, pad], axis=0)

    return kernel


def _gemm_fused(patches, w_mat, *, bias=None, pre_act=None, act=None,
                emit_stats=False, tm, tn):
    mp, kdim = patches.shape
    np_ = w_mat.shape[1]
    mt, nt = mp // tm, np_ // tn

    args = [patches, w_mat]
    in_specs = [
        pl.BlockSpec((tm, kdim), lambda i, j: (i, 0)),
        pl.BlockSpec((kdim, tn), lambda i, j: (0, j)),
    ]
    if bias is not None:
        args.append(bias)
        in_specs.append(pl.BlockSpec((1, tn), lambda i, j: (0, j)))

    out_shapes = [jax.ShapeDtypeStruct((mp, np_), jnp.float32)]
    out_specs = [pl.BlockSpec((tm, tn), lambda i, j: (i, j))]
    if emit_stats:
        out_shapes.append(jax.ShapeDtypeStruct((mt, 8, np_), jnp.float32))
        out_specs.append(pl.BlockSpec((None, 8, tn), lambda i, j: (i, 0, j)))

    flops = 2 * mp * kdim * np_
    bytes_acc = patches.size * 2 + w_mat.size * 2 + mp * np_ * 4
    trans = mp * np_ if act == "tanh" else 0

    res = pl.pallas_call(
        _make_gemm_kernel(bias is not None, pre_act, act, emit_stats),
        grid=(mt, nt),
        in_specs=in_specs,
        out_specs=out_specs,
        out_shape=out_shapes,
        compiler_params=pltpu.CompilerParams(
            dimension_semantics=("parallel", "parallel"),
            vmem_limit_bytes=_VMEM_LIMIT),
        cost_estimate=pl.CostEstimate(flops=flops, transcendentals=trans,
                                      bytes_accessed=bytes_acc),
    )(*args)
    if emit_stats:
        return res[0], res[1]
    return res[0], None


# ----------------------------------------------------------------------------
# Kernel B: tiled BN epilogue  out = act(z*scale + shift) [+ skip]
# (scale/shift are the algebraically folded gamma*rsqrt(var+eps) / beta-mean*s)
# ----------------------------------------------------------------------------
def _make_epilogue_kernel(post_act, has_skip):
    def kernel(*refs):
        i = 0
        z_ref = refs[i]; i += 1            # (TM, TN) f32
        sc_ref = refs[i]; i += 1           # (1, TN)  f32 scale
        sh_ref = refs[i]; i += 1           # (1, TN)  f32 shift
        k_ref = None
        if has_skip:
            k_ref = refs[i]; i += 1        # (TM, TN) f32 residual
        o_ref = refs[i]

        v = z_ref[...] * sc_ref[...] + sh_ref[...]
        if post_act == "relu":
            v = jnp.maximum(v, 0.0)
        elif post_act == "tanh":
            v = jnp.tanh(v)
        if has_skip:
            v = v + k_ref[...]
        o_ref[...] = v

    return kernel


def _epilogue_fused(z, scale, shift, *, skip=None, post_act=None, tm, tn):
    mp, np_ = z.shape
    mt, nt = mp // tm, np_ // tn
    args = [z, scale.reshape(1, np_), shift.reshape(1, np_)]
    in_specs = [
        pl.BlockSpec((tm, tn), lambda i, j: (i, j)),
        pl.BlockSpec((1, tn), lambda i, j: (0, j)),
        pl.BlockSpec((1, tn), lambda i, j: (0, j)),
    ]
    if skip is not None:
        args.append(skip)
        in_specs.append(pl.BlockSpec((tm, tn), lambda i, j: (i, j)))
    n_big = 2 + (1 if skip is not None else 0)
    return pl.pallas_call(
        _make_epilogue_kernel(post_act, skip is not None),
        grid=(mt, nt),
        in_specs=in_specs,
        out_specs=pl.BlockSpec((tm, tn), lambda i, j: (i, j)),
        out_shape=jax.ShapeDtypeStruct((mp, np_), jnp.float32),
        compiler_params=pltpu.CompilerParams(
            dimension_semantics=("parallel", "parallel"),
            vmem_limit_bytes=_VMEM_LIMIT),
        cost_estimate=pl.CostEstimate(flops=3 * mp * np_, transcendentals=0,
                                      bytes_accessed=n_big * mp * np_ * 4),
    )(*args)


# ----------------------------------------------------------------------------
# Plain-JAX glue (NHWC): padding, im2col, tile padding, ConvTranspose dilation
# ----------------------------------------------------------------------------
def _pad_hw(x, pad, mode):
    if pad == 0:
        return x
    cfg = ((0, 0), (pad, pad), (pad, pad), (0, 0))
    return jnp.pad(x, cfg, mode="reflect" if mode == "reflect" else "constant")


def _im2col_nhwc(x, k, stride):
    n, hp, wp, c = x.shape
    ho = (hp - k) // stride + 1
    wo = (wp - k) // stride + 1
    cols = []
    for kh in range(k):
        for kw in range(k):
            cols.append(x[:, kh:kh + stride * (ho - 1) + 1:stride,
                          kw:kw + stride * (wo - 1) + 1:stride, :])
    pat = jnp.stack(cols, axis=3)                   # [N, Ho, Wo, k*k, C]
    pat = pat.reshape(n * ho * wo, k * k * c)       # row order (kh, kw, c)
    return pat, ho, wo


def _pad2d(a, rows, cols):
    return jnp.pad(a, ((0, rows - a.shape[0]), (0, cols - a.shape[1])))


def _pad1d(a, cols):
    return jnp.pad(a, (0, cols - a.shape[0]))


def conv_block(x, weight, *, stride, padding, pad_mode="zeros", bias=None,
               gamma=None, beta=None, skip=None, act=None, pre_act=None):
    """NHWC Conv2d (PyTorch weight [Cout,Cin,k,k]) fused with BN / act / skip."""
    n, _, _, _ = x.shape
    cout, _, k, _ = weight.shape
    xp = _pad_hw(x, padding, pad_mode)
    patches, ho, wo = _im2col_nhwc(xp, k, stride)
    m, kdim = patches.shape

    np_ = _round_up(cout, LANE)                     # lane-dense output channels
    tm = min(256, _round_up(m, 8))
    mp = _round_up(m, tm)
    tn = 256 if np_ % 256 == 0 else LANE

    patches_p = _pad2d(patches, mp, kdim).astype(jnp.bfloat16)
    w_mat = weight.transpose(2, 3, 1, 0).reshape(kdim, cout)  # rows (kh,kw,cin)
    w_p = _pad2d(w_mat, kdim, np_).astype(jnp.bfloat16)
    bias_p = None
    if bias is not None:
        bias_p = _pad1d(bias.astype(jnp.float32), np_).reshape(1, np_)

    has_norm = gamma is not None
    z_p, stats = _gemm_fused(
        patches_p, w_p, bias=bias_p, pre_act=pre_act,
        act=None if has_norm else act, emit_stats=has_norm, tm=tm, tn=tn)

    if has_norm:
        # BatchNorm2d training-mode batch stats (biased variance over N,H,W).
        # Zero-padded rows/channels contribute 0 to sum / sumsq, so dividing
        # by the real M and per-channel stats keep the real channels exact.
        sums = jnp.sum(stats[:, 0, :], axis=0)
        sqs = jnp.sum(stats[:, 1, :], axis=0)
        mean = sums / m
        var = jnp.maximum(sqs / m - mean * mean, 0.0)
        scale = _pad1d(gamma.astype(jnp.float32), np_) * lax.rsqrt(var + BN_EPS)
        shift = _pad1d(beta.astype(jnp.float32), np_) - mean * scale
        skip_p = None
        if skip is not None:
            skip_p = _pad2d(skip.reshape(m, cout).astype(jnp.float32), mp, np_)
        out_p = _epilogue_fused(z_p, scale, shift, skip=skip_p, post_act=act,
                                tm=tm, tn=tn)
    else:
        out_p = z_p

    return out_p[:m, :cout].reshape(n, ho, wo, cout)


def conv_transpose_block(x, weight_t, *, gamma, beta):
    """ConvTranspose2d(k=3, s=2, p=1, output_padding=1) -> ReLU -> BN (NHWC)."""
    n, h, w, c = x.shape
    k, stride, pad, out_pad = 3, 2, 1, 1
    xd = jnp.zeros((n, (h - 1) * stride + 1, (w - 1) * stride + 1, c), x.dtype)
    xd = xd.at[:, ::stride, ::stride, :].set(x)
    lo = k - 1 - pad
    hi = k - 1 - pad + out_pad
    xp = jnp.pad(xd, ((0, 0), (lo, hi), (lo, hi), (0, 0)))
    # equivalent plain conv: flip spatial dims, swap in/out channels
    w_conv = jnp.flip(weight_t, axis=(2, 3)).transpose(1, 0, 2, 3)  # [Cout,Cin,k,k]
    return conv_block(xp, w_conv, stride=1, padding=0, gamma=gamma, beta=beta,
                      act=None, pre_act="relu")


# ----------------------------------------------------------------------------
# Parameter construction (deterministic, matches nn.Module __init__ shapes)
# ----------------------------------------------------------------------------
def init_params(key, in_ch, out_ch, feature, depth, n_blocks):
    keys = iter(jax.random.split(key, 4 * (depth + n_blocks) + 8))

    def conv_w(co, ci, k):
        return (jax.random.normal(next(keys), (co, ci, k, k), jnp.float32)
                * (1.0 / (ci * k * k) ** 0.5))

    down = []
    cin, cout = in_ch, feature
    down.append(dict(w=conv_w(cout, cin, 7),
                     gamma=jnp.ones(cout), beta=jnp.zeros(cout)))
    for _ in range(depth):
        cin, cout = cout, cout * 2
        down.append(dict(w=conv_w(cout, cin, 3),
                         gamma=jnp.ones(cout), beta=jnp.zeros(cout)))

    bott = []
    for _ in range(n_blocks):
        bott.append(dict(w1=conv_w(cout, cout, 3), g1=jnp.ones(cout), b1=jnp.zeros(cout),
                         w2=conv_w(cout, cout, 3), g2=jnp.ones(cout), b2=jnp.zeros(cout)))

    up = []
    for _ in range(depth):
        cin, cout = cout, cout // 2
        wt = (jax.random.normal(next(keys), (cin, cout, 3, 3), jnp.float32)
              * (1.0 / (cin * 9) ** 0.5))
        up.append(dict(w=wt, gamma=jnp.ones(cout), beta=jnp.zeros(cout)))

    pred_w = conv_w(out_ch, cout, 7)
    pred_b = jax.random.normal(next(keys), (out_ch,), jnp.float32) * 0.01
    return dict(down=down, bott=bott, up=up, pred_w=pred_w, pred_b=pred_b)


# ----------------------------------------------------------------------------
# Full ResNet forward (defaults: bias=False, dropout=False, norm_mode='batch')
# ----------------------------------------------------------------------------
def resnet_forward(params, x_nchw):
    x = x_nchw.transpose(0, 2, 3, 1)                # NCHW -> NHWC once
    # downsample
    d0 = params["down"][0]
    x = conv_block(x, d0["w"], stride=1, padding=3, pad_mode="reflect",
                   gamma=d0["gamma"], beta=d0["beta"], act="relu")
    for d in params["down"][1:]:
        x = conv_block(x, d["w"], stride=2, padding=1, pad_mode="zeros",
                       gamma=d["gamma"], beta=d["beta"], act="relu")
    # bottleneck residual blocks (padding_mode='reflect', no dropout)
    for b in params["bott"]:
        h = conv_block(x, b["w1"], stride=1, padding=1, pad_mode="reflect",
                       gamma=b["g1"], beta=b["b1"], act="relu")
        x = conv_block(h, b["w2"], stride=1, padding=1, pad_mode="reflect",
                       gamma=b["g2"], beta=b["b2"], act=None, skip=x)
    # upsample (ConvTranspose2d -> ReLU -> BN)
    for u in params["up"]:
        x = conv_transpose_block(x, u["w"], gamma=u["gamma"], beta=u["beta"])
    # pred head: Conv2d(k=7, pad=3, reflect, bias=True) -> Tanh
    x = conv_block(x, params["pred_w"], stride=1, padding=3, pad_mode="reflect",
                   bias=params["pred_b"], act="tanh")
    return x.transpose(0, 3, 1, 2)                  # NHWC -> NCHW once
    # TODO(synk): BatchNorm running-stat (momentum) buffer updates are a
    # training-time side effect and do not affect this forward output; omitted.


if __name__ == "__main__":
    # Small, forward-consistent shapes.
    BATCH, IN_CH, OUT_CH, H, W = 2, 4, 3, 16, 16
    FEATURE, DEPTH, N_BLOCKS = 8, 2, 2

    key = jax.random.PRNGKey(0)
    pkey, xkey = jax.random.split(key)
    params = init_params(pkey, IN_CH, OUT_CH, FEATURE, DEPTH, N_BLOCKS)
    x = jax.random.normal(xkey, (BATCH, IN_CH, H, W), jnp.float32)

    fwd = jax.jit(functools.partial(resnet_forward, params))
    y = fwd(x)
    jax.block_until_ready(y)

    assert y.shape == (BATCH, OUT_CH, H, W), y.shape
    assert y.dtype == jnp.float32
    assert bool(jnp.all(jnp.isfinite(y)))
    assert bool(jnp.all(jnp.abs(y) <= 1.0))  # tanh output range
    print("KERNEL_OK")
</pallas_src>

<mosaic_0001>
module attributes {stable_mosaic.version = 11 : i64} {
  func.func @kernel(%arg0: i32, %arg1: i32, %arg2: memref<256x196xbf16, #tpu.memory_space<vmem>>, %arg3: memref<196x128xbf16, #tpu.memory_space<vmem>>, %arg4: memref<256x128xf32, #tpu.memory_space<vmem>>, %arg5: memref<1x8x128xf32, #tpu.memory_space<vmem>>) attributes {dimension_semantics = [#tpu.dimension_semantics<parallel>, #tpu.dimension_semantics<parallel>], iteration_bounds = array<i64: 2, 1>, scalar_prefetch = 0 : i64, scratch_operands = 0 : i64, tpu.core_type = #tpu.core_type<tc>, window_params = [{transform_indices = @transform_0, window_bounds = array<i64: 256, 196>}, {transform_indices = @transform_1, window_bounds = array<i64: 196, 128>}, {transform_indices = @transform_2, window_bounds = array<i64: 256, 128>}, {transform_indices = @transform_3, window_bounds = array<i64: 1, 8, 128>}]} {
    %c0 = arith.constant 0 : index
    %c0_0 = arith.constant 0 : index
    %0 = vector.load %arg2[%c0, %c0_0] : memref<256x196xbf16, #tpu.memory_space<vmem>>, vector<256x196xbf16>
    %c0_1 = arith.constant 0 : index
    %c0_2 = arith.constant 0 : index
    %1 = vector.load %arg3[%c0_1, %c0_2] : memref<196x128xbf16, #tpu.memory_space<vmem>>, vector<196x128xbf16>
    %cst = arith.constant dense<0.000000e+00> : vector<256x128xf32>
    %2 = tpu.matmul %0, %1, %cst {dimension_numbers = #tpu.dot_dimension_numbers<[1], [0], [0], [1], [0, 0, 1, 1], [], []>} : vector<256x196xbf16>, vector<196x128xbf16>, vector<256x128xf32> -> vector<256x128xf32>
    %c0_3 = arith.constant 0 : index
    %c0_4 = arith.constant 0 : index
    %3 = vector.load %arg4[%c0_3, %c0_4] : memref<256x128xf32, #tpu.memory_space<vmem>>, vector<256x128xf32>
    tpu.vector_store %arg4[%c0_3, %c0_4], %2 {strides = array<i32>} : memref<256x128xf32, #tpu.memory_space<vmem>>, vector<256x128xf32>,
    %cst_5 = arith.constant dense<0.000000e+00> : vector<128xf32>
    %4 = vector.multi_reduction <add>, %2, %cst_5 [0] : vector<256x128xf32> to vector<128xf32>
    %5 = vector.shape_cast %4 : vector<128xf32> to vector<1x128xf32>
    %6 = arith.mulf %2, %2 : vector<256x128xf32>
    %cst_6 = arith.constant dense<0.000000e+00> : vector<128xf32>
    %7 = vector.multi_reduction <add>, %6, %cst_6 [0] : vector<256x128xf32> to vector<128xf32>
    %8 = vector.shape_cast %7 : vector<128xf32> to vector<1x128xf32>
    %cst_7 = arith.constant 0.000000e+00 : f32
    %9 = vector.broadcast %cst_7 : f32 to vector<6x128xf32>
    %10 = tpu.concatenate %5, %8, %9 in 0 : vector<1x128xf32>, vector<1x128xf32>, vector<6x128xf32> -> vector<8x128xf32>
    %c0_8 = arith.constant 0 : index
    %c0_9 = arith.constant 0 : index
    %c0_10 = arith.constant 0 : index
    %11 = vector.load %arg5[%c0_8, %c0_9, %c0_10] : memref<1x8x128xf32, #tpu.memory_space<vmem>>, vector<1x8x128xf32>
    %12 = vector.shape_cast %11 : vector<1x8x128xf32> to vector<8x128xf32>
    %13 = vector.shape_cast %10 : vector<8x128xf32> to vector<1x8x128xf32>
    tpu.vector_store %arg5[%c0_8, %c0_9, %c0_10], %13 {strides = array<i32>} : memref<1x8x128xf32, #tpu.memory_space<vmem>>, vector<1x8x128xf32>,
    return
  }
  func.func @transform_0(%arg0: i32, %arg1: i32) -> (i32, i32) {
    %c0_i32 = arith.constant 0 : i32
    %c0_i32_0 = arith.constant 0 : i32
    return %arg0, %c0_i32 : i32, i32
  }
  func.func @transform_1(%arg0: i32, %arg1: i32) -> (i32, i32) {
    %c0_i32 = arith.constant 0 : i32
    %c0_i32_0 = arith.constant 0 : i32
    return %c0_i32, %arg1 : i32, i32
  }
  func.func @transform_2(%arg0: i32, %arg1: i32) -> (i32, i32) {
    %c0_i32 = arith.constant 0 : i32
    return %arg0, %arg1 : i32, i32
  }
  func.func @transform_3(%arg0: i32, %arg1: i32) -> (i32, i32, i32) {
    %c0_i32 = arith.constant 0 : i32
    %c0_i32_0 = arith.constant 0 : i32
    return %arg0, %c0_i32, %arg1 : i32, i32, i32
  }
}

module attributes {stable_mosaic.version = 11 : i64} {
  func.func @kernel(%arg0: i32, %arg1: i32, %arg2: memref<256x128xf32, #tpu.memory_space<vmem>>, %arg3: memref<1x128xf32, #tpu.memory_space<vmem>>, %arg4: memref<1x128xf32, #tpu.memory_space<vmem>>, %arg5: memref<256x128xf32, #tpu.memory_space<vmem>>) attributes {dimension_semantics = [#tpu.dimension_semantics<parallel>, #tpu.dimension_semantics<parallel>], iteration_bounds = array<i64: 2, 1>, scalar_prefetch = 0 : i64, scratch_operands = 0 : i64, tpu.core_type = #tpu.core_type<tc>, window_params = [{transform_indices = @transform_0, window_bounds = array<i64: 256, 128>}, {transform_indices = @transform_1, window_bounds = array<i64: 1, 128>}, {transform_indices = @transform_2, window_bounds = array<i64: 1, 128>}, {transform_indices = @transform_3, window_bounds = array<i64: 256, 128>}]} {
    %c0 = arith.constant 0 : index
    %c0_0 = arith.constant 0 : index
    %0 = vector.load %arg2[%c0, %c0_0] : memref<256x128xf32, #tpu.memory_space<vmem>>, vector<256x128xf32>
    %c0_1 = arith.constant 0 : index
    %c0_2 = arith.constant 0 : index
    %1 = vector.load %arg3[%c0_1, %c0_2] : memref<1x128xf32, #tpu.memory_space<vmem>>, vector<1x128xf32>
    %2 = vector.broadcast %1 : vector<1x128xf32> to vector<256x128xf32>
    %3 = arith.mulf %0, %2 : vector<256x128xf32>
    %c0_3 = arith.constant 0 : index
    %c0_4 = arith.constant 0 : index
    %4 = vector.load %arg4[%c0_3, %c0_4] : memref<1x128xf32, #tpu.memory_space<vmem>>, vector<1x128xf32>
    %5 = vector.broadcast %4 : vector<1x128xf32> to vector<256x128xf32>
    %6 = arith.addf %3, %5 : vector<256x128xf32>
    %cst = arith.constant 0.000000e+00 : f32
    %7 = vector.broadcast %cst : f32 to vector<256x128xf32>
    %8 = arith.maximumf %6, %7 : vector<256x128xf32>
    %c0_5 = arith.constant 0 : index
    %c0_6 = arith.constant 0 : index
    %9 = vector.load %arg5[%c0_5, %c0_6] : memref<256x128xf32, #tpu.memory_space<vmem>>, vector<256x128xf32>
    tpu.vector_store %arg5[%c0_5, %c0_6], %8 {strides = array<i32>} : memref<256x128xf32, #tpu.memory_space<vmem>>, vector<256x128xf32>,
    return
  }
  func.func @transform_0(%arg0: i32, %arg1: i32) -> (i32, i32) {
    %c0_i32 = arith.constant 0 : i32
    return %arg0, %arg1 : i32, i32
  }
  func.func @transform_1(%arg0: i32, %arg1: i32) -> (i32, i32) {
    %c0_i32 = arith.constant 0 : i32
    %c0_i32_0 = arith.constant 0 : i32
    return %c0_i32, %arg1 : i32, i32
  }
  func.func @transform_2(%arg0: i32, %arg1: i32) -> (i32, i32) {
    %c0_i32 = arith.constant 0 : i32
    %c0_i32_0 = arith.constant 0 : i32
    return %c0_i32, %arg1 : i32, i32
  }
  func.func @transform_3(%arg0: i32, %arg1: i32) -> (i32, i32) {
    %c0_i32 = arith.constant 0 : i32
    return %arg0, %arg1 : i32, i32
  }
}

module attributes {stable_mosaic.version = 11 : i64} {
  func.func @kernel(%arg0: i32, %arg1: i32, %arg2: memref<128x72xbf16, #tpu.memory_space<vmem>>, %arg3: memref<72x128xbf16, #tpu.memory_space<vmem>>, %arg4: memref<128x128xf32, #tpu.memory_space<vmem>>, %arg5: memref<1x8x128xf32, #tpu.memory_space<vmem>>) attributes {dimension_semantics = [#tpu.dimension_semantics<parallel>, #tpu.dimension_semantics<parallel>], iteration_bounds = array<i64: 1, 1>, scalar_prefetch = 0 : i64, scratch_operands = 0 : i64, tpu.core_type = #tpu.core_type<tc>, window_params = [{transform_indices = @transform_0, window_bounds = array<i64: 128, 72>}, {transform_indices = @transform_1, window_bounds = array<i64: 72, 128>}, {transform_indices = @transform_2, window_bounds = array<i64: 128, 128>}, {transform_indices = @transform_3, window_bounds = array<i64: 1, 8, 128>}]} {
    %c0 = arith.constant 0 : index
    %c0_0 = arith.constant 0 : index
    %0 = vector.load %arg2[%c0, %c0_0] : memref<128x72xbf16, #tpu.memory_space<vmem>>, vector<128x72xbf16>
    %c0_1 = arith.constant 0 : index
    %c0_2 = arith.constant 0 : index
    %1 = vector.load %arg3[%c0_1, %c0_2] : memref<72x128xbf16, #tpu.memory_space<vmem>>, vector<72x128xbf16>
    %cst = arith.constant dense<0.000000e+00> : vector<128x128xf32>
    %2 = tpu.matmul %0, %1, %cst {dimension_numbers = #tpu.dot_dimension_numbers<[1], [0], [0], [1], [0, 0, 1, 1], [], []>} : vector<128x72xbf16>, vector<72x128xbf16>, vector<128x128xf32> -> vector<128x128xf32>
    %c0_3 = arith.constant 0 : index
    %c0_4 = arith.constant 0 : index
    %3 = vector.load %arg4[%c0_3, %c0_4] : memref<128x128xf32, #tpu.memory_space<vmem>>, vector<128x128xf32>
    tpu.vector_store %arg4[%c0_3, %c0_4], %2 {strides = array<i32>} : memref<128x128xf32, #tpu.memory_space<vmem>>, vector<128x128xf32>,
    %cst_5 = arith.constant dense<0.000000e+00> : vector<128xf32>
    %4 = vector.multi_reduction <add>, %2, %cst_5 [0] : vector<128x128xf32> to vector<128xf32>
    %5 = vector.shape_cast %4 : vector<128xf32> to vector<1x128xf32>
    %6 = arith.mulf %2, %2 : vector<128x128xf32>
    %cst_6 = arith.constant dense<0.000000e+00> : vector<128xf32>
    %7 = vector.multi_reduction <add>, %6, %cst_6 [0] : vector<128x128xf32> to vector<128xf32>
    %8 = vector.shape_cast %7 : vector<128xf32> to vector<1x128xf32>
    %cst_7 = arith.constant 0.000000e+00 : f32
    %9 = vector.broadcast %cst_7 : f32 to vector<6x128xf32>
    %10 = tpu.concatenate %5, %8, %9 in 0 : vector<1x128xf32>, vector<1x128xf32>, vector<6x128xf32> -> vector<8x128xf32>
    %c0_8 = arith.constant 0 : index
    %c0_9 = arith.constant 0 : index
    %c0_10 = arith.constant 0 : index
    %11 = vector.load %arg5[%c0_8, %c0_9, %c0_10] : memref<1x8x128xf32, #tpu.memory_space<vmem>>, vector<1x8x128xf32>
    %12 = vector.shape_cast %11 : vector<1x8x128xf32> to vector<8x128xf32>
    %13 = vector.shape_cast %10 : vector<8x128xf32> to vector<1x8x128xf32>
    tpu.vector_store %arg5[%c0_8, %c0_9, %c0_10], %13 {strides = array<i32>} : memref<1x8x128xf32, #tpu.memory_space<vmem>>, vector<1x8x128xf32>,
    return
  }
  func.func @transform_0(%arg0: i32, %arg1: i32) -> (i32, i32) {
    %c0_i32 = arith.constant 0 : i32
    %c0_i32_0 = arith.constant 0 : i32
    return %arg0, %c0_i32 : i32, i32
  }
  func.func @transform_1(%arg0: i32, %arg1: i32) -> (i32, i32) {
    %c0_i32 = arith.constant 0 : i32
    %c0_i32_0 = arith.constant 0 : i32
    return %c0_i32, %arg1 : i32, i32
  }
  func.func @transform_2(%arg0: i32, %arg1: i32) -> (i32, i32) {
    %c0_i32 = arith.constant 0 : i32
    return %arg0, %arg1 : i32, i32
  }
  func.func @transform_3(%arg0: i32, %arg1: i32) -> (i32, i32, i32) {
    %c0_i32 = arith.constant 0 : i32
    %c0_i32_0 = arith.constant 0 : i32
    return %arg0, %c0_i32, %arg1 : i32, i32, i32
  }
}

module attributes {stable_mosaic.version = 11 : i64} {
  func.func @kernel(%arg0: i32, %arg1: i32, %arg2: memref<128x128xf32, #tpu.memory_space<vmem>>, %arg3: memref<1x128xf32, #tpu.memory_space<vmem>>, %arg4: memref<1x128xf32, #tpu.memory_space<vmem>>, %arg5: memref<128x128xf32, #tpu.memory_space<vmem>>) attributes {dimension_semantics = [#tpu.dimension_semantics<parallel>, #tpu.dimension_semantics<parallel>], iteration_bounds = array<i64: 1, 1>, scalar_prefetch = 0 : i64, scratch_operands = 0 : i64, tpu.core_type = #tpu.core_type<tc>, window_params = [{transform_indices = @transform_0, window_bounds = array<i64: 128, 128>}, {transform_indices = @transform_1, window_bounds = array<i64: 1, 128>}, {transform_indices = @transform_2, window_bounds = array<i64: 1, 128>}, {transform_indices = @transform_3, window_bounds = array<i64: 128, 128>}]} {
    %c0 = arith.constant 0 : index
    %c0_0 = arith.constant 0 : index
    %0 = vector.load %arg2[%c0, %c0_0] : memref<128x128xf32, #tpu.memory_space<vmem>>, vector<128x128xf32>
    %c0_1 = arith.constant 0 : index
    %c0_2 = arith.constant 0 : index
    %1 = vector.load %arg3[%c0_1, %c0_2] : memref<1x128xf32, #tpu.memory_space<vmem>>, vector<1x128xf32>
    %2 = vector.broadcast %1 : vector<1x128xf32> to vector<128x128xf32>
    %3 = arith.mulf %0, %2 : vector<128x128xf32>
    %c0_3 = arith.constant 0 : index
    %c0_4 = arith.constant 0 : index
    %4 = vector.load %arg4[%c0_3, %c0_4] : memref<1x128xf32, #tpu.memory_space<vmem>>, vector<1x128xf32>
    %5 = vector.broadcast %4 : vector<1x128xf32> to vector<128x128xf32>
    %6 = arith.addf %3, %5 : vector<128x128xf32>
    %cst = arith.constant 0.000000e+00 : f32
    %7 = vector.broadcast %cst : f32 to vector<128x128xf32>
    %8 = arith.maximumf %6, %7 : vector<128x128xf32>
    %c0_5 = arith.constant 0 : index
    %c0_6 = arith.constant 0 : index
    %9 = vector.load %arg5[%c0_5, %c0_6] : memref<128x128xf32, #tpu.memory_space<vmem>>, vector<128x128xf32>
    tpu.vector_store %arg5[%c0_5, %c0_6], %8 {strides = array<i32>} : memref<128x128xf32, #tpu.memory_space<vmem>>, vector<128x128xf32>,
    return
  }
  func.func @transform_0(%arg0: i32, %arg1: i32) -> (i32, i32) {
    %c0_i32 = arith.constant 0 : i32
    return %arg0, %arg1 : i32, i32
  }
  func.func @transform_1(%arg0: i32, %arg1: i32) -> (i32, i32) {
    %c0_i32 = arith.constant 0 : i32
    %c0_i32_0 = arith.constant 0 : i32
    return %c0_i32, %arg1 : i32, i32
  }
  func.func @transform_2(%arg0: i32, %arg1: i32) -> (i32, i32) {
    %c0_i32 = arith.constant 0 : i32
    %c0_i32_0 = arith.constant 0 : i32
    return %c0_i32, %arg1 : i32, i32
  }
  func.func @transform_3(%arg0: i32, %arg1: i32) -> (i32, i32) {
    %c0_i32 = arith.constant 0 : i32
    return %arg0, %arg1 : i32, i32
  }
}

module attributes {stable_mosaic.version = 11 : i64} {
  func.func @kernel(%arg0: i32, %arg1: i32, %arg2: memref<32x144xbf16, #tpu.memory_space<vmem>>, %arg3: memref<144x128xbf16, #tpu.memory_space<vmem>>, %arg4: memref<32x128xf32, #tpu.memory_space<vmem>>, %arg5: memref<1x8x128xf32, #tpu.memory_space<vmem>>) attributes {dimension_semantics = [#tpu.dimension_semantics<parallel>, #tpu.dimension_semantics<parallel>], iteration_bounds = array<i64: 1, 1>, scalar_prefetch = 0 : i64, scratch_operands = 0 : i64, tpu.core_type = #tpu.core_type<tc>, window_params = [{transform_indices = @transform_0, window_bounds = array<i64: 32, 144>}, {transform_indices = @transform_1, window_bounds = array<i64: 144, 128>}, {transform_indices = @transform_2, window_bounds = array<i64: 32, 128>}, {transform_indices = @transform_3, window_bounds = array<i64: 1, 8, 128>}]} {
    %c0 = arith.constant 0 : index
    %c0_0 = arith.constant 0 : index
    %0 = vector.load %arg2[%c0, %c0_0] : memref<32x144xbf16, #tpu.memory_space<vmem>>, vector<32x144xbf16>
    %c0_1 = arith.constant 0 : index
    %c0_2 = arith.constant 0 : index
    %1 = vector.load %arg3[%c0_1, %c0_2] : memref<144x128xbf16, #tpu.memory_space<vmem>>, vector<144x128xbf16>
    %cst = arith.constant dense<0.000000e+00> : vector<32x128xf32>
    %2 = tpu.matmul %0, %1, %cst {dimension_numbers = #tpu.dot_dimension_numbers<[1], [0], [0], [1], [0, 0, 1, 1], [], []>} : vector<32x144xbf16>, vector<144x128xbf16>, vector<32x128xf32> -> vector<32x128xf32>
    %c0_3 = arith.constant 0 : index
    %c0_4 = arith.constant 0 : index
    %3 = vector.load %arg4[%c0_3, %c0_4] : memref<32x128xf32, #tpu.memory_space<vmem>>, vector<32x128xf32>
    tpu.vector_store %arg4[%c0_3, %c0_4], %2 {strides = array<i32>} : memref<32x128xf32, #tpu.memory_space<vmem>>, vector<32x128xf32>,
    %cst_5 = arith.constant dense<0.000000e+00> : vector<128xf32>
    %4 = vector.multi_reduction <add>, %2, %cst_5 [0] : vector<32x128xf32> to vector<128xf32>
    %5 = vector.shape_cast %4 : vector<128xf32> to vector<1x128xf32>
    %6 = arith.mulf %2, %2 : vector<32x128xf32>
    %cst_6 = arith.constant dense<0.000000e+00> : vector<128xf32>
    %7 = vector.multi_reduction <add>, %6, %cst_6 [0] : vector<32x128xf32> to vector<128xf32>
    %8 = vector.shape_cast %7 : vector<128xf32> to vector<1x128xf32>
    %cst_7 = arith.constant 0.000000e+00 : f32
    %9 = vector.broadcast %cst_7 : f32 to vector<6x128xf32>
    %10 = tpu.concatenate %5, %8, %9 in 0 : vector<1x128xf32>, vector<1x128xf32>, vector<6x128xf32> -> vector<8x128xf32>
    %c0_8 = arith.constant 0 : index
    %c0_9 = arith.constant 0 : index
    %c0_10 = arith.constant 0 : index
    %11 = vector.load %arg5[%c0_8, %c0_9, %c0_10] : memref<1x8x128xf32, #tpu.memory_space<vmem>>, vector<1x8x128xf32>
    %12 = vector.shape_cast %11 : vector<1x8x128xf32> to vector<8x128xf32>
    %13 = vector.shape_cast %10 : vector<8x128xf32> to vector<1x8x128xf32>
    tpu.vector_store %arg5[%c0_8, %c0_9, %c0_10], %13 {strides = array<i32>} : memref<1x8x128xf32, #tpu.memory_space<vmem>>, vector<1x8x128xf32>,
    return
  }
  func.func @transform_0(%arg0: i32, %arg1: i32) -> (i32, i32) {
    %c0_i32 = arith.constant 0 : i32
    %c0_i32_0 = arith.constant 0 : i32
    return %arg0, %c0_i32 : i32, i32
  }
  func.func @transform_1(%arg0: i32, %arg1: i32) -> (i32, i32) {
    %c0_i32 = arith.constant 0 : i32
    %c0_i32_0 = arith.constant 0 : i32
    return %c0_i32, %arg1 : i32, i32
  }
  func.func @transform_2(%arg0: i32, %arg1: i32) -> (i32, i32) {
    %c0_i32 = arith.constant 0 : i32
    return %arg0, %arg1 : i32, i32
  }
  func.func @transform_3(%arg0: i32, %arg1: i32) -> (i32, i32, i32) {
    %c0_i32 = arith.constant 0 : i32
    %c0_i32_0 = arith.constant 0 : i32
    return %arg0, %c0_i32, %arg1 : i32, i32, i32
  }
}

module attributes {stable_mosaic.version = 11 : i64} {
  func.func @kernel(%arg0: i32, %arg1: i32, %arg2: memref<32x128xf32, #tpu.memory_space<vmem>>, %arg3: memref<1x128xf32, #tpu.memory_space<vmem>>, %arg4: memref<1x128xf32, #tpu.memory_space<vmem>>, %arg5: memref<32x128xf32, #tpu.memory_space<vmem>>) attributes {dimension_semantics = [#tpu.dimension_semantics<parallel>, #tpu.dimension_semantics<parallel>], iteration_bounds = array<i64: 1, 1>, scalar_prefetch = 0 : i64, scratch_operands = 0 : i64, tpu.core_type = #tpu.core_type<tc>, window_params = [{transform_indices = @transform_0, window_bounds = array<i64: 32, 128>}, {transform_indices = @transform_1, window_bounds = array<i64: 1, 128>}, {transform_indices = @transform_2, window_bounds = array<i64: 1, 128>}, {transform_indices = @transform_3, window_bounds = array<i64: 32, 128>}]} {
    %c0 = arith.constant 0 : index
    %c0_0 = arith.constant 0 : index
    %0 = vector.load %arg2[%c0, %c0_0] : memref<32x128xf32, #tpu.memory_space<vmem>>, vector<32x128xf32>
    %c0_1 = arith.constant 0 : index
    %c0_2 = arith.constant 0 : index
    %1 = vector.load %arg3[%c0_1, %c0_2] : memref<1x128xf32, #tpu.memory_space<vmem>>, vector<1x128xf32>
    %2 = vector.broadcast %1 : vector<1x128xf32> to vector<32x128xf32>
    %3 = arith.mulf %0, %2 : vector<32x128xf32>
    %c0_3 = arith.constant 0 : index
    %c0_4 = arith.constant 0 : index
    %4 = vector.load %arg4[%c0_3, %c0_4] : memref<1x128xf32, #tpu.memory_space<vmem>>, vector<1x128xf32>
    %5 = vector.broadcast %4 : vector<1x128xf32> to vector<32x128xf32>
    %6 = arith.addf %3, %5 : vector<32x128xf32>
    %cst = arith.constant 0.000000e+00 : f32
    %7 = vector.broadcast %cst : f32 to vector<32x128xf32>
    %8 = arith.maximumf %6, %7 : vector<32x128xf32>
    %c0_5 = arith.constant 0 : index
    %c0_6 = arith.constant 0 : index
    %9 = vector.load %arg5[%c0_5, %c0_6] : memref<32x128xf32, #tpu.memory_space<vmem>>, vector<32x128xf32>
    tpu.vector_store %arg5[%c0_5, %c0_6], %8 {strides = array<i32>} : memref<32x128xf32, #tpu.memory_space<vmem>>, vector<32x128xf32>,
    return
  }
  func.func @transform_0(%arg0: i32, %arg1: i32) -> (i32, i32) {
    %c0_i32 = arith.constant 0 : i32
    return %arg0, %arg1 : i32, i32
  }
  func.func @transform_1(%arg0: i32, %arg1: i32) -> (i32, i32) {
    %c0_i32 = arith.constant 0 : i32
    %c0_i32_0 = arith.constant 0 : i32
    return %c0_i32, %arg1 : i32, i32
  }
  func.func @transform_2(%arg0: i32, %arg1: i32) -> (i32, i32) {
    %c0_i32 = arith.constant 0 : i32
    %c0_i32_0 = arith.constant 0 : i32
    return %c0_i32, %arg1 : i32, i32
  }
  func.func @transform_3(%arg0: i32, %arg1: i32) -> (i32, i32) {
    %c0_i32 = arith.constant 0 : i32
    return %arg0, %arg1 : i32, i32
  }
}

module attributes {stable_mosaic.version = 11 : i64} {
  func.func @kernel(%arg0: i32, %arg1: i32, %arg2: memref<32x288xbf16, #tpu.memory_space<vmem>>, %arg3: memref<288x128xbf16, #tpu.memory_space<vmem>>, %arg4: memref<32x128xf32, #tpu.memory_space<vmem>>, %arg5: memref<1x8x128xf32, #tpu.memory_space<vmem>>) attributes {dimension_semantics = [#tpu.dimension_semantics<parallel>, #tpu.dimension_semantics<parallel>], iteration_bounds = array<i64: 1, 1>, scalar_prefetch = 0 : i64, scratch_operands = 0 : i64, tpu.core_type = #tpu.core_type<tc>, window_params = [{transform_indices = @transform_0, window_bounds = array<i64: 32, 288>}, {transform_indices = @transform_1, window_bounds = array<i64: 288, 128>}, {transform_indices = @transform_2, window_bounds = array<i64: 32, 128>}, {transform_indices = @transform_3, window_bounds = array<i64: 1, 8, 128>}]} {
    %c0 = arith.constant 0 : index
    %c0_0 = arith.constant 0 : index
    %0 = vector.load %arg2[%c0, %c0_0] : memref<32x288xbf16, #tpu.memory_space<vmem>>, vector<32x288xbf16>
    %c0_1 = arith.constant 0 : index
    %c0_2 = arith.constant 0 : index
    %1 = vector.load %arg3[%c0_1, %c0_2] : memref<288x128xbf16, #tpu.memory_space<vmem>>, vector<288x128xbf16>
    %cst = arith.constant dense<0.000000e+00> : vector<32x128xf32>
    %2 = tpu.matmul %0, %1, %cst {dimension_numbers = #tpu.dot_dimension_numbers<[1], [0], [0], [1], [0, 0, 1, 1], [], []>} : vector<32x288xbf16>, vector<288x128xbf16>, vector<32x128xf32> -> vector<32x128xf32>
    %c0_3 = arith.constant 0 : index
    %c0_4 = arith.constant 0 : index
    %3 = vector.load %arg4[%c0_3, %c0_4] : memref<32x128xf32, #tpu.memory_space<vmem>>, vector<32x128xf32>
    tpu.vector_store %arg4[%c0_3, %c0_4], %2 {strides = array<i32>} : memref<32x128xf32, #tpu.memory_space<vmem>>, vector<32x128xf32>,
    %cst_5 = arith.constant dense<0.000000e+00> : vector<128xf32>
    %4 = vector.multi_reduction <add>, %2, %cst_5 [0] : vector<32x128xf32> to vector<128xf32>
    %5 = vector.shape_cast %4 : vector<128xf32> to vector<1x128xf32>
    %6 = arith.mulf %2, %2 : vector<32x128xf32>
    %cst_6 = arith.constant dense<0.000000e+00> : vector<128xf32>
    %7 = vector.multi_reduction <add>, %6, %cst_6 [0] : vector<32x128xf32> to vector<128xf32>
    %8 = vector.shape_cast %7 : vector<128xf32> to vector<1x128xf32>
    %cst_7 = arith.constant 0.000000e+00 : f32
    %9 = vector.broadcast %cst_7 : f32 to vector<6x128xf32>
    %10 = tpu.concatenate %5, %8, %9 in 0 : vector<1x128xf32>, vector<1x128xf32>, vector<6x128xf32> -> vector<8x128xf32>
    %c0_8 = arith.constant 0 : index
    %c0_9 = arith.constant 0 : index
    %c0_10 = arith.constant 0 : index
    %11 = vector.load %arg5[%c0_8, %c0_9, %c0_10] : memref<1x8x128xf32, #tpu.memory_space<vmem>>, vector<1x8x128xf32>
    %12 = vector.shape_cast %11 : vector<1x8x128xf32> to vector<8x128xf32>
    %13 = vector.shape_cast %10 : vector<8x128xf32> to vector<1x8x128xf32>
    tpu.vector_store %arg5[%c0_8, %c0_9, %c0_10], %13 {strides = array<i32>} : memref<1x8x128xf32, #tpu.memory_space<vmem>>, vector<1x8x128xf32>,
    return
  }
  func.func @transform_0(%arg0: i32, %arg1: i32) -> (i32, i32) {
    %c0_i32 = arith.constant 0 : i32
    %c0_i32_0 = arith.constant 0 : i32
    return %arg0, %c0_i32 : i32, i32
  }
  func.func @transform_1(%arg0: i32, %arg1: i32) -> (i32, i32) {
    %c0_i32 = arith.constant 0 : i32
    %c0_i32_0 = arith.constant 0 : i32
    return %c0_i32, %arg1 : i32, i32
  }
  func.func @transform_2(%arg0: i32, %arg1: i32) -> (i32, i32) {
    %c0_i32 = arith.constant 0 : i32
    return %arg0, %arg1 : i32, i32
  }
  func.func @transform_3(%arg0: i32, %arg1: i32) -> (i32, i32, i32) {
    %c0_i32 = arith.constant 0 : i32
    %c0_i32_0 = arith.constant 0 : i32
    return %arg0, %c0_i32, %arg1 : i32, i32, i32
  }
}

module attributes {stable_mosaic.version = 11 : i64} {
  func.func @kernel(%arg0: i32, %arg1: i32, %arg2: memref<32x128xf32, #tpu.memory_space<vmem>>, %arg3: memref<1x128xf32, #tpu.memory_space<vmem>>, %arg4: memref<1x128xf32, #tpu.memory_space<vmem>>, %arg5: memref<32x128xf32, #tpu.memory_space<vmem>>, %arg6: memref<32x128xf32, #tpu.memory_space<vmem>>) attributes {dimension_semantics = [#tpu.dimension_semantics<parallel>, #tpu.dimension_semantics<parallel>], iteration_bounds = array<i64: 1, 1>, scalar_prefetch = 0 : i64, scratch_operands = 0 : i64, tpu.core_type = #tpu.core_type<tc>, window_params = [{transform_indices = @transform_0, window_bounds = array<i64: 32, 128>}, {transform_indices = @transform_1, window_bounds = array<i64: 1, 128>}, {transform_indices = @transform_2, window_bounds = array<i64: 1, 128>}, {transform_indices = @transform_3, window_bounds = array<i64: 32, 128>}, {transform_indices = @transform_4, window_bounds = array<i64: 32, 128>}]} {
    %c0 = arith.constant 0 : index
    %c0_0 = arith.constant 0 : index
    %0 = vector.load %arg2[%c0, %c0_0] : memref<32x128xf32, #tpu.memory_space<vmem>>, vector<32x128xf32>
    %c0_1 = arith.constant 0 : index
    %c0_2 = arith.constant 0 : index
    %1 = vector.load %arg3[%c0_1, %c0_2] : memref<1x128xf32, #tpu.memory_space<vmem>>, vector<1x128xf32>
    %2 = vector.broadcast %1 : vector<1x128xf32> to vector<32x128xf32>
    %3 = arith.mulf %0, %2 : vector<32x128xf32>
    %c0_3 = arith.constant 0 : index
    %c0_4 = arith.constant 0 : index
    %4 = vector.load %arg4[%c0_3, %c0_4] : memref<1x128xf32, #tpu.memory_space<vmem>>, vector<1x128xf32>
    %5 = vector.broadcast %4 : vector<1x128xf32> to vector<32x128xf32>
    %6 = arith.addf %3, %5 : vector<32x128xf32>
    %c0_5 = arith.constant 0 : index
    %c0_6 = arith.constant 0 : index
    %7 = vector.load %arg5[%c0_5, %c0_6] : memref<32x128xf32, #tpu.memory_space<vmem>>, vector<32x128xf32>
    %8 = arith.addf %6, %7 : vector<32x128xf32>
    %c0_7 = arith.constant 0 : index
    %c0_8 = arith.constant 0 : index
    %9 = vector.load %arg6[%c0_7, %c0_8] : memref<32x128xf32, #tpu.memory_space<vmem>>, vector<32x128xf32>
    tpu.vector_store %arg6[%c0_7, %c0_8], %8 {strides = array<i32>} : memref<32x128xf32, #tpu.memory_space<vmem>>, vector<32x128xf32>,
    return
  }
  func.func @transform_0(%arg0: i32, %arg1: i32) -> (i32, i32) {
    %c0_i32 = arith.constant 0 : i32
    return %arg0, %arg1 : i32, i32
  }
  func.func @transform_1(%arg0: i32, %arg1: i32) -> (i32, i32) {
    %c0_i32 = arith.constant 0 : i32
    %c0_i32_0 = arith.constant 0 : i32
    return %c0_i32, %arg1 : i32, i32
  }
  func.func @transform_2(%arg0: i32, %arg1: i32) -> (i32, i32) {
    %c0_i32 = arith.constant 0 : i32
    %c0_i32_0 = arith.constant 0 : i32
    return %c0_i32, %arg1 : i32, i32
  }
  func.func @transform_3(%arg0: i32, %arg1: i32) -> (i32, i32) {
    %c0_i32 = arith.constant 0 : i32
    return %arg0, %arg1 : i32, i32
  }
  func.func @transform_4(%arg0: i32, %arg1: i32) -> (i32, i32) {
    %c0_i32 = arith.constant 0 : i32
    return %arg0, %arg1 : i32, i32
  }
}

module attributes {stable_mosaic.version = 11 : i64} {
  func.func @kernel(%arg0: i32, %arg1: i32, %arg2: memref<128x288xbf16, #tpu.memory_space<vmem>>, %arg3: memref<288x128xbf16, #tpu.memory_space<vmem>>, %arg4: memref<128x128xf32, #tpu.memory_space<vmem>>, %arg5: memref<1x8x128xf32, #tpu.memory_space<vmem>>) attributes {dimension_semantics = [#tpu.dimension_semantics<parallel>, #tpu.dimension_semantics<parallel>], iteration_bounds = array<i64: 1, 1>, scalar_prefetch = 0 : i64, scratch_operands = 0 : i64, tpu.core_type = #tpu.core_type<tc>, window_params = [{transform_indices = @transform_0, window_bounds = array<i64: 128, 288>}, {transform_indices = @transform_1, window_bounds = array<i64: 288, 128>}, {transform_indices = @transform_2, window_bounds = array<i64: 128, 128>}, {transform_indices = @transform_3, window_bounds = array<i64: 1, 8, 128>}]} {
    %c0 = arith.constant 0 : index
    %c0_0 = arith.constant 0 : index
    %0 = vector.load %arg2[%c0, %c0_0] : memref<128x288xbf16, #tpu.memory_space<vmem>>, vector<128x288xbf16>
    %c0_1 = arith.constant 0 : index
    %c0_2 = arith.constant 0 : index
    %1 = vector.load %arg3[%c0_1, %c0_2] : memref<288x128xbf16, #tpu.memory_space<vmem>>, vector<288x128xbf16>
    %cst = arith.constant dense<0.000000e+00> : vector<128x128xf32>
    %2 = tpu.matmul %0, %1, %cst {dimension_numbers = #tpu.dot_dimension_numbers<[1], [0], [0], [1], [0, 0, 1, 1], [], []>} : vector<128x288xbf16>, vector<288x128xbf16>, vector<128x128xf32> -> vector<128x128xf32>
    %cst_3 = arith.constant 0.000000e+00 : f32
    %3 = vector.broadcast %cst_3 : f32 to vector<128x128xf32>
    %4 = arith.maximumf %2, %3 : vector<128x128xf32>
    %c0_4 = arith.constant 0 : index
    %c0_5 = arith.constant 0 : index
    %5 = vector.load %arg4[%c0_4, %c0_5] : memref<128x128xf32, #tpu.memory_space<vmem>>, vector<128x128xf32>
    tpu.vector_store %arg4[%c0_4, %c0_5], %4 {strides = array<i32>} : memref<128x128xf32, #tpu.memory_space<vmem>>, vector<128x128xf32>,
    %cst_6 = arith.constant dense<0.000000e+00> : vector<128xf32>
    %6 = vector.multi_reduction <add>, %4, %cst_6 [0] : vector<128x128xf32> to vector<128xf32>
    %7 = vector.shape_cast %6 : vector<128xf32> to vector<1x128xf32>
    %8 = arith.mulf %4, %4 : vector<128x128xf32>
    %cst_7 = arith.constant dense<0.000000e+00> : vector<128xf32>
    %9 = vector.multi_reduction <add>, %8, %cst_7 [0] : vector<128x128xf32> to vector<128xf32>
    %10 = vector.shape_cast %9 : vector<128xf32> to vector<1x128xf32>
    %cst_8 = arith.constant 0.000000e+00 : f32
    %11 = vector.broadcast %cst_8 : f32 to vector<6x128xf32>
    %12 = tpu.concatenate %7, %10, %11 in 0 : vector<1x128xf32>, vector<1x128xf32>, vector<6x128xf32> -> vector<8x128xf32>
    %c0_9 = arith.constant 0 : index
    %c0_10 = arith.constant 0 : index
    %c0_11 = arith.constant 0 : index
    %13 = vector.load %arg5[%c0_9, %c0_10, %c0_11] : memref<1x8x128xf32, #tpu.memory_space<vmem>>, vector<1x8x128xf32>
    %14 = vector.shape_cast %13 : vector<1x8x128xf32> to vector<8x128xf32>
    %15 = vector.shape_cast %12 : vector<8x128xf32> to vector<1x8x128xf32>
    tpu.vector_store %arg5[%c0_9, %c0_10, %c0_11], %15 {strides = array<i32>} : memref<1x8x128xf32, #tpu.memory_space<vmem>>, vector<1x8x128xf32>,
    return
  }
  func.func @transform_0(%arg0: i32, %arg1: i32) -> (i32, i32) {
    %c0_i32 = arith.constant 0 : i32
    %c0_i32_0 = arith.constant 0 : i32
    return %arg0, %c0_i32 : i32, i32
  }
  func.func @transform_1(%arg0: i32, %arg1: i32) -> (i32, i32) {
    %c0_i32 = arith.constant 0 : i32
    %c0_i32_0 = arith.constant 0 : i32
    return %c0_i32, %arg1 : i32, i32
  }
  func.func @transform_2(%arg0: i32, %arg1: i32) -> (i32, i32) {
    %c0_i32 = arith.constant 0 : i32
    return %arg0, %arg1 : i32, i32
  }
  func.func @transform_3(%arg0: i32, %arg1: i32) -> (i32, i32, i32) {
    %c0_i32 = arith.constant 0 : i32
    %c0_i32_0 = arith.constant 0 : i32
    return %arg0, %c0_i32, %arg1 : i32, i32, i32
  }
}

module attributes {stable_mosaic.version = 11 : i64} {
  func.func @kernel(%arg0: i32, %arg1: i32, %arg2: memref<128x128xf32, #tpu.memory_space<vmem>>, %arg3: memref<1x128xf32, #tpu.memory_space<vmem>>, %arg4: memref<1x128xf32, #tpu.memory_space<vmem>>, %arg5: memref<128x128xf32, #tpu.memory_space<vmem>>) attributes {dimension_semantics = [#tpu.dimension_semantics<parallel>, #tpu.dimension_semantics<parallel>], iteration_bounds = array<i64: 1, 1>, scalar_prefetch = 0 : i64, scratch_operands = 0 : i64, tpu.core_type = #tpu.core_type<tc>, window_params = [{transform_indices = @transform_0, window_bounds = array<i64: 128, 128>}, {transform_indices = @transform_1, window_bounds = array<i64: 1, 128>}, {transform_indices = @transform_2, window_bounds = array<i64: 1, 128>}, {transform_indices = @transform_3, window_bounds = array<i64: 128, 128>}]} {
    %c0 = arith.constant 0 : index
    %c0_0 = arith.constant 0 : index
    %0 = vector.load %arg2[%c0, %c0_0] : memref<128x128xf32, #tpu.memory_space<vmem>>, vector<128x128xf32>
    %c0_1 = arith.constant 0 : index
    %c0_2 = arith.constant 0 : index
    %1 = vector.load %arg3[%c0_1, %c0_2] : memref<1x128xf32, #tpu.memory_space<vmem>>, vector<1x128xf32>
    %2 = vector.broadcast %1 : vector<1x128xf32> to vector<128x128xf32>
    %3 = arith.mulf %0, %2 : vector<128x128xf32>
    %c0_3 = arith.constant 0 : index
    %c0_4 = arith.constant 0 : index
    %4 = vector.load %arg4[%c0_3, %c0_4] : memref<1x128xf32, #tpu.memory_space<vmem>>, vector<1x128xf32>
    %5 = vector.broadcast %4 : vector<1x128xf32> to vector<128x128xf32>
    %6 = arith.addf %3, %5 : vector<128x128xf32>
    %c0_5 = arith.constant 0 : index
    %c0_6 = arith.constant 0 : index
    %7 = vector.load %arg5[%c0_5, %c0_6] : memref<128x128xf32, #tpu.memory_space<vmem>>, vector<128x128xf32>
    tpu.vector_store %arg5[%c0_5, %c0_6], %6 {strides = array<i32>} : memref<128x128xf32, #tpu.memory_space<vmem>>, vector<128x128xf32>,
    return
  }
  func.func @transform_0(%arg0: i32, %arg1: i32) -> (i32, i32) {
    %c0_i32 = arith.constant 0 : i32
    return %arg0, %arg1 : i32, i32
  }
  func.func @transform_1(%arg0: i32, %arg1: i32) -> (i32, i32) {
    %c0_i32 = arith.constant 0 : i32
    %c0_i32_0 = arith.constant 0 : i32
    return %c0_i32, %arg1 : i32, i32
  }
  func.func @transform_2(%arg0: i32, %arg1: i32) -> (i32, i32) {
    %c0_i32 = arith.constant 0 : i32
    %c0_i32_0 = arith.constant 0 : i32
    return %c0_i32, %arg1 : i32, i32
  }
  func.func @transform_3(%arg0: i32, %arg1: i32) -> (i32, i32) {
    %c0_i32 = arith.constant 0 : i32
    return %arg0, %arg1 : i32, i32
  }
}

module attributes {stable_mosaic.version = 11 : i64} {
  func.func @kernel(%arg0: i32, %arg1: i32, %arg2: memref<256x144xbf16, #tpu.memory_space<vmem>>, %arg3: memref<144x128xbf16, #tpu.memory_space<vmem>>, %arg4: memref<256x128xf32, #tpu.memory_space<vmem>>, %arg5: memref<1x8x128xf32, #tpu.memory_space<vmem>>) attributes {dimension_semantics = [#tpu.dimension_semantics<parallel>, #tpu.dimension_semantics<parallel>], iteration_bounds = array<i64: 2, 1>, scalar_prefetch = 0 : i64, scratch_operands = 0 : i64, tpu.core_type = #tpu.core_type<tc>, window_params = [{transform_indices = @transform_0, window_bounds = array<i64: 256, 144>}, {transform_indices = @transform_1, window_bounds = array<i64: 144, 128>}, {transform_indices = @transform_2, window_bounds = array<i64: 256, 128>}, {transform_indices = @transform_3, window_bounds = array<i64: 1, 8, 128>}]} {
    %c0 = arith.constant 0 : index
    %c0_0 = arith.constant 0 : index
    %0 = vector.load %arg2[%c0, %c0_0] : memref<256x144xbf16, #tpu.memory_space<vmem>>, vector<256x144xbf16>
    %c0_1 = arith.constant 0 : index
    %c0_2 = arith.constant 0 : index
    %1 = vector.load %arg3[%c0_1, %c0_2] : memref<144x128xbf16, #tpu.memory_space<vmem>>, vector<144x128xbf16>
    %cst = arith.constant dense<0.000000e+00> : vector<256x128xf32>
    %2 = tpu.matmul %0, %1, %cst {dimension_numbers = #tpu.dot_dimension_numbers<[1], [0], [0], [1], [0, 0, 1, 1], [], []>} : vector<256x144xbf16>, vector<144x128xbf16>, vector<256x128xf32> -> vector<256x128xf32>
    %cst_3 = arith.constant 0.000000e+00 : f32
    %3 = vector.broadcast %cst_3 : f32 to vector<256x128xf32>
    %4 = arith.maximumf %2, %3 : vector<256x128xf32>
    %c0_4 = arith.constant 0 : index
    %c0_5 = arith.constant 0 : index
    %5 = vector.load %arg4[%c0_4, %c0_5] : memref<256x128xf32, #tpu.memory_space<vmem>>, vector<256x128xf32>
    tpu.vector_store %arg4[%c0_4, %c0_5], %4 {strides = array<i32>} : memref<256x128xf32, #tpu.memory_space<vmem>>, vector<256x128xf32>,
    %cst_6 = arith.constant dense<0.000000e+00> : vector<128xf32>
    %6 = vector.multi_reduction <add>, %4, %cst_6 [0] : vector<256x128xf32> to vector<128xf32>
    %7 = vector.shape_cast %6 : vector<128xf32> to vector<1x128xf32>
    %8 = arith.mulf %4, %4 : vector<256x128xf32>
    %cst_7 = arith.constant dense<0.000000e+00> : vector<128xf32>
    %9 = vector.multi_reduction <add>, %8, %cst_7 [0] : vector<256x128xf32> to vector<128xf32>
    %10 = vector.shape_cast %9 : vector<128xf32> to vector<1x128xf32>
    %cst_8 = arith.constant 0.000000e+00 : f32
    %11 = vector.broadcast %cst_8 : f32 to vector<6x128xf32>
    %12 = tpu.concatenate %7, %10, %11 in 0 : vector<1x128xf32>, vector<1x128xf32>, vector<6x128xf32> -> vector<8x128xf32>
    %c0_9 = arith.constant 0 : index
    %c0_10 = arith.constant 0 : index
    %c0_11 = arith.constant 0 : index
    %13 = vector.load %arg5[%c0_9, %c0_10, %c0_11] : memref<1x8x128xf32, #tpu.memory_space<vmem>>, vector<1x8x128xf32>
    %14 = vector.shape_cast %13 : vector<1x8x128xf32> to vector<8x128xf32>
    %15 = vector.shape_cast %12 : vector<8x128xf32> to vector<1x8x128xf32>
    tpu.vector_store %arg5[%c0_9, %c0_10, %c0_11], %15 {strides = array<i32>} : memref<1x8x128xf32, #tpu.memory_space<vmem>>, vector<1x8x128xf32>,
    return
  }
  func.func @transform_0(%arg0: i32, %arg1: i32) -> (i32, i32) {
    %c0_i32 = arith.constant 0 : i32
    %c0_i32_0 = arith.constant 0 : i32
    return %arg0, %c0_i32 : i32, i32
  }
  func.func @transform_1(%arg0: i32, %arg1: i32) -> (i32, i32) {
    %c0_i32 = arith.constant 0 : i32
    %c0_i32_0 = arith.constant 0 : i32
    return %c0_i32, %arg1 : i32, i32
  }
  func.func @transform_2(%arg0: i32, %arg1: i32) -> (i32, i32) {
    %c0_i32 = arith.constant 0 : i32
    return %arg0, %arg1 : i32, i32
  }
  func.func @transform_3(%arg0: i32, %arg1: i32) -> (i32, i32, i32) {
    %c0_i32 = arith.constant 0 : i32
    %c0_i32_0 = arith.constant 0 : i32
    return %arg0, %c0_i32, %arg1 : i32, i32, i32
  }
}

module attributes {stable_mosaic.version = 11 : i64} {
  func.func @kernel(%arg0: i32, %arg1: i32, %arg2: memref<256x128xf32, #tpu.memory_space<vmem>>, %arg3: memref<1x128xf32, #tpu.memory_space<vmem>>, %arg4: memref<1x128xf32, #tpu.memory_space<vmem>>, %arg5: memref<256x128xf32, #tpu.memory_space<vmem>>) attributes {dimension_semantics = [#tpu.dimension_semantics<parallel>, #tpu.dimension_semantics<parallel>], iteration_bounds = array<i64: 2, 1>, scalar_prefetch = 0 : i64, scratch_operands = 0 : i64, tpu.core_type = #tpu.core_type<tc>, window_params = [{transform_indices = @transform_0, window_bounds = array<i64: 256, 128>}, {transform_indices = @transform_1, window_bounds = array<i64: 1, 128>}, {transform_indices = @transform_2, window_bounds = array<i64: 1, 128>}, {transform_indices = @transform_3, window_bounds = array<i64: 256, 128>}]} {
    %c0 = arith.constant 0 : index
    %c0_0 = arith.constant 0 : index
    %0 = vector.load %arg2[%c0, %c0_0] : memref<256x128xf32, #tpu.memory_space<vmem>>, vector<256x128xf32>
    %c0_1 = arith.constant 0 : index
    %c0_2 = arith.constant 0 : index
    %1 = vector.load %arg3[%c0_1, %c0_2] : memref<1x128xf32, #tpu.memory_space<vmem>>, vector<1x128xf32>
    %2 = vector.broadcast %1 : vector<1x128xf32> to vector<256x128xf32>
    %3 = arith.mulf %0, %2 : vector<256x128xf32>
    %c0_3 = arith.constant 0 : index
    %c0_4 = arith.constant 0 : index
    %4 = vector.load %arg4[%c0_3, %c0_4] : memref<1x128xf32, #tpu.memory_space<vmem>>, vector<1x128xf32>
    %5 = vector.broadcast %4 : vector<1x128xf32> to vector<256x128xf32>
    %6 = arith.addf %3, %5 : vector<256x128xf32>
    %c0_5 = arith.constant 0 : index
    %c0_6 = arith.constant 0 : index
    %7 = vector.load %arg5[%c0_5, %c0_6] : memref<256x128xf32, #tpu.memory_space<vmem>>, vector<256x128xf32>
    tpu.vector_store %arg5[%c0_5, %c0_6], %6 {strides = array<i32>} : memref<256x128xf32, #tpu.memory_space<vmem>>, vector<256x128xf32>,
    return
  }
  func.func @transform_0(%arg0: i32, %arg1: i32) -> (i32, i32) {
    %c0_i32 = arith.constant 0 : i32
    return %arg0, %arg1 : i32, i32
  }
  func.func @transform_1(%arg0: i32, %arg1: i32) -> (i32, i32) {
    %c0_i32 = arith.constant 0 : i32
    %c0_i32_0 = arith.constant 0 : i32
    return %c0_i32, %arg1 : i32, i32
  }
  func.func @transform_2(%arg0: i32, %arg1: i32) -> (i32, i32) {
    %c0_i32 = arith.constant 0 : i32
    %c0_i32_0 = arith.constant 0 : i32
    return %c0_i32, %arg1 : i32, i32
  }
  func.func @transform_3(%arg0: i32, %arg1: i32) -> (i32, i32) {
    %c0_i32 = arith.constant 0 : i32
    return %arg0, %arg1 : i32, i32
  }
}

module attributes {stable_mosaic.version = 11 : i64} {
  func.func @kernel(%arg0: i32, %arg1: i32, %arg2: memref<256x392xbf16, #tpu.memory_space<vmem>>, %arg3: memref<392x128xbf16, #tpu.memory_space<vmem>>, %arg4: memref<1x128xf32, #tpu.memory_space<vmem>>, %arg5: memref<256x128xf32, #tpu.memory_space<vmem>>) attributes {dimension_semantics = [#tpu.dimension_semantics<parallel>, #tpu.dimension_semantics<parallel>], iteration_bounds = array<i64: 2, 1>, scalar_prefetch = 0 : i64, scratch_operands = 0 : i64, tpu.core_type = #tpu.core_type<tc>, window_params = [{transform_indices = @transform_0, window_bounds = array<i64: 256, 392>}, {transform_indices = @transform_1, window_bounds = array<i64: 392, 128>}, {transform_indices = @transform_2, window_bounds = array<i64: 1, 128>}, {transform_indices = @transform_3, window_bounds = array<i64: 256, 128>}]} {
    %c0 = arith.constant 0 : index
    %c0_0 = arith.constant 0 : index
    %0 = vector.load %arg2[%c0, %c0_0] : memref<256x392xbf16, #tpu.memory_space<vmem>>, vector<256x392xbf16>
    %c0_1 = arith.constant 0 : index
    %c0_2 = arith.constant 0 : index
    %1 = vector.load %arg3[%c0_1, %c0_2] : memref<392x128xbf16, #tpu.memory_space<vmem>>, vector<392x128xbf16>
    %cst = arith.constant dense<0.000000e+00> : vector<256x128xf32>
    %2 = tpu.matmul %0, %1, %cst {dimension_numbers = #tpu.dot_dimension_numbers<[1], [0], [0], [1], [0, 0, 1, 1], [], []>} : vector<256x392xbf16>, vector<392x128xbf16>, vector<256x128xf32> -> vector<256x128xf32>
    %c0_3 = arith.constant 0 : index
    %c0_4 = arith.constant 0 : index
    %3 = vector.load %arg4[%c0_3, %c0_4] : memref<1x128xf32, #tpu.memory_space<vmem>>, vector<1x128xf32>
    %4 = vector.broadcast %3 : vector<1x128xf32> to vector<256x128xf32>
    %5 = arith.addf %2, %4 : vector<256x128xf32>
    %6 = math.tanh %5 : vector<256x128xf32>
    %c0_5 = arith.constant 0 : index
    %c0_6 = arith.constant 0 : index
    %7 = vector.load %arg5[%c0_5, %c0_6] : memref<256x128xf32, #tpu.memory_space<vmem>>, vector<256x128xf32>
    tpu.vector_store %arg5[%c0_5, %c0_6], %6 {strides = array<i32>} : memref<256x128xf32, #tpu.memory_space<vmem>>, vector<256x128xf32>,
    return
  }
  func.func @transform_0(%arg0: i32, %arg1: i32) -> (i32, i32) {
    %c0_i32 = arith.constant 0 : i32
    %c0_i32_0 = arith.constant 0 : i32
    return %arg0, %c0_i32 : i32, i32
  }
  func.func @transform_1(%arg0: i32, %arg1: i32) -> (i32, i32) {
    %c0_i32 = arith.constant 0 : i32
    %c0_i32_0 = arith.constant 0 : i32
    return %c0_i32, %arg1 : i32, i32
  }
  func.func @transform_2(%arg0: i32, %arg1: i32) -> (i32, i32) {
    %c0_i32 = arith.constant 0 : i32
    %c0_i32_0 = arith.constant 0 : i32
    return %c0_i32, %arg1 : i32, i32
  }
  func.func @transform_3(%arg0: i32, %arg1: i32) -> (i32, i32) {
    %c0_i32 = arith.constant 0 : i32
    return %arg0, %arg1 : i32, i32
  }
}

</mosaic_0001>

<bundles_post_ra>
// kernel: resnet_forward.19
= control target key start
LH: loop header
LB: loop body
LE: loop exit
PB: predicated region body
PF: predicated region fallthrough
CT: control target
= control target key end

     0   :  { %s1346_s12 = smov 0   ;;  %s1348_s13 = smov 0   ;;  %s1641_s0 = inlined_call_operand.vmem [shape: bf16[512,196], index: 0, kind: input, shape index: {}]   ;;  %s1642_s1 = inlined_call_operand.vmem [shape: bf16[196,128], index: 1, kind: input, shape index: {}]   ;;  %s1643_s2 = inlined_call_operand.vmem [shape: f32[512,128], index: 2, kind: output, shape index: {0}]   ;;  %s1644_s3 = inlined_call_operand.vmem [shape: f32[2,8,128], index: 3, kind: output, shape index: {1}]  }
   0x1   :  { %s1350_s14 = smov 0  }
   0x2 LB: > { %s26_s15 = sadd.s32 1, %s1320_s13  ;;  %p1019_p0 = scmp.ge.s32.totalorder %s1324_s14, 1  ;;  %s1324_s14 = sphi %s1350_s14, %s14_s14   ;;  %s1320_s13 = sphi %s1348_s13, %s1646_s13   ;;  %s1316_s12 = sphi %s1346_s12, %s1645_s12  }
   0x3   : > { %p28_p1 = scmp.ge.s32.totalorder %s26_s15, 2  ;;  %p167_p2 = scmp.lt.s32.totalorder %s1324_s14, 3 }
   0x5   : > { %s1648_s15 = smov (%p28_p1, %s26_s15), 0  ;;  %p168_p3 = pnand %p1019_p0, %p167_p2 }
   0x6   : > { %s1020_s20 = sshll.u32 (!%p168_p3), %s1316_s12, 5  ;;  %p226_p5 = scmp.lt.s32.totalorder (!%p168_p3), %s1316_s12, 1 }
   0x7   : > { %171 = sbr.rel (%p168_p3) target bundleno = 348 (0x15c), region = 28  ;;  %p207_p4 = scmp.lt.s32.totalorder (!%p168_p3), %s1020_s20, 63 }
   0xc   : > { %v1260_v0 = vld [vmem:[%s1642_s1 + $0x38] sm:$0xff]  ;;  %v290_v1 = vld [vmem:[%s1642_s1 + $0x60] sm:$0x3]  ;;  %vm559_vm0 = vcmask 1041408   ;;  %v1259_v3 = vld [vmem:[%s1642_s1 + $0x30] sm:$0xff]  ;;  %s1650_s20 = smov (!%p207_p4, %s1020_s20), 63 }
   0xd   : > { %v484_v2 = vunpack.c.l.b16 %v290_v1  ;;  %563 = vmatpush.bf16.msra.mxu0 %v1260_v0  ;;  %1265 = vmatpush.bf16.msra.mxu2 %v1260_v0  ;;  %v1264_v6 = vld [vmem:[%s1642_s1 + $0x58] sm:$0xff]  ;;  %v1258_v7 = vld [vmem:[%s1642_s1 + $0x28] sm:$0xff]  ;;  %v1263_v8 = vld [vmem:[%s1642_s1 + $0x50] sm:$0xff]  ;;  %s1220_s4 = sshll.u32 %s1650_s20, 3  ;;  %vm510_vm1 = vcmask 556032   ;;  %s1652_s12 = smov (!%p226_p5, %s1316_s12), 1 }
   0xe   : > { %v1257_v9 = vld [vmem:[%s1642_s1 + $0x20] sm:$0xff]  ;;  %v1262_v10 = vld [vmem:[%s1642_s1 + $0x48] sm:$0xff]  ;;  %v1256_v11 = vld [vmem:[%s1642_s1 + $0x18] sm:$0xff]  ;;  %s1403_s11 = scalar_lea.vmem %s1641_s0, %s1220_s4  ;;  %s1502_s27 = scalar_lea.vmem %s1643_s2, %s1220_s4  ;;  %vm879_vm2 = vcmask 1040384  }
   0xf   : > { %v497_v4 = vpack.c.b16 %v484_v2, %v484_v2  ;;  %v1261_v12 = vld [vmem:[%s1642_s1 + $0x40] sm:$0xff]  ;;  %v1255_v13 = vld [vmem:[%s1642_s1 + $0x10] sm:$0xff]  ;;  %v1030_v15 = vld [vmem:[%s1403_s11 + $0x8] sm:$0xf0]  ;;  %s1025_s20 = sshll.u32 %s1652_s12, 3 }
  0x10   : > { %v1221_v14 = vld [vmem:[%s1403_s11 + $0x4] sm:$0xf]  ;;  %v1254_v17 = vld [vmem:[%s1642_s1 + $0x8] sm:$0xff]  ;;  %v1028_v19 = vld [vmem:[%s1403_s11] sm:$0xf]  ;;  %s232_s30 = scalar_lea.vmem %s1644_s3, %s1025_s20 }
  0x11   : > { %v561_v5 = vsel %vm559_vm0, %v497_v4, 0  ;;  %564 = vmatpush.bf16.msra.mxu0 %v1259_v3  ;;  %1266 = vmatpush.bf16.msra.mxu2 %v1259_v3  ;;  %v1033_v16 = vor.u32 %v1221_v14, %v1030_v15  ;;  %v1253_v18 = vld [vmem:[%s1642_s1] sm:$0xff]  ;;  %v1222_v20 = vld [vmem:[%s1403_s11 + $0x4] sm:$0xf0]  ;;  %v1239_v25 = vld [vmem:[%s1403_s11 + $0x94] sm:$0xf] }
  0x12   : > { %655 = vmatpush.bf16.msra.mxu1 %v561_v5  ;;  %1273 = vmatpush.bf16.msra.mxu3 %v561_v5  ;;  %v1092_v21 = vld [vmem:[%s1403_s11 + $0x80] sm:$0xf]  ;;  %v1238_v22 = vld [vmem:[%s1403_s11 + $0x84] sm:$0xf0]  ;;  %v1029_v23 = vor.u32 %v1222_v20, %v1028_v19  ;;  %v1223_v26 = vld [vmem:[%s1403_s11 + $0x14] sm:$0xf] }
  0x13   : > { %v1093_v24 = vor.u32 %v1238_v22, %v1092_v21  ;;  %v1038_v27 = vld [vmem:[%s1403_s11 + $0x18] sm:$0xf0]  ;;  %v1036_v31 = vld [vmem:[%s1403_s11 + $0x10] sm:$0xf]  ;;  %v1224_v32 = vld [vmem:[%s1403_s11 + $0x14] sm:$0xf0] }
  0x14   : > { %v1102_v28 = vld [vmem:[%s1403_s11 + $0x98] sm:$0xf0]  ;;  %v1041_v30 = vor.u32 %v1223_v26, %v1038_v27  ;;  %v1100_v33 = vld [vmem:[%s1403_s11 + $0x90] sm:$0xf]  ;;  %v1240_v34 = vld [vmem:[%s1403_s11 + $0x94] sm:$0xf0]  ;;  %v1037_v35 = vor.u32 %v1224_v32, %v1036_v31 }
  0x15   : > { %565 = vmatpush.bf16.msra.mxu0 %v1258_v7  ;;  %1267 = vmatpush.bf16.msra.mxu2 %v1258_v7  ;;  %v1105_v29 = vor.u32 %v1239_v25, %v1102_v28  ;;  %v1101_v36 = vor.u32 %v1240_v34, %v1100_v33  ;;  %v1241_v37 = vld [vmem:[%s1403_s11 + $0xa4] sm:$0xf]  ;;  %v1046_v39 = vld [vmem:[%s1403_s11 + $0x28] sm:$0xf0]  ;;  %v1044_v43 = vld [vmem:[%s1403_s11 + $0x20] sm:$0xf] }
  0x16   : > { %656 = vmatpush.bf16.msra.mxu1 %v1264_v6  ;;  %1274 = vmatpush.bf16.msra.mxu3 %v1264_v6  ;;  %v1225_v38 = vld [vmem:[%s1403_s11 + $0x24] sm:$0xf]  ;;  %v1110_v40 = vld [vmem:[%s1403_s11 + $0xa8] sm:$0xf0]  ;;  %v1226_v44 = vld [vmem:[%s1403_s11 + $0x24] sm:$0xf0] }
  0x17   : > { %v1113_v41 = vor.u32 %v1241_v37, %v1110_v40  ;;  %v1049_v42 = vor.u32 %v1225_v38, %v1046_v39  ;;  %v1108_v45 = vld [vmem:[%s1403_s11 + $0xa0] sm:$0xf]  ;;  %v1242_v46 = vld [vmem:[%s1403_s11 + $0xa4] sm:$0xf0]  ;;  %v1045_v47 = vor.u32 %v1226_v44, %v1044_v43  ;;  %v1243_v49 = vld [vmem:[%s1403_s11 + $0xb4] sm:$0xf] }
  0x18   : > { %v1109_v48 = vor.u32 %v1242_v46, %v1108_v45  ;;  %v1227_v50 = vld [vmem:[%s1403_s11 + $0x34] sm:$0xf]  ;;  %v1054_v51 = vld [vmem:[%s1403_s11 + $0x38] sm:$0xf0]  ;;  %v1052_v55 = vld [vmem:[%s1403_s11 + $0x30] sm:$0xf] }
  0x19   : > { %566 = vmatpush.bf16.msra.mxu0 %v1257_v9  ;;  %1268 = vmatpush.bf16.msra.mxu2 %v1257_v9  ;;  %v1118_v52 = vld [vmem:[%s1403_s11 + $0xb8] sm:$0xf0]  ;;  %v1057_v54 = vor.u32 %v1227_v50, %v1054_v51  ;;  %v1228_v56 = vld [vmem:[%s1403_s11 + $0x34] sm:$0xf0]  ;;  %v1116_v57 = vld [vmem:[%s1403_s11 + $0xb0] sm:$0xf] }
  0x1a   : > { %657 = vmatpush.bf16.msra.mxu1 %v1263_v8  ;;  %1275 = vmatpush.bf16.msra.mxu3 %v1263_v8  ;;  %v1121_v53 = vor.u32 %v1243_v49, %v1118_v52  ;;  %v1244_v58 = vld [vmem:[%s1403_s11 + $0xb4] sm:$0xf0]  ;;  %v1053_v59 = vor.u32 %v1228_v56, %v1052_v55  ;;  %v1245_v61 = vld [vmem:[%s1403_s11 + $0xc4] sm:$0xf]  ;;  %v1062_v63 = vld [vmem:[%s1403_s11 + $0x48] sm:$0xf0] }
  0x1b   : > { %v1117_v60 = vor.u32 %v1244_v58, %v1116_v57  ;;  %v1229_v62 = vld [vmem:[%s1403_s11 + $0x44] sm:$0xf]  ;;  %v1126_v0 = vld [vmem:[%s1403_s11 + $0xc8] sm:$0xf0]  ;;  %v1060_v3 = vld [vmem:[%s1403_s11 + $0x40] sm:$0xf] }
  0x1c   : > { %v1129_v1 = vor.u32 %v1245_v61, %v1126_v0  ;;  %v1065_v2 = vor.u32 %v1229_v62, %v1062_v63  ;;  %v1230_v4 = vld [vmem:[%s1403_s11 + $0x44] sm:$0xf0]  ;;  %v1124_v5 = vld [vmem:[%s1403_s11 + $0xc0] sm:$0xf]  ;;  %v1247_v9 = vld [vmem:[%s1403_s11 + $0xd4] sm:$0xf] }
  0x1d   : > { %567 = vmatpush.bf16.msra.mxu0 %v1256_v11  ;;  %1269 = vmatpush.bf16.msra.mxu2 %v1256_v11  ;;  %v1246_v6 = vld [vmem:[%s1403_s11 + $0xc4] sm:$0xf0]  ;;  %v1061_v7 = vor.u32 %v1230_v4, %v1060_v3  ;;  %v1070_v11 = vld [vmem:[%s1403_s11 + $0x58] sm:$0xf0]  ;;  %v1068_v15 = vld [vmem:[%s1403_s11 + $0x50] sm:$0xf] }
  0x1e   : > { %658 = vmatpush.bf16.msra.mxu1 %v1262_v10  ;;  %1276 = vmatpush.bf16.msra.mxu3 %v1262_v10  ;;  %v1125_v8 = vor.u32 %v1246_v6, %v1124_v5  ;;  %v1231_v10 = vld [vmem:[%s1403_s11 + $0x54] sm:$0xf]  ;;  %v1233_v21 = vld [vmem:[%s1403_s11 + $0x64] sm:$0xf]  ;;  %v1078_v22 = vld [vmem:[%s1403_s11 + $0x68] sm:$0xf0] }
  0x1f   : > { %v1073_v14 = vor.u32 %v1231_v10, %v1070_v11  ;;  %v1142_v25 = vld [vmem:[%s1403_s11 + $0xe8] sm:$0xf0]  ;;  %v1076_v27 = vld [vmem:[%s1403_s11 + $0x60] sm:$0xf]  ;;  %v1234_v28 = vld [vmem:[%s1403_s11 + $0x64] sm:$0xf0] }
  0x20   : > { %v1077_v31 = vor.u32 %v1234_v28, %v1076_v27  ;;  %v1235_v33 = vld [vmem:[%s1403_s11 + $0x74] sm:$0xf]  ;;  %v1086_v34 = vld [vmem:[%s1403_s11 + $0x78] sm:$0xf0]  ;;  %v1084_v39 = vld [vmem:[%s1403_s11 + $0x70] sm:$0xf] }
  0x21   : > { %568 = vmatpush.bf16.msra.mxu0 %v1255_v13  ;;  %1270 = vmatpush.bf16.msra.mxu2 %v1255_v13  ;;  %v1150_v37 = vld [vmem:[%s1403_s11 + $0xf8] sm:$0xf0]  ;;  %v1236_v40 = vld [vmem:[%s1403_s11 + $0x74] sm:$0xf0]  ;;  %v1237_v45 = vld [vmem:[%s1403_s11 + $0x84] sm:$0xf] }
  0x22   : > { %659 = vmatpush.bf16.msra.mxu1 %v1261_v12  ;;  %1277 = vmatpush.bf16.msra.mxu3 %v1261_v12  ;;  %v1134_v12 = vld [vmem:[%s1403_s11 + $0xd8] sm:$0xf0]  ;;  %v1085_v43 = vor.u32 %v1236_v40, %v1084_v39  ;;  %v1094_v46 = vld [vmem:[%s1403_s11 + $0x88] sm:$0xf0] }
  0x23   : > { %v1137_v13 = vor.u32 %v1247_v9, %v1134_v12 }
  0x25   : > { %1202 = vmatmul.msk.bf16.vlgmr.msra.gmra.mxu1 %vm510_vm1, %v1033_v16  ;;  %569 = vmatpush.bf16.msra.mxu0 %v1254_v17  ;;  %v1232_v16 = vld [vmem:[%s1403_s11 + $0x54] sm:$0xf0] }
  0x26   : > { %1271 = vmatpush.bf16.msra.mxu2 %v1254_v17  ;;  %1211 = vmatmul.msk.bf16.vlgmr.msra.gmra.mxu3 %vm510_vm1, %v1105_v29  ;;  %v1132_v17 = vld [vmem:[%s1403_s11 + $0xd0] sm:$0xf]  ;;  %v1069_v19 = vor.u32 %v1232_v16, %v1068_v15  ;;  %v1140_v29 = vld [vmem:[%s1403_s11 + $0xe0] sm:$0xf] }
  0x29   : > { %570 = vmatpush.bf16.msra.mxu0 %v1253_v18 }
  0x2a   : > { %1272 = vmatpush.bf16.msra.mxu2 %v1253_v18  ;;  %v1248_v18 = vld [vmem:[%s1403_s11 + $0xd4] sm:$0xf0] }
  0x2b   : > { %v1133_v20 = vor.u32 %v1248_v18, %v1132_v17 }
  0x2c   : > { %571 = vmatmul.bf16.vlgmr.msra.gmra.mxu0 %v1029_v23  ;;  %v1249_v23 = vld [vmem:[%s1403_s11 + $0xe4] sm:$0xf] }
  0x2d   : > { %611 = vmatmul.bf16.vlgmr.msra.gmra.mxu2 %v1093_v24  ;;  %v1081_v24 = vor.u32 %v1233_v21, %v1078_v22  ;;  %v1145_v26 = vor.u32 %v1249_v23, %v1142_v25 }
  0x35   : > { %1203 = vmatmul.msk.bf16.gmra.mxu1 %vm510_vm1, %v1041_v30  ;;  %v1250_v30 = vld [vmem:[%s1403_s11 + $0xe4] sm:$0xf0] }
  0x36   : > { %1212 = vmatmul.msk.bf16.gmra.mxu3 %vm510_vm1, %v1113_v41  ;;  %v1141_v32 = vor.u32 %v1250_v30, %v1140_v29  ;;  %v1148_v41 = vld [vmem:[%s1403_s11 + $0xf0] sm:$0xf] }
  0x3c   : > { %576 = vmatmul.bf16.gmra.mxu0 %v1037_v35  ;;  %v1251_v35 = vld [vmem:[%s1403_s11 + $0xf4] sm:$0xf] }
  0x3d   : > { %616 = vmatmul.bf16.gmra.mxu2 %v1101_v36  ;;  %v1089_v36 = vor.u32 %v1235_v33, %v1086_v34  ;;  %v1153_v38 = vor.u32 %v1251_v35, %v1150_v37 }
  0x45   : > { %1204 = vmatmul.msk.bf16.gmra.mxu1 %vm510_vm1, %v1049_v42  ;;  %v1252_v42 = vld [vmem:[%s1403_s11 + $0xf4] sm:$0xf0] }
  0x46   : > { %1213 = vmatmul.msk.bf16.gmra.mxu3 %vm510_vm1, %v1121_v53  ;;  %v1149_v44 = vor.u32 %v1252_v42, %v1148_v41 }
  0x4c   : > { %581 = vmatmul.bf16.gmra.mxu0 %v1045_v47  ;;  %v1097_v47 = vor.u32 %v1237_v45, %v1094_v46 }
  0x4d   : > { %621 = vmatmul.bf16.gmra.mxu2 %v1109_v48 }
  0x55   : > { %1205 = vmatmul.msk.bf16.gmra.mxu1 %vm510_vm1, %v1057_v54 }
  0x56   : > { %1214 = vmatmul.msk.bf16.gmra.mxu3 %vm510_vm1, %v1129_v1 }
  0x5c   : > { %586 = vmatmul.bf16.gmra.mxu0 %v1053_v59 }
  0x5d   : > { %626 = vmatmul.bf16.gmra.mxu2 %v1117_v60 }
  0x65   : > { %1206 = vmatmul.msk.bf16.gmra.mxu1 %vm510_vm1, %v1065_v2 }
  0x66   : > { %1215 = vmatmul.msk.bf16.gmra.mxu3 %vm510_vm1, %v1137_v13 }
  0x6c   : > { %591 = vmatmul.bf16.gmra.mxu0 %v1061_v7 }
  0x6d   : > { %631 = vmatmul.bf16.gmra.mxu2 %v1125_v8 }
  0x75   : > { %1207 = vmatmul.msk.bf16.gmra.mxu1 %vm510_vm1, %v1073_v14 }
  0x76   : > { %1216 = vmatmul.msk.bf16.gmra.mxu3 %vm510_vm1, %v1145_v26 }
  0x7c   : > { %596 = vmatmul.bf16.gmra.mxu0 %v1069_v19 }
  0x7d   : > { %636 = vmatmul.bf16.gmra.mxu2 %v1133_v20 }
  0x85   : > { %1208 = vmatmul.msk.bf16.gmra.mxu1 %vm510_vm1, %v1081_v24 }
  0x86   : > { %1217 = vmatmul.msk.bf16.gmra.mxu3 %vm510_vm1, %v1153_v38 }
  0x8c   : > { %601 = vmatmul.bf16.gmra.mxu0 %v1077_v31 }
  0x8d   : > { %641 = vmatmul.bf16.gmra.mxu2 %v1141_v32 }
  0x95   : > { %1209 = vmatmul.msk.bf16.gmra.mxu1 %vm510_vm1, %v1089_v36 }
  0x9c   : > { %606 = vmatmul.bf16.gmra.mxu0 %v1085_v43 }
  0x9d   : > { %646 = vmatmul.bf16.gmra.mxu2 %v1149_v44 }
  0xa2   : > { %v661_v48 = vpop.f32.mrf.mxu1 }
  0xa5   : > { %1210 = vmatmul.msk.bf16.gmra.mxu1 %vm510_vm1, %v1097_v47 }
  0xa9   : > { %v572_v50 = vpop.f32.mrf.mxu0  ;;  %v706_v59 = vpop.f32.mrf.mxu3 }
  0xaa   : > { %v663_v49 = vpop.f32.mrf.mxu1  ;;  %v662_v51 = vadd.f32 %v661_v48, %v572_v50 }
  0xac   : > { %741 = vst [vmem:[%s1502_s27] sm:$0xff] %v662_v51  ;;  %v810_v56 = vmul.f32 %v662_v51, %v662_v51 }
  0xb0   : > { %v1505_v52 = vpop.f32.mrf.mxu2 }
  0xb1   : > { %v574_v54 = vpop.f32.mrf.mxu0  ;;  %v708_v3 = vpop.f32.mrf.mxu3 }
  0xb2   : > { %v666_v53 = vpop.f32.mrf.mxu1  ;;  %v664_v55 = vadd.f32 %v663_v49, %v574_v54 }
  0xb4   : > { %742 = vst [vmem:[%s1502_s27 + $0x8] sm:$0xff] %v664_v55  ;;  %v773_v57 = vadd.f32 %v664_v55, %v662_v51  ;;  %v811_v58 = vmul.f32 %v664_v55, %v664_v55 }
  0xb6   : > { %v842_v60 = vadd.f32 %v811_v58, %v810_v56 }
  0xb8   : > { %v1508_v61 = vpop.f32.mrf.mxu2 }
  0xb9   : > { %v577_v63 = vpop.f32.mrf.mxu0  ;;  %v711_v12 = vpop.f32.mrf.mxu3 }
  0xba   : > { %v668_v62 = vpop.f32.mrf.mxu1  ;;  %v667_v0 = vadd.f32 %v666_v53, %v577_v63 }
  0xbc   : > { %743 = vst [vmem:[%s1502_s27 + $0x10] sm:$0xff] %v667_v0  ;;  %v774_v1 = vadd.f32 %v773_v57, %v667_v0  ;;  %v812_v2 = vmul.f32 %v667_v0, %v667_v0 }
  0xbe   : > { %v843_v4 = vadd.f32 %v842_v60, %v812_v2 }
  0xc0   : > { %v617_v5 = vpop.f32.mrf.mxu2 }
  0xc1   : > { %v579_v7 = vpop.f32.mrf.mxu0  ;;  %v1511_v8 = vadd.f32 %v706_v59, %v617_v5  ;;  %v713_v21 = vpop.f32.mrf.mxu3 }
  0xc2   : > { %v671_v6 = vpop.f32.mrf.mxu1  ;;  %v669_v9 = vadd.f32 %v668_v62, %v579_v7 }
  0xc3   : > { %759 = vst [vmem:[%s1502_s27 + $0x90] sm:$0xff] %v1511_v8 }
  0xc4   : > { %744 = vst [vmem:[%s1502_s27 + $0x18] sm:$0xff] %v669_v9  ;;  %v775_v10 = vadd.f32 %v774_v1, %v669_v9  ;;  %v813_v11 = vmul.f32 %v669_v9, %v669_v9 }
  0xc6   : > { %v844_v13 = vadd.f32 %v843_v4, %v813_v11 }
  0xc8   : > { %v619_v14 = vpop.f32.mrf.mxu2 }
  0xc9   : > { %v582_v16 = vpop.f32.mrf.mxu0  ;;  %v1516_v17 = vadd.f32 %v708_v3, %v619_v14  ;;  %v716_v30 = vpop.f32.mrf.mxu3 }
  0xca   : > { %v673_v15 = vpop.f32.mrf.mxu1  ;;  %v672_v18 = vadd.f32 %v671_v6, %v582_v16 }
  0xcb   : > { %760 = vst [vmem:[%s1502_s27 + $0x98] sm:$0xff] %v1516_v17 }
  0xcc   : > { %745 = vst [vmem:[%s1502_s27 + $0x20] sm:$0xff] %v672_v18  ;;  %v776_v19 = vadd.f32 %v775_v10, %v672_v18  ;;  %v814_v20 = vmul.f32 %v672_v18, %v672_v18 }
  0xce   : > { %v845_v22 = vadd.f32 %v844_v13, %v814_v20 }
  0xd0   : > { %v622_v23 = vpop.f32.mrf.mxu2 }
  0xd1   : > { %v584_v25 = vpop.f32.mrf.mxu0  ;;  %v1521_v26 = vadd.f32 %v711_v12, %v622_v23  ;;  %v718_v37 = vpop.f32.mrf.mxu3 }
  0xd2   : > { %v676_v24 = vpop.f32.mrf.mxu1  ;;  %v674_v27 = vadd.f32 %v673_v15, %v584_v25 }
  0xd3   : > { %761 = vst [vmem:[%s1502_s27 + $0xa0] sm:$0xff] %v1521_v26 }
  0xd4   : > { %746 = vst [vmem:[%s1502_s27 + $0x28] sm:$0xff] %v674_v27  ;;  %v1526_v28 = vadd.f32 %v776_v19, %v674_v27  ;;  %v815_v29 = vmul.f32 %v674_v27, %v674_v27 }
  0xd6   : > { %v1528_v31 = vadd.f32 %v845_v22, %v815_v29 }
  0xd8   : > { %v624_v32 = vpop.f32.mrf.mxu2 }
  0xd9   : > { %v587_v34 = vpop.f32.mrf.mxu0  ;;  %v1530_v35 = vadd.f32 %v713_v21, %v624_v32  ;;  %v721_v43 = vpop.f32.mrf.mxu3 }
  0xda   : > { %v678_v33 = vpop.f32.mrf.mxu1  ;;  %v677_v36 = vadd.f32 %v676_v24, %v587_v34 }
  0xdb   : > { %762 = vst [vmem:[%s1502_s27 + $0xa8] sm:$0xff] %v1530_v35 }
  0xdc   : > { %747 = vst [vmem:[%s1502_s27 + $0x30] sm:$0xff] %v677_v36  ;;  %v816_v13 = vmul.f32 %v677_v36, %v677_v36  ;;  %v778_v21 = vadd.f32 %v1526_v28, %v677_v36 }
  0xde   : > { %v847_v22 = vadd.f32 %v1528_v31, %v816_v13 }
  0xe0   : > { %v627_v38 = vpop.f32.mrf.mxu2 }
  0xe1   : > { %v589_v40 = vpop.f32.mrf.mxu0  ;;  %v1535_v41 = vadd.f32 %v716_v30, %v627_v38  ;;  %v723_v49 = vpop.f32.mrf.mxu3 }
  0xe2   : > { %v681_v39 = vpop.f32.mrf.mxu1  ;;  %v679_v42 = vadd.f32 %v678_v33, %v589_v40 }
  0xe3   : > { %763 = vst [vmem:[%s1502_s27 + $0xb0] sm:$0xff] %v1535_v41 }
  0xe4   : > { %748 = vst [vmem:[%s1502_s27 + $0x38] sm:$0xff] %v679_v42  ;;  %v817_v20 = vmul.f32 %v679_v42, %v679_v42  ;;  %v779_v24 = vadd.f32 %v778_v21, %v679_v42 }
  0xe6   : > { %v848_v25 = vadd.f32 %v847_v22, %v817_v20  ;;  %v829_v22 = vmul.f32 %v1516_v17, %v1516_v17 }
  0xe8   : > { %v629_v44 = vpop.f32.mrf.mxu2 }
  0xe9   : > { %v592_v46 = vpop.f32.mrf.mxu0  ;;  %v1540_v47 = vadd.f32 %v718_v37, %v629_v44  ;;  %v726_v56 = vpop.f32.mrf.mxu3 }
  0xea   : > { %v683_v45 = vpop.f32.mrf.mxu1  ;;  %v682_v48 = vadd.f32 %v681_v39, %v592_v46 }
  0xeb   : > { %764 = vst [vmem:[%s1502_s27 + $0xb8] sm:$0xff] %v1540_v47 }
  0xec   : > { %749 = vst [vmem:[%s1502_s27 + $0x40] sm:$0xff] %v682_v48  ;;  %v818_v23 = vmul.f32 %v682_v48, %v682_v48  ;;  %v780_v29 = vadd.f32 %v779_v24, %v682_v48 }
  0xee   : > { %v849_v32 = vadd.f32 %v848_v25, %v818_v23 }
  0xf0   : > { %v632_v50 = vpop.f32.mrf.mxu2 }
  0xf1   : > { %v594_v53 = vpop.f32.mrf.mxu0  ;;  %v1545_v54 = vadd.f32 %v721_v43, %v632_v50  ;;  %v728_v63 = vpop.f32.mrf.mxu3 }
  0xf2   : > { %v686_v51 = vpop.f32.mrf.mxu1  ;;  %v684_v55 = vadd.f32 %v683_v45, %v594_v53 }
  0xf3   : > { %765 = vst [vmem:[%s1502_s27 + $0xc0] sm:$0xff] %v1545_v54 }
  0xf4   : > { %750 = vst [vmem:[%s1502_s27 + $0x48] sm:$0xff] %v684_v55  ;;  %v819_v27 = vmul.f32 %v684_v55, %v684_v55  ;;  %v781_v39 = vadd.f32 %v780_v29, %v684_v55  ;;  %v831_v29 = vmul.f32 %v1530_v35, %v1530_v35 }
  0xf6   : > { %v850_v28 = vadd.f32 %v849_v32, %v819_v27 }
  0xf8   : > { %v634_v57 = vpop.f32.mrf.mxu2 }
  0xf9   : > { %v597_v59 = vpop.f32.mrf.mxu0  ;;  %v1550_v60 = vadd.f32 %v723_v49, %v634_v57  ;;  %v731_v6 = vpop.f32.mrf.mxu3 }
  0xfa   : > { %v688_v58 = vpop.f32.mrf.mxu1  ;;  %v687_v62 = vadd.f32 %v686_v51, %v597_v59 }
  0xfb   : > { %766 = vst [vmem:[%s1502_s27 + $0xc8] sm:$0xff] %v1550_v60 }
  0xfc   : > { %751 = vst [vmem:[%s1502_s27 + $0x50] sm:$0xff] %v687_v62  ;;  %v820_v33 = vmul.f32 %v687_v62, %v687_v62  ;;  %v782_v31 = vadd.f32 %v781_v39, %v687_v62 }
  0xfe   : > { %v851_v43 = vadd.f32 %v850_v28, %v820_v33 }
 0x100   : > { %v637_v0 = vpop.f32.mrf.mxu2 }
 0x101   : > { %v599_v2 = vpop.f32.mrf.mxu0  ;;  %v1555_v3 = vadd.f32 %v726_v56, %v637_v0  ;;  %v733_v19 = vpop.f32.mrf.mxu3 }
 0x102   : > { %v691_v1 = vpop.f32.mrf.mxu1  ;;  %v689_v4 = vadd.f32 %v688_v58, %v599_v2 }
 0x103   : > { %767 = vst [vmem:[%s1502_s27 + $0xd0] sm:$0xff] %v1555_v3 }
 0x104   : > { %752 = vst [vmem:[%s1502_s27 + $0x58] sm:$0xff] %v689_v4  ;;  %v821_v36 = vmul.f32 %v689_v4, %v689_v4  ;;  %v783_v45 = vadd.f32 %v782_v31, %v689_v4 }
 0x106   : > { %v852_v46 = vadd.f32 %v851_v43, %v821_v36 }
 0x108   : > { %v639_v5 = vpop.f32.mrf.mxu2 }
 0x109   : > { %v602_v9 = vpop.f32.mrf.mxu0  ;;  %v1560_v10 = vadd.f32 %v728_v63, %v639_v5  ;;  %v736_v42 = vpop.f32.mrf.mxu3 }
 0x10a   : > { %v693_v7 = vpop.f32.mrf.mxu1  ;;  %v692_v11 = vadd.f32 %v691_v1, %v602_v9 }
 0x10b   : > { %768 = vst [vmem:[%s1502_s27 + $0xd8] sm:$0xff] %v1560_v10 }
 0x10c   : > { %753 = vst [vmem:[%s1502_s27 + $0x60] sm:$0xff] %v692_v11  ;;  %v822_v44 = vmul.f32 %v692_v11, %v692_v11  ;;  %v784_v48 = vadd.f32 %v783_v45, %v692_v11 }
 0x10e   : > { %v853_v51 = vadd.f32 %v852_v46, %v822_v44 }
 0x110   : > { %v642_v12 = vpop.f32.mrf.mxu2 }
 0x111   : > { %v604_v15 = vpop.f32.mrf.mxu0  ;;  %v1565_v16 = vadd.f32 %v731_v6, %v642_v12  ;;  %v738_v5 = vpop.f32.mrf.mxu3 }
 0x112   : > { %v696_v14 = vpop.f32.mrf.mxu1  ;;  %v694_v18 = vadd.f32 %v693_v7, %v604_v15 }
 0x113   : > { %769 = vst [vmem:[%s1502_s27 + $0xe0] sm:$0xff] %v1565_v16  ;;  %v838_v45 = vmul.f32 %v1565_v16, %v1565_v16 }
 0x114   : > { %754 = vst [vmem:[%s1502_s27 + $0x68] sm:$0xff] %v694_v18  ;;  %v823_v49 = vmul.f32 %v694_v18, %v694_v18  ;;  %v785_v57 = vadd.f32 %v784_v48, %v694_v18 }
 0x116   : > { %v854_v63 = vadd.f32 %v853_v51, %v823_v49 }
 0x118   : > { %v644_v30 = vpop.f32.mrf.mxu2 }
 0x119   : > { %v607_v37 = vpop.f32.mrf.mxu0  ;;  %v1572_v38 = vadd.f32 %v733_v19, %v644_v30  ;;  %v828_v19 = vmul.f32 %v1511_v8, %v1511_v8 }
 0x11a   : > { %v698_v34 = vpop.f32.mrf.mxu1  ;;  %v697_v40 = vadd.f32 %v696_v14, %v607_v37 }
 0x11b   : > { %770 = vst [vmem:[%s1502_s27 + $0xe8] sm:$0xff] %v1572_v38 }
 0x11c   : > { %755 = vst [vmem:[%s1502_s27 + $0x70] sm:$0xff] %v697_v40  ;;  %v824_v58 = vmul.f32 %v697_v40, %v697_v40  ;;  %v786_v0 = vadd.f32 %v785_v57, %v697_v40 }
 0x11e   : > { %v855_v2 = vadd.f32 %v854_v63, %v824_v58 }
 0x120   : > { %v647_v50 = vpop.f32.mrf.mxu2 }
 0x121   : > { %v609_v55 = vpop.f32.mrf.mxu0  ;;  %v1577_v56 = vadd.f32 %v736_v42, %v647_v50 }
 0x122   : > { %v701_v53 = vpop.f32.mrf.mxu1  ;;  %v699_v62 = vadd.f32 %v698_v34, %v609_v55 }
 0x123   : > { %v702_v59 = vadd.f32 %v701_v53, %v1505_v52  ;;  %771 = vst [vmem:[%s1502_s27 + $0xf0] sm:$0xff] %v1577_v56 }
 0x124   : > { %v825_v1 = vmul.f32 %v699_v62, %v699_v62  ;;  %756 = vst [vmem:[%s1502_s27 + $0x78] sm:$0xff] %v699_v62  ;;  %v787_v4 = vadd.f32 %v786_v0, %v699_v62 }
 0x125   : > { %757 = vst [vmem:[%s1502_s27 + $0x80] sm:$0xff] %v702_v59  ;;  %v826_v12 = vmul.f32 %v702_v59, %v702_v59 }
 0x126   : > { %v856_v6 = vadd.f32 %v855_v2, %v825_v1  ;;  %v788_v13 = vadd.f32 %v787_v4, %v702_v59 }
 0x128   : > { %v649_v7 = vpop.f32.mrf.mxu2  ;;  %v857_v18 = vadd.f32 %v856_v6, %v826_v12 }
 0x129   : > { %v739_v11 = vadd.f32 %v738_v5, %v649_v7 }
 0x12a   : > { %v703_v9 = vpop.f32.mrf.mxu1 }
 0x12b   : > { %v704_v52 = vadd.f32 %v703_v9, %v1508_v61  ;;  %772 = vst [vmem:[%s1502_s27 + $0xf8] sm:$0xff] %v739_v11  ;;  %v830_v61 = vmul.f32 %v1521_v26, %v1521_v26  ;;  %v841_v57 = vmul.f32 %v739_v11, %v739_v11 }
 0x12d   : > { %758 = vst [vmem:[%s1502_s27 + $0x88] sm:$0xff] %v704_v52  ;;  %v789_v14 = vadd.f32 %v788_v13, %v704_v52  ;;  %v827_v15 = vmul.f32 %v704_v52, %v704_v52 }
 0x12f   : > { %v790_v20 = vadd.f32 %v789_v14, %v1511_v8  ;;  %v858_v21 = vadd.f32 %v857_v18, %v827_v15  ;;  %v832_v8 = vmul.f32 %v1535_v41, %v1535_v41 }
 0x131   : > { %v791_v23 = vadd.f32 %v790_v20, %v1516_v17  ;;  %v859_v24 = vadd.f32 %v858_v21, %v828_v19  ;;  %v833_v17 = vmul.f32 %v1540_v47, %v1540_v47 }
 0x133   : > { %v792_v25 = vadd.f32 %v791_v23, %v1521_v26  ;;  %v860_v27 = vadd.f32 %v859_v24, %v829_v22  ;;  %v834_v26 = vmul.f32 %v1545_v54, %v1545_v54 }
 0x135   : > { %v793_v30 = vadd.f32 %v792_v25, %v1530_v35  ;;  %v861_v32 = vadd.f32 %v860_v27, %v830_v61  ;;  %v835_v35 = vmul.f32 %v1550_v60, %v1550_v60 }
 0x137   : > { %v794_v33 = vadd.f32 %v793_v30, %v1535_v41  ;;  %v862_v34 = vadd.f32 %v861_v32, %v831_v29  ;;  %v836_v41 = vmul.f32 %v1555_v3, %v1555_v3 }
 0x139   : > { %v863_v37 = vadd.f32 %v862_v34, %v832_v8  ;;  %v795_v39 = vadd.f32 %v794_v33, %v1540_v47  ;;  %v837_v47 = vmul.f32 %v1560_v10, %v1560_v10 }
 0x13b   : > { %v796_v40 = vadd.f32 %v795_v39, %v1545_v54  ;;  %v864_v28 = vadd.f32 %v863_v37, %v833_v17 }
 0x13d   : > { %v797_v36 = vadd.f32 %v796_v40, %v1550_v60  ;;  %v865_v31 = vadd.f32 %v864_v28, %v834_v26 }
 0x13f   : > { %v798_v42 = vadd.f32 %v797_v36, %v1555_v3  ;;  %v866_v43 = vadd.f32 %v865_v31, %v835_v35  ;;  %v839_v3 = vmul.f32 %v1572_v38, %v1572_v38 }
 0x141   : > { %v799_v44 = vadd.f32 %v798_v42, %v1560_v10  ;;  %v867_v54 = vadd.f32 %v866_v43, %v836_v41  ;;  %v840_v10 = vmul.f32 %v1577_v56, %v1577_v56 }
 0x143   : > { %v800_v46 = vadd.f32 %v799_v44, %v1565_v16  ;;  %v868_v60 = vadd.f32 %v867_v54, %v837_v47 }
 0x145   : > { %v801_v48 = vadd.f32 %v800_v46, %v1572_v38  ;;  %v869_v49 = vadd.f32 %v868_v60, %v838_v45 }
 0x147   : > { %v870_v50 = vadd.f32 %v869_v49, %v839_v3  ;;  %v802_v51 = vadd.f32 %v801_v48, %v1577_v56 }
 0x149   : > { %v871_v53 = vadd.f32 %v870_v50, %v840_v10  ;;  %v803_v55 = vadd.f32 %v802_v51, %v739_v11 }
 0x14b   : > { %v804_v58 = vrot.slane %v803_v55, 4  ;;  %v872_v59 = vadd.f32 %v871_v53, %v841_v57 }
 0x14d   : > { %v805_v16 = vadd.f32 %v804_v58, %v803_v55  ;;  %v873_v62 = vrot.slane %v872_v59, 4 }
 0x14f   : > { %v806_v63 = vrot.slane %v805_v16, 2  ;;  %v874_v0 = vadd.f32 %v873_v62, %v872_v59 }
 0x151   : > { %v807_v1 = vadd.f32 %v806_v63, %v805_v16  ;;  %v875_v38 = vrot.slane %v874_v0, 2 }
 0x153   : > { %v808_v2 = vrot.slane %v807_v1, 1  ;;  %v876_v4 = vadd.f32 %v875_v38, %v874_v0 }
 0x155   : > { %v877_v5 = vrot.slane %v876_v4, 1  ;;  %v809_v6 = vadd.f32 %v808_v2, %v807_v1 }
 0x157   : > { %v878_v56 = vadd.f32 %v877_v5, %v876_v4 }
 0x159   : > { %v880_v7 = vsel %vm879_vm2, %v809_v6, %v878_v56 }
 0x15a   : > { %v881_v9 = vsel %vm559_vm0, %v880_v7, 0.0 }
 0x15b   : > { %882 = vst [vmem:[%s232_s30] sm:$0xff] %v881_v9 }
 0x15c PF: > { %s14_s14 = sadd.s32 1, %s1324_s14   ;;  %s1645_s12 = smov %s1320_s13 }
 0x15d   : > { %p11_p6 = scmp.ge.s32.totalorder %s14_s14, 4   ;;  %s1646_s13 = smov %s1648_s15 }
 0x15f   :  { %13 = sbr.rel (!%p11_p6) target bundleno = 2 (0x2), region = 73 }

// kernel: resnet_forward.20
= control target key start
LH: loop header
LB: loop body
LE: loop exit
PB: predicated region body
PF: predicated region fallthrough
CT: control target
= control target key end

     0   :  { %s586_s12 = smov 0   ;;  %s588_s13 = smov 0   ;;  %s761_s0 = inlined_call_operand.vmem [shape: f32[512,128], index: 0, kind: input, shape index: {}]   ;;  %s762_s1 = inlined_call_operand.vmem [shape: f32[1,128], index: 1, kind: input, shape index: {}]   ;;  %s763_s2 = inlined_call_operand.vmem [shape: f32[1,128], index: 2, kind: input, shape index: {}]   ;;  %s764_s3 = inlined_call_operand.vmem [shape: f32[512,128], index: 3, kind: output, shape index: {}]  }
   0x1   :  { %s590_s14 = smov 0  }
   0x2 LB: > { %s25_s15 = sadd.s32 1, %s560_s13  ;;  %p509_p0 = scmp.ge.s32.totalorder %s564_s14, 1  ;;  %s564_s14 = sphi %s590_s14, %s13_s14   ;;  %s560_s13 = sphi %s588_s13, %s766_s13   ;;  %s556_s12 = sphi %s586_s12, %s765_s12  }
   0x3   : > { %p27_p1 = scmp.ge.s32.totalorder %s25_s15, 2  ;;  %p173_p2 = scmp.lt.s32.totalorder %s564_s14, 3 }
   0x5   : > { %s768_s15 = smov (%p27_p1, %s25_s15), 0  ;;  %p174_p3 = pnand %p509_p0, %p173_p2 }
   0x6   : > { %s510_s16 = sshll.u32 (!%p174_p3), %s556_s12, 5 }
   0x7   : > { %177 = sbr.rel (%p174_p3) target bundleno = 54 (0x36), region = 32  ;;  %p210_p4 = scmp.lt.s32.totalorder (!%p174_p3), %s510_s16, 63 }
   0xc   : > { %s770_s16 = smov (!%p210_p4, %s510_s16), 63  ;;  %v607_v0 = vld [vmem:[%s762_s1] ss:$0 sm:$0xff] }
   0xd   : > { %s511_s19 = sshll.u32 %s770_s16, 3  ;;  %v617_v1 = vld [vmem:[%s763_s2] ss:$0 sm:$0xff] }
   0xe   : > { %s612_s22 = scalar_lea.vmem %s761_s0, %s511_s19  ;;  %s640_s27 = scalar_lea.vmem %s764_s3, %s511_s19 }
   0xf   : > { %v233_v2 = vld [vmem:[%s612_s22] sm:$0xff]  ;;  %v234_v3 = vld [vmem:[%s612_s22 + $0x8] sm:$0xff]  ;;  %v235_v4 = vld [vmem:[%s612_s22 + $0x10] sm:$0xff] }
  0x10   : > { %v269_v5 = vmul.f32 %v607_v0, %v233_v2  ;;  %v270_v6 = vmul.f32 %v607_v0, %v234_v3  ;;  %v271_v7 = vmul.f32 %v607_v0, %v235_v4  ;;  %v236_v8 = vld [vmem:[%s612_s22 + $0x18] sm:$0xff]  ;;  %v237_v9 = vld [vmem:[%s612_s22 + $0x20] sm:$0xff]  ;;  %v238_v10 = vld [vmem:[%s612_s22 + $0x28] sm:$0xff] }
  0x11   : > { %v272_v11 = vmul.f32 %v607_v0, %v236_v8  ;;  %v273_v12 = vmul.f32 %v607_v0, %v237_v9  ;;  %v274_v13 = vmul.f32 %v607_v0, %v238_v10  ;;  %v239_v14 = vld [vmem:[%s612_s22 + $0x30] sm:$0xff]  ;;  %v240_v15 = vld [vmem:[%s612_s22 + $0x38] sm:$0xff]  ;;  %v241_v24 = vld [vmem:[%s612_s22 + $0x40] sm:$0xff] }
  0x12   : > { %v305_v16 = vadd.f32 %v617_v1, %v269_v5  ;;  %v306_v17 = vadd.f32 %v617_v1, %v270_v6  ;;  %v307_v18 = vadd.f32 %v617_v1, %v271_v7  ;;  %v275_v19 = vmul.f32 %v607_v0, %v239_v14  ;;  %v242_v25 = vld [vmem:[%s612_s22 + $0x48] sm:$0xff]  ;;  %v243_v26 = vld [vmem:[%s612_s22 + $0x50] sm:$0xff]  ;;  %v244_v31 = vld [vmem:[%s612_s22 + $0x58] sm:$0xff] }
  0x13   : > { %v308_v20 = vadd.f32 %v617_v1, %v272_v11  ;;  %v309_v21 = vadd.f32 %v617_v1, %v273_v12  ;;  %v310_v22 = vadd.f32 %v617_v1, %v274_v13  ;;  %v276_v23 = vmul.f32 %v607_v0, %v240_v15  ;;  %v245_v32 = vld [vmem:[%s612_s22 + $0x60] sm:$0xff]  ;;  %v246_v33 = vld [vmem:[%s612_s22 + $0x68] sm:$0xff]  ;;  %v247_v37 = vld [vmem:[%s612_s22 + $0x70] sm:$0xff] }
  0x14   : > { %v337_v27 = vmax.f32 %v305_v16, 0.0  ;;  %v338_v28 = vmax.f32 %v306_v17, 0.0  ;;  %v339_v29 = vmax.f32 %v307_v18, 0.0  ;;  %v311_v30 = vadd.f32 %v617_v1, %v275_v19  ;;  %v248_v42 = vld [vmem:[%s612_s22 + $0x78] sm:$0xff]  ;;  %v249_v54 = vld [vmem:[%s612_s22 + $0x80] sm:$0xff]  ;;  %v250_v55 = vld [vmem:[%s612_s22 + $0x88] sm:$0xff] }
  0x15   : > { %v340_v34 = vmax.f32 %v308_v20, 0.0  ;;  %v341_v35 = vmax.f32 %v309_v21, 0.0  ;;  %v312_v36 = vadd.f32 %v617_v1, %v276_v23  ;;  %v342_v38 = vmax.f32 %v310_v22, 0.0  ;;  %v251_v56 = vld [vmem:[%s612_s22 + $0x90] sm:$0xff]  ;;  %v252_v59 = vld [vmem:[%s612_s22 + $0x98] sm:$0xff]  ;;  %v253_v63 = vld [vmem:[%s612_s22 + $0xa0] sm:$0xff] }
  0x16   : > { %369 = vst [vmem:[%s640_s27] sm:$0xff] %v337_v27  ;;  %v277_v39 = vmul.f32 %v607_v0, %v241_v24  ;;  %v278_v40 = vmul.f32 %v607_v0, %v242_v25  ;;  %v279_v41 = vmul.f32 %v607_v0, %v243_v26  ;;  %v343_v43 = vmax.f32 %v311_v30, 0.0  ;;  %v254_v6 = vld [vmem:[%s612_s22 + $0xa8] sm:$0xff]  ;;  %v255_v10 = vld [vmem:[%s612_s22 + $0xb0] sm:$0xff]  ;;  %v256_v14 = vld [vmem:[%s612_s22 + $0xb8] sm:$0xff] }
  0x17   : > { %370 = vst [vmem:[%s640_s27 + $0x8] sm:$0xff] %v338_v28  ;;  %v280_v44 = vmul.f32 %v607_v0, %v244_v31  ;;  %v281_v45 = vmul.f32 %v607_v0, %v245_v32  ;;  %v282_v46 = vmul.f32 %v607_v0, %v246_v33  ;;  %v283_v50 = vmul.f32 %v607_v0, %v247_v37  ;;  %v257_v18 = vld [vmem:[%s612_s22 + $0xc0] sm:$0xff]  ;;  %v258_v22 = vld [vmem:[%s612_s22 + $0xc8] sm:$0xff]  ;;  %v259_v26 = vld [vmem:[%s612_s22 + $0xd0] sm:$0xff] }
  0x18   : > { %371 = vst [vmem:[%s640_s27 + $0x10] sm:$0xff] %v339_v29  ;;  %v313_v47 = vadd.f32 %v617_v1, %v277_v39  ;;  %v314_v48 = vadd.f32 %v617_v1, %v278_v40  ;;  %v315_v49 = vadd.f32 %v617_v1, %v279_v41  ;;  %v344_v51 = vmax.f32 %v312_v36, 0.0  ;;  %v260_v30 = vld [vmem:[%s612_s22 + $0xd8] sm:$0xff] }
  0x19   : > { %372 = vst [vmem:[%s640_s27 + $0x18] sm:$0xff] %v340_v34  ;;  %v316_v52 = vadd.f32 %v617_v1, %v280_v44  ;;  %v284_v53 = vmul.f32 %v607_v0, %v248_v42  ;;  %v317_v58 = vadd.f32 %v617_v1, %v281_v45  ;;  %v318_v62 = vadd.f32 %v617_v1, %v282_v46  ;;  %v261_v34 = vld [vmem:[%s612_s22 + $0xe0] sm:$0xff]  ;;  %v263_v42 = vld [vmem:[%s612_s22 + $0xf0] sm:$0xff]  ;;  %v264_v46 = vld [vmem:[%s612_s22 + $0xf8] sm:$0xff] }
  0x1a   : > { %373 = vst [vmem:[%s640_s27 + $0x20] sm:$0xff] %v341_v35  ;;  %v345_v57 = vmax.f32 %v313_v47, 0.0  ;;  %v346_v60 = vmax.f32 %v314_v48, 0.0  ;;  %v347_v61 = vmax.f32 %v315_v49, 0.0  ;;  %v319_v2 = vadd.f32 %v617_v1, %v283_v50 }
  0x1b   : > { %374 = vst [vmem:[%s640_s27 + $0x28] sm:$0xff] %v342_v38  ;;  %v285_v3 = vmul.f32 %v607_v0, %v249_v54  ;;  %v286_v4 = vmul.f32 %v607_v0, %v250_v55  ;;  %v287_v5 = vmul.f32 %v607_v0, %v251_v56  ;;  %v348_v7 = vmax.f32 %v316_v52, 0.0  ;;  %v262_v38 = vld [vmem:[%s612_s22 + $0xe8] sm:$0xff] }
  0x1c   : > { %375 = vst [vmem:[%s640_s27 + $0x30] sm:$0xff] %v343_v43  ;;  %v320_v8 = vadd.f32 %v617_v1, %v284_v53  ;;  %v288_v9 = vmul.f32 %v607_v0, %v252_v59  ;;  %v349_v11 = vmax.f32 %v317_v58, 0.0  ;;  %v289_v13 = vmul.f32 %v607_v0, %v253_v63 }
  0x1d   : > { %376 = vst [vmem:[%s640_s27 + $0x38] sm:$0xff] %v344_v51  ;;  %v321_v12 = vadd.f32 %v617_v1, %v285_v3  ;;  %v350_v15 = vmax.f32 %v318_v62, 0.0  ;;  %v322_v16 = vadd.f32 %v617_v1, %v286_v4  ;;  %v290_v17 = vmul.f32 %v607_v0, %v254_v6 }
  0x1e   : > { %377 = vst [vmem:[%s640_s27 + $0x40] sm:$0xff] %v345_v57  ;;  %v351_v19 = vmax.f32 %v319_v2, 0.0  ;;  %v323_v20 = vadd.f32 %v617_v1, %v287_v5  ;;  %v291_v21 = vmul.f32 %v607_v0, %v255_v10  ;;  %v352_v23 = vmax.f32 %v320_v8, 0.0 }
  0x1f   : > { %378 = vst [vmem:[%s640_s27 + $0x48] sm:$0xff] %v346_v60  ;;  %v324_v24 = vadd.f32 %v617_v1, %v288_v9  ;;  %v292_v25 = vmul.f32 %v607_v0, %v256_v14  ;;  %v353_v27 = vmax.f32 %v321_v12, 0.0  ;;  %v325_v28 = vadd.f32 %v617_v1, %v289_v13 }
  0x20   : > { %379 = vst [vmem:[%s640_s27 + $0x50] sm:$0xff] %v347_v61  ;;  %v293_v29 = vmul.f32 %v607_v0, %v257_v18  ;;  %v354_v31 = vmax.f32 %v322_v16, 0.0  ;;  %v326_v32 = vadd.f32 %v617_v1, %v290_v17  ;;  %v294_v33 = vmul.f32 %v607_v0, %v258_v22 }
  0x21   : > { %380 = vst [vmem:[%s640_s27 + $0x58] sm:$0xff] %v348_v7  ;;  %v355_v35 = vmax.f32 %v323_v20, 0.0  ;;  %v327_v36 = vadd.f32 %v617_v1, %v291_v21  ;;  %v295_v37 = vmul.f32 %v607_v0, %v259_v26  ;;  %v356_v39 = vmax.f32 %v324_v24, 0.0 }
  0x22   : > { %381 = vst [vmem:[%s640_s27 + $0x60] sm:$0xff] %v349_v11  ;;  %v328_v40 = vadd.f32 %v617_v1, %v292_v25  ;;  %v296_v41 = vmul.f32 %v607_v0, %v260_v30  ;;  %v357_v43 = vmax.f32 %v325_v28, 0.0  ;;  %v329_v44 = vadd.f32 %v617_v1, %v293_v29 }
  0x23   : > { %382 = vst [vmem:[%s640_s27 + $0x68] sm:$0xff] %v350_v15  ;;  %v297_v45 = vmul.f32 %v607_v0, %v261_v34  ;;  %v358_v47 = vmax.f32 %v326_v32, 0.0  ;;  %v330_v48 = vadd.f32 %v617_v1, %v294_v33  ;;  %v298_v49 = vmul.f32 %v607_v0, %v262_v38 }
  0x24   : > { %383 = vst [vmem:[%s640_s27 + $0x70] sm:$0xff] %v351_v19  ;;  %v359_v50 = vmax.f32 %v327_v36, 0.0  ;;  %v331_v51 = vadd.f32 %v617_v1, %v295_v37  ;;  %v299_v52 = vmul.f32 %v607_v0, %v263_v42  ;;  %v360_v53 = vmax.f32 %v328_v40, 0.0 }
  0x25   : > { %384 = vst [vmem:[%s640_s27 + $0x78] sm:$0xff] %v352_v23  ;;  %v332_v54 = vadd.f32 %v617_v1, %v296_v41  ;;  %v300_v55 = vmul.f32 %v607_v0, %v264_v46  ;;  %v361_v56 = vmax.f32 %v329_v44, 0.0  ;;  %v333_v57 = vadd.f32 %v617_v1, %v297_v45 }
  0x26   : > { %385 = vst [vmem:[%s640_s27 + $0x80] sm:$0xff] %v353_v27  ;;  %v362_v58 = vmax.f32 %v330_v48, 0.0  ;;  %v334_v59 = vadd.f32 %v617_v1, %v298_v49  ;;  %v363_v60 = vmax.f32 %v331_v51, 0.0  ;;  %v335_v61 = vadd.f32 %v617_v1, %v299_v52 }
  0x27   : > { %386 = vst [vmem:[%s640_s27 + $0x88] sm:$0xff] %v354_v31  ;;  %v364_v0 = vmax.f32 %v332_v54, 0.0  ;;  %v336_v62 = vadd.f32 %v617_v1, %v300_v55  ;;  %v365_v63 = vmax.f32 %v333_v57, 0.0 }
  0x28   : > { %387 = vst [vmem:[%s640_s27 + $0x90] sm:$0xff] %v355_v35  ;;  %v366_v2 = vmax.f32 %v334_v59, 0.0  ;;  %v367_v3 = vmax.f32 %v335_v61, 0.0 }
  0x29   : > { %388 = vst [vmem:[%s640_s27 + $0x98] sm:$0xff] %v356_v39  ;;  %v368_v4 = vmax.f32 %v336_v62, 0.0 }
  0x2a   : > { %389 = vst [vmem:[%s640_s27 + $0xa0] sm:$0xff] %v357_v43 }
  0x2b   : > { %390 = vst [vmem:[%s640_s27 + $0xa8] sm:$0xff] %v358_v47 }
  0x2c   : > { %391 = vst [vmem:[%s640_s27 + $0xb0] sm:$0xff] %v359_v50 }
  0x2d   : > { %392 = vst [vmem:[%s640_s27 + $0xb8] sm:$0xff] %v360_v53 }
  0x2e   : > { %393 = vst [vmem:[%s640_s27 + $0xc0] sm:$0xff] %v361_v56 }
  0x2f   : > { %394 = vst [vmem:[%s640_s27 + $0xc8] sm:$0xff] %v362_v58 }
  0x30   : > { %395 = vst [vmem:[%s640_s27 + $0xd0] sm:$0xff] %v363_v60 }
  0x31   : > { %396 = vst [vmem:[%s640_s27 + $0xd8] sm:$0xff] %v364_v0 }
  0x32   : > { %397 = vst [vmem:[%s640_s27 + $0xe0] sm:$0xff] %v365_v63 }
  0x33   : > { %398 = vst [vmem:[%s640_s27 + $0xe8] sm:$0xff] %v366_v2 }
  0x34   : > { %399 = vst [vmem:[%s640_s27 + $0xf0] sm:$0xff] %v367_v3 }
  0x35   : > { %400 = vst [vmem:[%s640_s27 + $0xf8] sm:$0xff] %v368_v4 }
  0x36 PF: > { %s13_s14 = sadd.s32 1, %s564_s14   ;;  %s765_s12 = smov %s560_s13 }
  0x37   : > { %p10_p5 = scmp.ge.s32.totalorder %s13_s14, 4   ;;  %s766_s13 = smov %s768_s15 }
  0x39   :  { %12 = sbr.rel (!%p10_p5) target bundleno = 2 (0x2), region = 68 }

// kernel: resnet_forward.21
= control target key start
LH: loop header
LB: loop body
LE: loop exit
PB: predicated region body
PF: predicated region fallthrough
CT: control target
= control target key end

     0   :  { %vm131_vm0 = vcmask 1043456   ;;  %vm106_vm1 = vcmask 588800   ;;  %vm258_vm2 = vcmask 1040384   ;;  %vm260_vm3 = vcmask 1041408   ;;  %s472_s1 = inlined_call_operand.vmem [shape: bf16[72,128], index: 1, kind: input, shape index: {}]   ;;  %s473_s0 = inlined_call_operand.vmem [shape: bf16[128,72], index: 0, kind: input, shape index: {}]   ;;  %s474_s2 = inlined_call_operand.vmem [shape: f32[128,128], index: 2, kind: output, shape index: {0}]   ;;  %s475_s3 = inlined_call_operand.vmem [shape: f32[1,8,128], index: 3, kind: output, shape index: {1}]  }
   0x1   :  { %v38_v0 = vld [vmem:[%s472_s1 + $0x20] sm:$0xf]  ;;  %v338_v4 = vld [vmem:[%s472_s1 + $0x18] sm:$0xff]  ;;  %v337_v5 = vld [vmem:[%s472_s1 + $0x10] sm:$0xff] }
   0x2   :  { %v96_v1 = vunpack.c.l.b16 %v38_v0  ;;  %v336_v6 = vld [vmem:[%s472_s1 + $0x8] sm:$0xff]  ;;  %v335_v7 = vld [vmem:[%s472_s1] sm:$0xff]  ;;  %v329_v9 = vld [vmem:[%s473_s0 + $0x10] sm:$0xff] }
   0x3   :  { %v327_v8 = vld [vmem:[%s473_s0] sm:$0xff]  ;;  %v333_v11 = vld [vmem:[%s473_s0 + $0x30] sm:$0xff]  ;;  %v328_v12 = vld [vmem:[%s473_s0 + $0x8] sm:$0xff] }
   0x4   :  { %v101_v2 = vpack.c.b16 %v96_v1, %v96_v1  ;;  %v331_v10 = vld [vmem:[%s473_s0 + $0x20] sm:$0xff]  ;;  %v330_v13 = vld [vmem:[%s473_s0 + $0x18] sm:$0xff]  ;;  %v332_v14 = vld [vmem:[%s473_s0 + $0x28] sm:$0xff] }
   0x5   :  { %v334_v15 = vld [vmem:[%s473_s0 + $0x38] sm:$0xff] }
   0x6   :  { %v133_v3 = vsel %vm131_vm0, %v101_v2, 0 }
   0x7   :  { %138 = vmatpush.bf16.msra.mxu0 %v133_v3  ;;  %339 = vmatpush.bf16.msra.mxu1 %v133_v3 }
   0x8   :  { %340 = vmatpush.bf16.msra.mxu2 %v133_v3  ;;  %341 = vmatpush.bf16.msra.mxu3 %v133_v3 }
   0xb   :  { %139 = vmatpush.bf16.msra.mxu0 %v338_v4  ;;  %342 = vmatpush.bf16.msra.mxu1 %v338_v4 }
   0xc   :  { %343 = vmatpush.bf16.msra.mxu2 %v338_v4  ;;  %344 = vmatpush.bf16.msra.mxu3 %v338_v4 }
   0xf   :  { %140 = vmatpush.bf16.msra.mxu0 %v337_v5  ;;  %345 = vmatpush.bf16.msra.mxu1 %v337_v5 }
  0x10   :  { %346 = vmatpush.bf16.msra.mxu2 %v337_v5  ;;  %347 = vmatpush.bf16.msra.mxu3 %v337_v5 }
  0x13   :  { %141 = vmatpush.bf16.msra.mxu0 %v336_v6  ;;  %348 = vmatpush.bf16.msra.mxu1 %v336_v6 }
  0x14   :  { %349 = vmatpush.bf16.msra.mxu2 %v336_v6  ;;  %350 = vmatpush.bf16.msra.mxu3 %v336_v6 }
  0x17   :  { %142 = vmatpush.bf16.msra.mxu0 %v335_v7  ;;  %351 = vmatpush.bf16.msra.mxu1 %v335_v7 }
  0x18   :  { %352 = vmatpush.bf16.msra.mxu2 %v335_v7  ;;  %353 = vmatpush.bf16.msra.mxu3 %v335_v7 }
  0x1a   :  { %319 = vmatmul.msk.bf16.vlgmr.msra.gmra.mxu0 %vm106_vm1, %v327_v8  ;;  %321 = vmatmul.msk.bf16.vlgmr.msra.gmra.mxu1 %vm106_vm1, %v329_v9 }
  0x1b   :  { %323 = vmatmul.msk.bf16.vlgmr.msra.gmra.mxu2 %vm106_vm1, %v331_v10  ;;  %325 = vmatmul.msk.bf16.vlgmr.msra.gmra.mxu3 %vm106_vm1, %v333_v11 }
  0x2a   :  { %320 = vmatmul.msk.bf16.gmra.mxu0 %vm106_vm1, %v328_v12  ;;  %322 = vmatmul.msk.bf16.gmra.mxu1 %vm106_vm1, %v330_v13 }
  0x2b   :  { %324 = vmatmul.msk.bf16.gmra.mxu2 %vm106_vm1, %v332_v14  ;;  %326 = vmatmul.msk.bf16.gmra.mxu3 %vm106_vm1, %v334_v15 }
  0x97   :  { %v144_v16 = vpop.f32.mrf.mxu0  ;;  %v154_v17 = vpop.f32.mrf.mxu1 }
  0x98   :  { %184 = vst [vmem:[%s474_s2] sm:$0xff] %v144_v16  ;;  %v221_v27 = vmul.f32 %v144_v16, %v144_v16  ;;  %v225_v39 = vmul.f32 %v154_v17, %v154_v17 }
  0x99   :  { %188 = vst [vmem:[%s474_s2 + $0x20] sm:$0xff] %v154_v17 }
  0x9e   :  { %v164_v18 = vpop.f32.mrf.mxu2  ;;  %v174_v19 = vpop.f32.mrf.mxu3 }
  0x9f   :  { %v146_v20 = vpop.f32.mrf.mxu0  ;;  %v156_v21 = vpop.f32.mrf.mxu1  ;;  %192 = vst [vmem:[%s474_s2 + $0x40] sm:$0xff] %v164_v18  ;;  %v229_v53 = vmul.f32 %v164_v18, %v164_v18  ;;  %v233_v1 = vmul.f32 %v174_v19, %v174_v19 }
  0xa0   :  { %185 = vst [vmem:[%s474_s2 + $0x8] sm:$0xff] %v146_v20  ;;  %v222_v26 = vmul.f32 %v146_v20, %v146_v20  ;;  %v200_v28 = vadd.f32 %v146_v20, %v144_v16  ;;  %v226_v42 = vmul.f32 %v156_v21, %v156_v21 }
  0xa1   :  { %189 = vst [vmem:[%s474_s2 + $0x28] sm:$0xff] %v156_v21 }
  0xa2   :  { %196 = vst [vmem:[%s474_s2 + $0x60] sm:$0xff] %v174_v19  ;;  %v237_v30 = vadd.f32 %v222_v26, %v221_v27 }
  0xa6   :  { %v166_v22 = vpop.f32.mrf.mxu2  ;;  %v176_v23 = vpop.f32.mrf.mxu3 }
  0xa7   :  { %v149_v24 = vpop.f32.mrf.mxu0  ;;  %v159_v25 = vpop.f32.mrf.mxu1  ;;  %193 = vst [vmem:[%s474_s2 + $0x48] sm:$0xff] %v166_v22  ;;  %v230_v56 = vmul.f32 %v166_v22, %v166_v22  ;;  %v234_v4 = vmul.f32 %v176_v23, %v176_v23 }
  0xa8   :  { %186 = vst [vmem:[%s474_s2 + $0x10] sm:$0xff] %v149_v24  ;;  %v223_v29 = vmul.f32 %v149_v24, %v149_v24  ;;  %v201_v31 = vadd.f32 %v200_v28, %v149_v24  ;;  %v227_v45 = vmul.f32 %v159_v25, %v159_v25 }
  0xa9   :  { %190 = vst [vmem:[%s474_s2 + $0x30] sm:$0xff] %v159_v25 }
  0xaa   :  { %197 = vst [vmem:[%s474_s2 + $0x68] sm:$0xff] %v176_v23  ;;  %v238_v36 = vadd.f32 %v237_v30, %v223_v29 }
  0xae   :  { %v169_v32 = vpop.f32.mrf.mxu2  ;;  %v179_v33 = vpop.f32.mrf.mxu3 }
  0xaf   :  { %v151_v34 = vpop.f32.mrf.mxu0  ;;  %v161_v35 = vpop.f32.mrf.mxu1  ;;  %194 = vst [vmem:[%s474_s2 + $0x50] sm:$0xff] %v169_v32  ;;  %v231_v60 = vmul.f32 %v169_v32, %v169_v32  ;;  %v235_v8 = vmul.f32 %v179_v33, %v179_v33 }
  0xb0   :  { %187 = vst [vmem:[%s474_s2 + $0x18] sm:$0xff] %v151_v34  ;;  %v202_v37 = vadd.f32 %v201_v31, %v151_v34  ;;  %v224_v38 = vmul.f32 %v151_v34, %v151_v34  ;;  %v228_v51 = vmul.f32 %v161_v35, %v161_v35 }
  0xb1   :  { %191 = vst [vmem:[%s474_s2 + $0x38] sm:$0xff] %v161_v35 }
  0xb2   :  { %v203_v40 = vadd.f32 %v202_v37, %v154_v17  ;;  %v239_v41 = vadd.f32 %v238_v36, %v224_v38  ;;  %198 = vst [vmem:[%s474_s2 + $0x70] sm:$0xff] %v179_v33 }
  0xb4   :  { %v240_v43 = vadd.f32 %v239_v41, %v225_v39  ;;  %v204_v44 = vadd.f32 %v203_v40, %v156_v21 }
  0xb6   :  { %v205_v46 = vadd.f32 %v204_v44, %v159_v25  ;;  %v241_v47 = vadd.f32 %v240_v43, %v226_v42  ;;  %v171_v48 = vpop.f32.mrf.mxu2  ;;  %v181_v49 = vpop.f32.mrf.mxu3 }
  0xb7   :  { %195 = vst [vmem:[%s474_s2 + $0x58] sm:$0xff] %v171_v48  ;;  %v232_v0 = vmul.f32 %v171_v48, %v171_v48  ;;  %v236_v12 = vmul.f32 %v181_v49, %v181_v49 }
  0xb8   :  { %v206_v50 = vadd.f32 %v205_v46, %v161_v35  ;;  %v242_v52 = vadd.f32 %v241_v47, %v227_v45  ;;  %199 = vst [vmem:[%s474_s2 + $0x78] sm:$0xff] %v181_v49 }
  0xba   :  { %v207_v54 = vadd.f32 %v206_v50, %v164_v18  ;;  %v243_v55 = vadd.f32 %v242_v52, %v228_v51 }
  0xbc   :  { %v244_v57 = vadd.f32 %v243_v55, %v229_v53  ;;  %v208_v58 = vadd.f32 %v207_v54, %v166_v22 }
  0xbe   :  { %v209_v59 = vadd.f32 %v208_v58, %v169_v32  ;;  %v245_v61 = vadd.f32 %v244_v57, %v230_v56 }
  0xc0   :  { %v246_v62 = vadd.f32 %v245_v61, %v231_v60  ;;  %v210_v63 = vadd.f32 %v209_v59, %v171_v48 }
  0xc2   :  { %v211_v2 = vadd.f32 %v210_v63, %v174_v19  ;;  %v247_v3 = vadd.f32 %v246_v62, %v232_v0 }
  0xc4   :  { %v248_v5 = vadd.f32 %v247_v3, %v233_v1  ;;  %v212_v6 = vadd.f32 %v211_v2, %v176_v23 }
  0xc6   :  { %v213_v7 = vadd.f32 %v212_v6, %v179_v33  ;;  %v249_v9 = vadd.f32 %v248_v5, %v234_v4 }
  0xc8   :  { %v250_v10 = vadd.f32 %v249_v9, %v235_v8  ;;  %v214_v11 = vadd.f32 %v213_v7, %v181_v49 }
  0xca   :  { %v215_v13 = vrot.slane %v214_v11, 4  ;;  %v251_v14 = vadd.f32 %v250_v10, %v236_v12 }
  0xcc   :  { %v216_v15 = vadd.f32 %v215_v13, %v214_v11  ;;  %v252_v16 = vrot.slane %v251_v14, 4 }
  0xce   :  { %v217_v17 = vrot.slane %v216_v15, 2  ;;  %v253_v18 = vadd.f32 %v252_v16, %v251_v14 }
  0xd0   :  { %v218_v20 = vadd.f32 %v217_v17, %v216_v15  ;;  %v254_v21 = vrot.slane %v253_v18, 2 }
  0xd2   :  { %v219_v22 = vrot.slane %v218_v20, 1  ;;  %v255_v19 = vadd.f32 %v254_v21, %v253_v18 }
  0xd4   :  { %v256_v24 = vrot.slane %v255_v19, 1  ;;  %v220_v25 = vadd.f32 %v219_v22, %v218_v20 }
  0xd6   :  { %v257_v23 = vadd.f32 %v256_v24, %v255_v19 }
  0xd8   :  { %v259_v26 = vsel %vm258_vm2, %v220_v25, %v257_v23 }
  0xd9   :  { %v261_v27 = vsel %vm260_vm3, %v259_v26, 0.0 }
  0xda   :  { %262 = vst [vmem:[%s475_s3] sm:$0xff] %v261_v27 }

// kernel: resnet_forward.22
= control target key start
LH: loop header
LB: loop body
LE: loop exit
PB: predicated region body
PF: predicated region fallthrough
CT: control target
= control target key end

     0   :  { %s248_s0 = inlined_call_operand.vmem [shape: f32[128,128], index: 0, kind: input, shape index: {}]   ;;  %s249_s1 = inlined_call_operand.vmem [shape: f32[1,128], index: 1, kind: input, shape index: {}]   ;;  %s250_s2 = inlined_call_operand.vmem [shape: f32[1,128], index: 2, kind: input, shape index: {}]   ;;  %s251_s3 = inlined_call_operand.vmem [shape: f32[128,128], index: 3, kind: output, shape index: {}]  }
   0x1   :  { %v14_v0 = vld [vmem:[%s248_s0] sm:$0xff]  ;;  %v15_v3 = vld [vmem:[%s248_s0 + $0x8] sm:$0xff]  ;;  %v16_v6 = vld [vmem:[%s248_s0 + $0x10] sm:$0xff] }
   0x2   :  { %v106_v1 = vld [vmem:[%s249_s1] ss:$0 sm:$0xff]  ;;  %v17_v7 = vld [vmem:[%s248_s0 + $0x18] sm:$0xff]  ;;  %v19_v12 = vld [vmem:[%s248_s0 + $0x28] sm:$0xff] }
   0x3   :  { %v137_v2 = vld [vmem:[%s250_s2] ss:$0 sm:$0xff]  ;;  %v34_v4 = vmul.f32 %v106_v1, %v14_v0  ;;  %v35_v5 = vmul.f32 %v106_v1, %v15_v3  ;;  %v36_v9 = vmul.f32 %v106_v1, %v16_v6  ;;  %v37_v10 = vmul.f32 %v106_v1, %v17_v7  ;;  %v20_v13 = vld [vmem:[%s248_s0 + $0x30] sm:$0xff]  ;;  %v21_v14 = vld [vmem:[%s248_s0 + $0x38] sm:$0xff] }
   0x4   :  { %v18_v8 = vld [vmem:[%s248_s0 + $0x20] sm:$0xff]  ;;  %v39_v17 = vmul.f32 %v106_v1, %v19_v12  ;;  %v40_v18 = vmul.f32 %v106_v1, %v20_v13  ;;  %v41_v22 = vmul.f32 %v106_v1, %v21_v14  ;;  %v23_v24 = vld [vmem:[%s248_s0 + $0x48] sm:$0xff]  ;;  %v24_v29 = vld [vmem:[%s248_s0 + $0x50] sm:$0xff] }
   0x5   :  { %v38_v11 = vmul.f32 %v106_v1, %v18_v8  ;;  %v54_v15 = vadd.f32 %v137_v2, %v34_v4  ;;  %v55_v16 = vadd.f32 %v137_v2, %v35_v5  ;;  %v56_v19 = vadd.f32 %v137_v2, %v36_v9  ;;  %v22_v23 = vld [vmem:[%s248_s0 + $0x40] sm:$0xff]  ;;  %v25_v30 = vld [vmem:[%s248_s0 + $0x58] sm:$0xff]  ;;  %v27_v35 = vld [vmem:[%s248_s0 + $0x68] sm:$0xff] }
   0x6   :  { %v57_v20 = vadd.f32 %v137_v2, %v37_v10  ;;  %v59_v27 = vadd.f32 %v137_v2, %v39_v17  ;;  %v60_v28 = vadd.f32 %v137_v2, %v40_v18  ;;  %v26_v31 = vld [vmem:[%s248_s0 + $0x60] sm:$0xff]  ;;  %v61_v34 = vadd.f32 %v137_v2, %v41_v22  ;;  %v28_v36 = vld [vmem:[%s248_s0 + $0x70] sm:$0xff]  ;;  %v29_v41 = vld [vmem:[%s248_s0 + $0x78] sm:$0xff] }
   0x7   :  { %v58_v21 = vadd.f32 %v137_v2, %v38_v11  ;;  %v70_v25 = vmax.f32 %v54_v15, 0.0  ;;  %v71_v26 = vmax.f32 %v55_v16, 0.0  ;;  %v72_v32 = vmax.f32 %v56_v19, 0.0 }
   0x8   :  { %v73_v33 = vmax.f32 %v57_v20, 0.0  ;;  %v75_v38 = vmax.f32 %v59_v27, 0.0  ;;  %v42_v39 = vmul.f32 %v106_v1, %v22_v23  ;;  %v43_v40 = vmul.f32 %v106_v1, %v23_v24 }
   0x9   :  { %86 = vst [vmem:[%s251_s3] sm:$0xff] %v70_v25  ;;  %v74_v37 = vmax.f32 %v58_v21, 0.0  ;;  %v76_v42 = vmax.f32 %v60_v28, 0.0  ;;  %v44_v43 = vmul.f32 %v106_v1, %v24_v29  ;;  %v45_v44 = vmul.f32 %v106_v1, %v25_v30 }
   0xa   :  { %87 = vst [vmem:[%s251_s3 + $0x8] sm:$0xff] %v71_v26  ;;  %v46_v45 = vmul.f32 %v106_v1, %v26_v31  ;;  %v62_v46 = vadd.f32 %v137_v2, %v42_v39  ;;  %v63_v47 = vadd.f32 %v137_v2, %v43_v40  ;;  %v47_v48 = vmul.f32 %v106_v1, %v27_v35 }
   0xb   :  { %88 = vst [vmem:[%s251_s3 + $0x10] sm:$0xff] %v72_v32  ;;  %v48_v49 = vmul.f32 %v106_v1, %v28_v36  ;;  %v77_v50 = vmax.f32 %v61_v34, 0.0  ;;  %v64_v51 = vadd.f32 %v137_v2, %v44_v43  ;;  %v65_v52 = vadd.f32 %v137_v2, %v45_v44 }
   0xc   :  { %89 = vst [vmem:[%s251_s3 + $0x18] sm:$0xff] %v73_v33  ;;  %v49_v53 = vmul.f32 %v106_v1, %v29_v41  ;;  %v78_v54 = vmax.f32 %v62_v46, 0.0  ;;  %v66_v55 = vadd.f32 %v137_v2, %v46_v45  ;;  %v79_v56 = vmax.f32 %v63_v47, 0.0 }
   0xd   :  { %90 = vst [vmem:[%s251_s3 + $0x20] sm:$0xff] %v74_v37  ;;  %v67_v57 = vadd.f32 %v137_v2, %v47_v48  ;;  %v80_v58 = vmax.f32 %v64_v51, 0.0  ;;  %v68_v59 = vadd.f32 %v137_v2, %v48_v49  ;;  %v81_v60 = vmax.f32 %v65_v52, 0.0 }
   0xe   :  { %91 = vst [vmem:[%s251_s3 + $0x28] sm:$0xff] %v75_v38  ;;  %v69_v61 = vadd.f32 %v137_v2, %v49_v53  ;;  %v82_v62 = vmax.f32 %v66_v55, 0.0 }
   0xf   :  { %92 = vst [vmem:[%s251_s3 + $0x30] sm:$0xff] %v76_v42  ;;  %v83_v63 = vmax.f32 %v67_v57, 0.0  ;;  %v84_v0 = vmax.f32 %v68_v59, 0.0 }
  0x10   :  { %93 = vst [vmem:[%s251_s3 + $0x38] sm:$0xff] %v77_v50  ;;  %v85_v1 = vmax.f32 %v69_v61, 0.0 }
  0x11   :  { %94 = vst [vmem:[%s251_s3 + $0x40] sm:$0xff] %v78_v54 }
  0x12   :  { %95 = vst [vmem:[%s251_s3 + $0x48] sm:$0xff] %v79_v56 }
  0x13   :  { %96 = vst [vmem:[%s251_s3 + $0x50] sm:$0xff] %v80_v58 }
  0x14   :  { %97 = vst [vmem:[%s251_s3 + $0x58] sm:$0xff] %v81_v60 }
  0x15   :  { %98 = vst [vmem:[%s251_s3 + $0x60] sm:$0xff] %v82_v62 }
  0x16   :  { %99 = vst [vmem:[%s251_s3 + $0x68] sm:$0xff] %v83_v63 }
  0x17   :  { %100 = vst [vmem:[%s251_s3 + $0x70] sm:$0xff] %v84_v0 }
  0x18   :  { %101 = vst [vmem:[%s251_s3 + $0x78] sm:$0xff] %v85_v1 }

// kernel: resnet_forward.23
= control target key start
LH: loop header
LB: loop body
LE: loop exit
PB: predicated region body
PF: predicated region fallthrough
CT: control target
= control target key end

     0   :  { %vm108_vm0 = vcmask 130048   ;;  %vm179_vm1 = vcmask 1040384   ;;  %vm181_vm2 = vcmask 1041408   ;;  %s355_s1 = inlined_call_operand.vmem [shape: bf16[144,128], index: 1, kind: input, shape index: {}]   ;;  %s356_s0 = inlined_call_operand.vmem [shape: bf16[32,144], index: 0, kind: input, shape index: {}]   ;;  %s357_s2 = inlined_call_operand.vmem [shape: f32[32,128], index: 2, kind: output, shape index: {0}]   ;;  %s358_s3 = inlined_call_operand.vmem [shape: f32[1,8,128], index: 3, kind: output, shape index: {1}]  }
   0x1   :  { %v257_v0 = vld [vmem:[%s355_s1 + $0x38] sm:$0xff]  ;;  %v258_v1 = vld [vmem:[%s355_s1 + $0x40] sm:$0xff]  ;;  %v256_v3 = vld [vmem:[%s355_s1 + $0x30] sm:$0xff] }
   0x2   :  { %v246_v2 = vld [vmem:[%s356_s0 + $0x4] sm:$0xf]  ;;  %115 = vmatpush.bf16.msra.mxu0 %v257_v0  ;;  %259 = vmatpush.bf16.msra.mxu2 %v257_v0  ;;  %v196_v4 = vld [vmem:[%s356_s0 + $0x8] sm:$0xf0]  ;;  %v253_v8 = vld [vmem:[%s355_s1 + $0x18] sm:$0xff] }
   0x3   :  { %141 = vmatpush.bf16.msra.mxu1 %v258_v1  ;;  %v199_v5 = vor.u32 %v246_v2, %v196_v4  ;;  %v255_v6 = vld [vmem:[%s355_s1 + $0x28] sm:$0xff]  ;;  %v254_v7 = vld [vmem:[%s355_s1 + $0x20] sm:$0xff]  ;;  %v248_v9 = vld [vmem:[%s356_s0 + $0x14] sm:$0xf] }
   0x4   :  { %v204_v10 = vld [vmem:[%s356_s0 + $0x18] sm:$0xf0]  ;;  %v252_v11 = vld [vmem:[%s355_s1 + $0x10] sm:$0xff]  ;;  %v251_v13 = vld [vmem:[%s355_s1 + $0x8] sm:$0xff] }
   0x5   :  { %v207_v12 = vor.u32 %v248_v9, %v204_v10  ;;  %v250_v14 = vld [vmem:[%s355_s1] sm:$0xff]  ;;  %v247_v16 = vld [vmem:[%s356_s0 + $0x4] sm:$0xf0]  ;;  %v202_v17 = vld [vmem:[%s356_s0 + $0x10] sm:$0xf] }
   0x6   :  { %116 = vmatpush.bf16.msra.mxu0 %v256_v3  ;;  %260 = vmatpush.bf16.msra.mxu2 %v256_v3  ;;  %v194_v15 = vld [vmem:[%s356_s0] sm:$0xf]  ;;  %v249_v18 = vld [vmem:[%s356_s0 + $0x14] sm:$0xf0] }
   0x7   :  { %244 = vmatmul.msk.bf16.vlgmr.msra.gmra.mxu1 %vm108_vm0, %v199_v5  ;;  %v195_v19 = vor.u32 %v247_v16, %v194_v15  ;;  %v203_v20 = vor.u32 %v249_v18, %v202_v17 }
   0xa   :  { %117 = vmatpush.bf16.msra.mxu0 %v255_v6  ;;  %261 = vmatpush.bf16.msra.mxu2 %v255_v6 }
   0xe   :  { %118 = vmatpush.bf16.msra.mxu0 %v254_v7  ;;  %262 = vmatpush.bf16.msra.mxu2 %v254_v7 }
  0x12   :  { %119 = vmatpush.bf16.msra.mxu0 %v253_v8  ;;  %263 = vmatpush.bf16.msra.mxu2 %v253_v8 }
  0x16   :  { %120 = vmatpush.bf16.msra.mxu0 %v252_v11  ;;  %264 = vmatpush.bf16.msra.mxu2 %v252_v11 }
  0x17   :  { %245 = vmatmul.msk.bf16.gmra.mxu1 %vm108_vm0, %v207_v12 }
  0x1a   :  { %121 = vmatpush.bf16.msra.mxu0 %v251_v13  ;;  %265 = vmatpush.bf16.msra.mxu2 %v251_v13 }
  0x1e   :  { %122 = vmatpush.bf16.msra.mxu0 %v250_v14  ;;  %266 = vmatpush.bf16.msra.mxu2 %v250_v14 }
  0x21   :  { %123 = vmatmul.bf16.vlgmr.msra.gmra.mxu0 %v195_v19  ;;  %128 = vmatmul.bf16.vlgmr.msra.gmra.mxu2 %v203_v20 }
  0x84   :  { %v143_v21 = vpop.f32.mrf.mxu1 }
  0x8c   :  { %v145_v22 = vpop.f32.mrf.mxu1 }
  0x94   :  { %v148_v25 = vpop.f32.mrf.mxu1 }
  0x9c   :  { %v150_v34 = vpop.f32.mrf.mxu1 }
  0x9e   :  { %v124_v23 = vpop.f32.mrf.mxu0 }
  0x9f   :  { %v144_v24 = vadd.f32 %v143_v21, %v124_v23 }
  0xa1   :  { %153 = vst [vmem:[%s357_s2] sm:$0xff] %v144_v24  ;;  %v166_v30 = vmul.f32 %v144_v24, %v144_v24 }
  0xa4   :  { %v129_v26 = vpop.f32.mrf.mxu2 }
  0xa5   :  { %v149_v27 = vadd.f32 %v148_v25, %v129_v26 }
  0xa6   :  { %v126_v28 = vpop.f32.mrf.mxu0 }
  0xa7   :  { %155 = vst [vmem:[%s357_s2 + $0x10] sm:$0xff] %v149_v27  ;;  %v146_v29 = vadd.f32 %v145_v22, %v126_v28  ;;  %v168_v36 = vmul.f32 %v149_v27, %v149_v27 }
  0xa9   :  { %154 = vst [vmem:[%s357_s2 + $0x8] sm:$0xff] %v146_v29  ;;  %v157_v31 = vadd.f32 %v146_v29, %v144_v24  ;;  %v167_v32 = vmul.f32 %v146_v29, %v146_v29 }
  0xab   :  { %v170_v33 = vadd.f32 %v167_v32, %v166_v30  ;;  %v158_v38 = vadd.f32 %v157_v31, %v149_v27 }
  0xac   :  { %v131_v35 = vpop.f32.mrf.mxu2 }
  0xad   :  { %v151_v37 = vadd.f32 %v150_v34, %v131_v35  ;;  %v171_v41 = vadd.f32 %v170_v33, %v168_v36 }
  0xaf   :  { %156 = vst [vmem:[%s357_s2 + $0x18] sm:$0xff] %v151_v37  ;;  %v159_v39 = vadd.f32 %v158_v38, %v151_v37  ;;  %v169_v40 = vmul.f32 %v151_v37, %v151_v37 }
  0xb1   :  { %v160_v42 = vrot.slane %v159_v39, 4  ;;  %v172_v43 = vadd.f32 %v171_v41, %v169_v40 }
  0xb3   :  { %v161_v44 = vadd.f32 %v160_v42, %v159_v39  ;;  %v173_v45 = vrot.slane %v172_v43, 4 }
  0xb5   :  { %v162_v46 = vrot.slane %v161_v44, 2  ;;  %v174_v47 = vadd.f32 %v173_v45, %v172_v43 }
  0xb7   :  { %v163_v48 = vadd.f32 %v162_v46, %v161_v44  ;;  %v175_v49 = vrot.slane %v174_v47, 2 }
  0xb9   :  { %v164_v50 = vrot.slane %v163_v48, 1  ;;  %v176_v51 = vadd.f32 %v175_v49, %v174_v47 }
  0xbb   :  { %v177_v52 = vrot.slane %v176_v51, 1  ;;  %v165_v53 = vadd.f32 %v164_v50, %v163_v48 }
  0xbd   :  { %v178_v54 = vadd.f32 %v177_v52, %v176_v51 }
  0xbf   :  { %v180_v55 = vsel %vm179_vm1, %v165_v53, %v178_v54 }
  0xc0   :  { %v182_v56 = vsel %vm181_vm2, %v180_v55, 0.0 }
  0xc1   :  { %183 = vst [vmem:[%s358_s3] sm:$0xff] %v182_v56 }

// kernel: resnet_forward.24
= control target key start
LH: loop header
LB: loop body
LE: loop exit
PB: predicated region body
PF: predicated region fallthrough
CT: control target
= control target key end

     0   :  { %s98_s0 = inlined_call_operand.vmem [shape: f32[32,128], index: 0, kind: input, shape index: {}]   ;;  %s99_s1 = inlined_call_operand.vmem [shape: f32[1,128], index: 1, kind: input, shape index: {}]   ;;  %s100_s2 = inlined_call_operand.vmem [shape: f32[1,128], index: 2, kind: input, shape index: {}]   ;;  %s101_s3 = inlined_call_operand.vmem [shape: f32[32,128], index: 3, kind: output, shape index: {}]  }
   0x1   :  { %v14_v0 = vld [vmem:[%s98_s0] sm:$0xff]  ;;  %v15_v3 = vld [vmem:[%s98_s0 + $0x8] sm:$0xff]  ;;  %v16_v6 = vld [vmem:[%s98_s0 + $0x10] sm:$0xff] }
   0x2   :  { %v46_v1 = vld [vmem:[%s99_s1] ss:$0 sm:$0xff]  ;;  %v17_v7 = vld [vmem:[%s98_s0 + $0x18] sm:$0xff] }
   0x3   :  { %v47_v2 = vld [vmem:[%s100_s2] ss:$0 sm:$0xff]  ;;  %v22_v4 = vmul.f32 %v46_v1, %v14_v0  ;;  %v23_v5 = vmul.f32 %v46_v1, %v15_v3  ;;  %v24_v8 = vmul.f32 %v46_v1, %v16_v6  ;;  %v25_v9 = vmul.f32 %v46_v1, %v17_v7 }
   0x5   :  { %v30_v10 = vadd.f32 %v47_v2, %v22_v4  ;;  %v31_v11 = vadd.f32 %v47_v2, %v23_v5  ;;  %v32_v12 = vadd.f32 %v47_v2, %v24_v8  ;;  %v33_v13 = vadd.f32 %v47_v2, %v25_v9 }
   0x7   :  { %v34_v14 = vmax.f32 %v30_v10, 0.0  ;;  %v35_v15 = vmax.f32 %v31_v11, 0.0  ;;  %v36_v16 = vmax.f32 %v32_v12, 0.0  ;;  %v37_v17 = vmax.f32 %v33_v13, 0.0 }
   0x9   :  { %38 = vst [vmem:[%s101_s3] sm:$0xff] %v34_v14 }
   0xa   :  { %39 = vst [vmem:[%s101_s3 + $0x8] sm:$0xff] %v35_v15 }
   0xb   :  { %40 = vst [vmem:[%s101_s3 + $0x10] sm:$0xff] %v36_v16 }
   0xc   :  { %41 = vst [vmem:[%s101_s3 + $0x18] sm:$0xff] %v37_v17 }

// kernel: resnet_forward.25
= control target key start
LH: loop header
LB: loop body
LE: loop exit
PB: predicated region body
PF: predicated region fallthrough
CT: control target
= control target key end

     0   :  { %vm196_vm0 = vcmask 261120   ;;  %vm286_vm1 = vcmask 1040384   ;;  %vm288_vm2 = vcmask 1041408   ;;  %s556_s1 = inlined_call_operand.vmem [shape: bf16[288,128], index: 1, kind: input, shape index: {}]   ;;  %s557_s0 = inlined_call_operand.vmem [shape: bf16[32,288], index: 0, kind: input, shape index: {}]   ;;  %s558_s2 = inlined_call_operand.vmem [shape: f32[32,128], index: 2, kind: output, shape index: {0}]   ;;  %s559_s3 = inlined_call_operand.vmem [shape: f32[1,8,128], index: 3, kind: output, shape index: {1}]  }
   0x1   :  { %v410_v0 = vld [vmem:[%s556_s1 + $0x38] sm:$0xff]  ;;  %v409_v2 = vld [vmem:[%s556_s1 + $0x30] sm:$0xff]  ;;  %v420_v4 = vld [vmem:[%s556_s1 + $0x88] sm:$0xff] }
   0x2   :  { %v418_v1 = vld [vmem:[%s556_s1 + $0x78] sm:$0xff]  ;;  %203 = vmatpush.bf16.msra.mxu0 %v410_v0  ;;  %v417_v3 = vld [vmem:[%s556_s1 + $0x70] sm:$0xff]  ;;  %421 = vmatpush.bf16.msra.mxu3 %v410_v0  ;;  %v419_v5 = vld [vmem:[%s556_s1 + $0x80] sm:$0xff] }
   0x3   :  { %222 = vmatpush.bf16.msra.mxu1 %v418_v1  ;;  %247 = vmatpush.bf16.msra.mxu2 %v420_v4  ;;  %v309_v6 = vld [vmem:[%s557_s0 + $0x8] sm:$0xf]  ;;  %v399_v7 = vld [vmem:[%s557_s0 + $0x10] sm:$0xf0]  ;;  %v407_v11 = vld [vmem:[%s556_s1 + $0x20] sm:$0xff] }
   0x4   :  { %v408_v8 = vld [vmem:[%s556_s1 + $0x28] sm:$0xff]  ;;  %v310_v10 = vor.u32 %v399_v7, %v309_v6  ;;  %v415_v12 = vld [vmem:[%s556_s1 + $0x60] sm:$0xff]  ;;  %v406_v13 = vld [vmem:[%s556_s1 + $0x18] sm:$0xff] }
   0x5   :  { %v416_v9 = vld [vmem:[%s556_s1 + $0x68] sm:$0xff]  ;;  %v414_v14 = vld [vmem:[%s556_s1 + $0x58] sm:$0xff]  ;;  %v405_v15 = vld [vmem:[%s556_s1 + $0x10] sm:$0xff] }
   0x6   :  { %204 = vmatpush.bf16.msra.mxu0 %v409_v2  ;;  %422 = vmatpush.bf16.msra.mxu3 %v409_v2  ;;  %v413_v16 = vld [vmem:[%s556_s1 + $0x50] sm:$0xff]  ;;  %v321_v17 = vld [vmem:[%s557_s0 + $0x20] sm:$0xf]  ;;  %v402_v18 = vld [vmem:[%s557_s0 + $0x28] sm:$0xf0] }
   0x7   :  { %223 = vmatpush.bf16.msra.mxu1 %v417_v3  ;;  %248 = vmatpush.bf16.msra.mxu2 %v419_v5  ;;  %v404_v19 = vld [vmem:[%s556_s1 + $0x8] sm:$0xff]  ;;  %v322_v21 = vor.u32 %v402_v18, %v321_v17  ;;  %v403_v22 = vld [vmem:[%s556_s1] sm:$0xff]  ;;  %v303_v27 = vld [vmem:[%s557_s0 + $0xc] sm:$0xf0] }
   0x8   :  { %v412_v20 = vld [vmem:[%s556_s1 + $0x48] sm:$0xff]  ;;  %v411_v23 = vld [vmem:[%s556_s1 + $0x40] sm:$0xff]  ;;  %v313_v28 = vld [vmem:[%s557_s0 + $0x18] sm:$0xf] }
   0x9   :  { %v301_v24 = vld [vmem:[%s557_s0] sm:$0xf]  ;;  %v398_v25 = vld [vmem:[%s557_s0 + $0x8] sm:$0xf0]  ;;  %v397_v26 = vld [vmem:[%s557_s0 + $0x4] sm:$0xf] }
   0xa   :  { %205 = vmatpush.bf16.msra.mxu0 %v408_v8  ;;  %423 = vmatpush.bf16.msra.mxu3 %v408_v8  ;;  %v401_v29 = vld [vmem:[%s557_s0 + $0x20] sm:$0xf0]  ;;  %v302_v30 = vor.u32 %v398_v25, %v301_v24  ;;  %v306_v31 = vor.u32 %v397_v26, %v303_v27  ;;  %v400_v33 = vld [vmem:[%s557_s0 + $0x1c] sm:$0xf]  ;;  %v315_v34 = vld [vmem:[%s557_s0 + $0x24] sm:$0xf0] }
   0xb   :  { %224 = vmatpush.bf16.msra.mxu1 %v416_v9  ;;  %395 = vmatmul.msk.bf16.vlgmr.msra.gmra.mxu2 %vm196_vm0, %v310_v10  ;;  %v314_v32 = vor.u32 %v401_v29, %v313_v28  ;;  %v318_v35 = vor.u32 %v400_v33, %v315_v34 }
   0xe   :  { %206 = vmatpush.bf16.msra.mxu0 %v407_v11  ;;  %424 = vmatpush.bf16.msra.mxu3 %v407_v11 }
   0xf   :  { %225 = vmatpush.bf16.msra.mxu1 %v415_v12 }
  0x12   :  { %207 = vmatpush.bf16.msra.mxu0 %v406_v13  ;;  %425 = vmatpush.bf16.msra.mxu3 %v406_v13 }
  0x13   :  { %226 = vmatpush.bf16.msra.mxu1 %v414_v14 }
  0x16   :  { %208 = vmatpush.bf16.msra.mxu0 %v405_v15  ;;  %426 = vmatpush.bf16.msra.mxu3 %v405_v15 }
  0x17   :  { %227 = vmatpush.bf16.msra.mxu1 %v413_v16 }
  0x1a   :  { %209 = vmatpush.bf16.msra.mxu0 %v404_v19  ;;  %427 = vmatpush.bf16.msra.mxu3 %v404_v19 }
  0x1b   :  { %228 = vmatpush.bf16.msra.mxu1 %v412_v20  ;;  %396 = vmatmul.msk.bf16.gmra.mxu2 %vm196_vm0, %v322_v21 }
  0x1e   :  { %210 = vmatpush.bf16.msra.mxu0 %v403_v22  ;;  %428 = vmatpush.bf16.msra.mxu3 %v403_v22 }
  0x1f   :  { %229 = vmatpush.bf16.msra.mxu1 %v411_v23 }
  0x21   :  { %211 = vmatmul.bf16.vlgmr.msra.gmra.mxu0 %v302_v30  ;;  %216 = vmatmul.bf16.vlgmr.msra.gmra.mxu3 %v314_v32 }
  0x22   :  { %230 = vmatmul.bf16.vlgmr.msra.gmra.mxu1 %v306_v31 }
  0x32   :  { %235 = vmatmul.bf16.gmra.mxu1 %v318_v35 }
  0x8e   :  { %v250_v36 = vpop.f32.mrf.mxu2 }
  0x96   :  { %v252_v41 = vpop.f32.mrf.mxu2 }
  0x9e   :  { %v212_v37 = vpop.f32.mrf.mxu0  ;;  %v255_v47 = vpop.f32.mrf.mxu2 }
  0x9f   :  { %v231_v38 = vpop.f32.mrf.mxu1 }
  0xa0   :  { %v232_v39 = vadd.f32 %v231_v38, %v212_v37 }
  0xa2   :  { %v251_v40 = vadd.f32 %v250_v36, %v232_v39 }
  0xa4   :  { %260 = vst [vmem:[%s558_s2] sm:$0xff] %v251_v40  ;;  %v217_v46 = vpop.f32.mrf.mxu3  ;;  %v273_v54 = vmul.f32 %v251_v40, %v251_v40 }
  0xa6   :  { %v214_v42 = vpop.f32.mrf.mxu0  ;;  %v257_v58 = vpop.f32.mrf.mxu2 }
  0xa7   :  { %v233_v43 = vpop.f32.mrf.mxu1 }
  0xa8   :  { %v234_v44 = vadd.f32 %v233_v43, %v214_v42 }
  0xaa   :  { %v253_v45 = vadd.f32 %v252_v41, %v234_v44 }
  0xac   :  { %261 = vst [vmem:[%s558_s2 + $0x8] sm:$0xff] %v253_v45  ;;  %v274_v51 = vmul.f32 %v253_v45, %v253_v45  ;;  %v219_v52 = vpop.f32.mrf.mxu3  ;;  %v264_v55 = vadd.f32 %v253_v45, %v251_v40 }
  0xae   :  { %v277_v59 = vadd.f32 %v274_v51, %v273_v54 }
  0xaf   :  { %v236_v48 = vpop.f32.mrf.mxu1 }
  0xb0   :  { %v237_v49 = vadd.f32 %v236_v48, %v217_v46 }
  0xb2   :  { %v256_v50 = vadd.f32 %v255_v47, %v237_v49 }
  0xb4   :  { %262 = vst [vmem:[%s558_s2 + $0x10] sm:$0xff] %v256_v50  ;;  %v275_v56 = vmul.f32 %v256_v50, %v256_v50  ;;  %v265_v60 = vadd.f32 %v264_v55, %v256_v50 }
  0xb6   :  { %v278_v62 = vadd.f32 %v277_v59, %v275_v56 }
  0xb7   :  { %v238_v53 = vpop.f32.mrf.mxu1 }
  0xb8   :  { %v239_v57 = vadd.f32 %v238_v53, %v219_v52 }
  0xba   :  { %v258_v61 = vadd.f32 %v257_v58, %v239_v57 }
  0xbc   :  { %263 = vst [vmem:[%s558_s2 + $0x18] sm:$0xff] %v258_v61  ;;  %v266_v63 = vadd.f32 %v265_v60, %v258_v61  ;;  %v276_v0 = vmul.f32 %v258_v61, %v258_v61 }
  0xbe   :  { %v267_v1 = vrot.slane %v266_v63, 4  ;;  %v279_v2 = vadd.f32 %v278_v62, %v276_v0 }
  0xc0   :  { %v268_v3 = vadd.f32 %v267_v1, %v266_v63  ;;  %v280_v4 = vrot.slane %v279_v2, 4 }
  0xc2   :  { %v269_v5 = vrot.slane %v268_v3, 2  ;;  %v281_v6 = vadd.f32 %v280_v4, %v279_v2 }
  0xc4   :  { %v270_v7 = vadd.f32 %v269_v5, %v268_v3  ;;  %v282_v8 = vrot.slane %v281_v6, 2 }
  0xc6   :  { %v271_v9 = vrot.slane %v270_v7, 1  ;;  %v283_v10 = vadd.f32 %v282_v8, %v281_v6 }
  0xc8   :  { %v284_v11 = vrot.slane %v283_v10, 1  ;;  %v272_v12 = vadd.f32 %v271_v9, %v270_v7 }
  0xca   :  { %v285_v13 = vadd.f32 %v284_v11, %v283_v10 }
  0xcc   :  { %v287_v14 = vsel %vm286_vm1, %v272_v12, %v285_v13 }
  0xcd   :  { %v289_v15 = vsel %vm288_vm2, %v287_v14, 0.0 }
  0xce   :  { %290 = vst [vmem:[%s559_s3] sm:$0xff] %v289_v15 }

// kernel: resnet_forward.28
= control target key start
LH: loop header
LB: loop body
LE: loop exit
PB: predicated region body
PF: predicated region fallthrough
CT: control target
= control target key end

     0   :  { %s122_s0 = inlined_call_operand.vmem [shape: f32[32,128], index: 0, kind: input, shape index: {}]   ;;  %s123_s1 = inlined_call_operand.vmem [shape: f32[1,128], index: 1, kind: input, shape index: {}]   ;;  %s124_s2 = inlined_call_operand.vmem [shape: f32[1,128], index: 2, kind: input, shape index: {}]   ;;  %s125_s3 = inlined_call_operand.vmem [shape: f32[32,128], index: 3, kind: input, shape index: {}]   ;;  %s126_s4 = inlined_call_operand.vmem [shape: f32[32,128], index: 4, kind: output, shape index: {}]  }
   0x1   :  { %v17_v0 = vld [vmem:[%s122_s0] sm:$0xff]  ;;  %v18_v4 = vld [vmem:[%s122_s0 + $0x8] sm:$0xff]  ;;  %v19_v5 = vld [vmem:[%s122_s0 + $0x10] sm:$0xff] }
   0x2   :  { %v53_v1 = vld [vmem:[%s123_s1] ss:$0 sm:$0xff]  ;;  %v20_v9 = vld [vmem:[%s122_s0 + $0x18] sm:$0xff]  ;;  %v38_v11 = vld [vmem:[%s125_s3 + $0x8] sm:$0xff] }
   0x3   :  { %v54_v2 = vld [vmem:[%s124_s2] ss:$0 sm:$0xff]  ;;  %v25_v3 = vmul.f32 %v53_v1, %v17_v0  ;;  %v26_v7 = vmul.f32 %v53_v1, %v18_v4  ;;  %v27_v8 = vmul.f32 %v53_v1, %v19_v5  ;;  %v39_v12 = vld [vmem:[%s125_s3 + $0x10] sm:$0xff]  ;;  %v28_v13 = vmul.f32 %v53_v1, %v20_v9  ;;  %v40_v16 = vld [vmem:[%s125_s3 + $0x18] sm:$0xff] }
   0x4   :  { %v37_v6 = vld [vmem:[%s125_s3] sm:$0xff] }
   0x5   :  { %v33_v10 = vadd.f32 %v54_v2, %v25_v3  ;;  %v34_v14 = vadd.f32 %v54_v2, %v26_v7  ;;  %v35_v15 = vadd.f32 %v54_v2, %v27_v8  ;;  %v36_v18 = vadd.f32 %v54_v2, %v28_v13 }
   0x7   :  { %v41_v17 = vadd.f32 %v37_v6, %v33_v10  ;;  %v42_v19 = vadd.f32 %v38_v11, %v34_v14  ;;  %v43_v20 = vadd.f32 %v39_v12, %v35_v15  ;;  %v44_v21 = vadd.f32 %v40_v16, %v36_v18 }
   0x9   :  { %45 = vst [vmem:[%s126_s4] sm:$0xff] %v41_v17 }
   0xa   :  { %46 = vst [vmem:[%s126_s4 + $0x8] sm:$0xff] %v42_v19 }
   0xb   :  { %47 = vst [vmem:[%s126_s4 + $0x10] sm:$0xff] %v43_v20 }
   0xc   :  { %48 = vst [vmem:[%s126_s4 + $0x18] sm:$0xff] %v44_v21 }

// kernel: resnet_forward.33
= control target key start
LH: loop header
LB: loop body
LE: loop exit
PB: predicated region body
PF: predicated region fallthrough
CT: control target
= control target key end

     0   :  { %vm310_vm0 = vcmask 261120   ;;  %vm572_vm1 = vcmask 1040384   ;;  %vm574_vm2 = vcmask 1041408   ;;  %s1108_s1 = inlined_call_operand.vmem [shape: bf16[288,128], index: 1, kind: input, shape index: {}]   ;;  %s1109_s0 = inlined_call_operand.vmem [shape: bf16[128,288], index: 0, kind: input, shape index: {}]   ;;  %s1110_s2 = inlined_call_operand.vmem [shape: f32[128,128], index: 2, kind: output, shape index: {0}]   ;;  %s1111_s3 = inlined_call_operand.vmem [shape: f32[1,8,128], index: 3, kind: output, shape index: {1}]  }
   0x1   :  { %v792_v0 = vld [vmem:[%s1108_s1 + $0x38] sm:$0xff]  ;;  %v802_v2 = vld [vmem:[%s1108_s1 + $0x88] sm:$0xff]  ;;  %v791_v3 = vld [vmem:[%s1108_s1 + $0x30] sm:$0xff] }
   0x2   :  { %v800_v1 = vld [vmem:[%s1108_s1 + $0x78] sm:$0xff]  ;;  %335 = vmatpush.bf16.msra.mxu0 %v792_v0  ;;  %803 = vmatpush.bf16.msra.mxu3 %v792_v0  ;;  %v799_v4 = vld [vmem:[%s1108_s1 + $0x70] sm:$0xff]  ;;  %v801_v5 = vld [vmem:[%s1108_s1 + $0x80] sm:$0xff] }
   0x3   :  { %384 = vmatpush.bf16.msra.mxu1 %v800_v1  ;;  %439 = vmatpush.bf16.msra.mxu2 %v802_v2  ;;  %v595_v6 = vld [vmem:[%s1109_s0 + $0x8] sm:$0xf]  ;;  %v763_v7 = vld [vmem:[%s1109_s0 + $0x10] sm:$0xf0]  ;;  %v789_v11 = vld [vmem:[%s1108_s1 + $0x20] sm:$0xff] }
   0x4   :  { %v596_v8 = vor.u32 %v763_v7, %v595_v6  ;;  %v790_v9 = vld [vmem:[%s1108_s1 + $0x28] sm:$0xff]  ;;  %v797_v12 = vld [vmem:[%s1108_s1 + $0x60] sm:$0xff]  ;;  %v788_v13 = vld [vmem:[%s1108_s1 + $0x18] sm:$0xff] }
   0x5   :  { %v798_v10 = vld [vmem:[%s1108_s1 + $0x68] sm:$0xff]  ;;  %v796_v14 = vld [vmem:[%s1108_s1 + $0x58] sm:$0xff]  ;;  %v787_v15 = vld [vmem:[%s1108_s1 + $0x10] sm:$0xff] }
   0x6   :  { %336 = vmatpush.bf16.msra.mxu0 %v791_v3  ;;  %804 = vmatpush.bf16.msra.mxu3 %v791_v3  ;;  %v795_v16 = vld [vmem:[%s1108_s1 + $0x50] sm:$0xff]  ;;  %v607_v17 = vld [vmem:[%s1109_s0 + $0x20] sm:$0xf]  ;;  %v766_v18 = vld [vmem:[%s1109_s0 + $0x28] sm:$0xf0] }
   0x7   :  { %385 = vmatpush.bf16.msra.mxu1 %v799_v4  ;;  %440 = vmatpush.bf16.msra.mxu2 %v801_v5  ;;  %v608_v19 = vor.u32 %v766_v18, %v607_v17  ;;  %v786_v20 = vld [vmem:[%s1108_s1 + $0x8] sm:$0xff]  ;;  %v785_v22 = vld [vmem:[%s1108_s1] sm:$0xff]  ;;  %v659_v26 = vld [vmem:[%s1109_s0 + $0x90] sm:$0xf] }
   0x8   :  { %v794_v21 = vld [vmem:[%s1108_s1 + $0x48] sm:$0xff]  ;;  %v793_v23 = vld [vmem:[%s1108_s1 + $0x40] sm:$0xff]  ;;  %v780_v27 = vld [vmem:[%s1109_s0 + $0x98] sm:$0xf0] }
   0x9   :  { %v587_v24 = vld [vmem:[%s1109_s0] sm:$0xf]  ;;  %v762_v25 = vld [vmem:[%s1109_s0 + $0x8] sm:$0xf0]  ;;  %v761_v28 = vld [vmem:[%s1109_s0 + $0x4] sm:$0xf]  ;;  %v660_v31 = vor.u32 %v780_v27, %v659_v26 }
   0xa   :  { %753 = vmatmul.msk.bf16.vlgmr.msra.gmra.mxu2 %vm310_vm0, %v596_v8  ;;  %337 = vmatpush.bf16.msra.mxu0 %v790_v9  ;;  %v589_v29 = vld [vmem:[%s1109_s0 + $0xc] sm:$0xf0]  ;;  %v588_v30 = vor.u32 %v762_v25, %v587_v24  ;;  %v619_v33 = vld [vmem:[%s1109_s0 + $0x38] sm:$0xf]  ;;  %v769_v34 = vld [vmem:[%s1109_s0 + $0x40] sm:$0xf0] }
   0xb   :  { %805 = vmatpush.bf16.msra.mxu3 %v790_v9  ;;  %386 = vmatpush.bf16.msra.mxu1 %v798_v10  ;;  %v592_v32 = vor.u32 %v761_v28, %v589_v29  ;;  %v620_v35 = vor.u32 %v769_v34, %v619_v33  ;;  %v599_v36 = vld [vmem:[%s1109_s0 + $0x18] sm:$0xf]  ;;  %v765_v37 = vld [vmem:[%s1109_s0 + $0x20] sm:$0xf0]  ;;  %v671_v38 = vld [vmem:[%s1109_s0 + $0xa8] sm:$0xf] }
   0xc   :  { %v783_v39 = vld [vmem:[%s1109_s0 + $0xb0] sm:$0xf0]  ;;  %v764_v40 = vld [vmem:[%s1109_s0 + $0x1c] sm:$0xf]  ;;  %v601_v41 = vld [vmem:[%s1109_s0 + $0x24] sm:$0xf0]  ;;  %v600_v42 = vor.u32 %v765_v37, %v599_v36 }
   0xd   :  { %v672_v43 = vor.u32 %v783_v39, %v671_v38  ;;  %v604_v44 = vor.u32 %v764_v40, %v601_v41  ;;  %v631_v45 = vld [vmem:[%s1109_s0 + $0x50] sm:$0xf]  ;;  %v772_v46 = vld [vmem:[%s1109_s0 + $0x58] sm:$0xf0]  ;;  %v767_v50 = vld [vmem:[%s1109_s0 + $0x34] sm:$0xf] }
   0xe   :  { %338 = vmatpush.bf16.msra.mxu0 %v789_v11  ;;  %v632_v47 = vor.u32 %v772_v46, %v631_v45  ;;  %v611_v48 = vld [vmem:[%s1109_s0 + $0x30] sm:$0xf]  ;;  %v768_v49 = vld [vmem:[%s1109_s0 + $0x38] sm:$0xf0]  ;;  %v613_v51 = vld [vmem:[%s1109_s0 + $0x3c] sm:$0xf0] }
   0xf   :  { %806 = vmatpush.bf16.msra.mxu3 %v789_v11  ;;  %387 = vmatpush.bf16.msra.mxu1 %v797_v12  ;;  %v779_v52 = vld [vmem:[%s1109_s0 + $0x94] sm:$0xf]  ;;  %v661_v53 = vld [vmem:[%s1109_s0 + $0x9c] sm:$0xf0]  ;;  %v612_v54 = vor.u32 %v768_v49, %v611_v48  ;;  %v616_v55 = vor.u32 %v767_v50, %v613_v51  ;;  %v643_v57 = vld [vmem:[%s1109_s0 + $0x68] sm:$0xf] }
  0x10   :  { %v664_v56 = vor.u32 %v779_v52, %v661_v53  ;;  %v775_v58 = vld [vmem:[%s1109_s0 + $0x70] sm:$0xf0]  ;;  %v623_v60 = vld [vmem:[%s1109_s0 + $0x48] sm:$0xf]  ;;  %v770_v62 = vld [vmem:[%s1109_s0 + $0x4c] sm:$0xf] }
  0x11   :  { %v644_v59 = vor.u32 %v775_v58, %v643_v57  ;;  %v771_v61 = vld [vmem:[%s1109_s0 + $0x50] sm:$0xf0]  ;;  %v625_v63 = vld [vmem:[%s1109_s0 + $0x54] sm:$0xf0]  ;;  %v782_v0 = vld [vmem:[%s1109_s0 + $0xac] sm:$0xf] }
  0x12   :  { %339 = vmatpush.bf16.msra.mxu0 %v788_v13  ;;  %v624_v2 = vor.u32 %v771_v61, %v623_v60  ;;  %v628_v3 = vor.u32 %v770_v62, %v625_v63  ;;  %v655_v5 = vld [vmem:[%s1109_s0 + $0x80] sm:$0xf]  ;;  %v778_v6 = vld [vmem:[%s1109_s0 + $0x88] sm:$0xf0]  ;;  %v637_v11 = vld [vmem:[%s1109_s0 + $0x6c] sm:$0xf0] }
  0x13   :  { %807 = vmatpush.bf16.msra.mxu3 %v788_v13  ;;  %388 = vmatpush.bf16.msra.mxu1 %v796_v14  ;;  %v656_v7 = vor.u32 %v778_v6, %v655_v5  ;;  %v635_v8 = vld [vmem:[%s1109_s0 + $0x60] sm:$0xf]  ;;  %v774_v9 = vld [vmem:[%s1109_s0 + $0x68] sm:$0xf0]  ;;  %v647_v17 = vld [vmem:[%s1109_s0 + $0x78] sm:$0xf] }
  0x14   :  { %v777_v18 = vld [vmem:[%s1109_s0 + $0x80] sm:$0xf0]  ;;  %v784_v24 = vld [vmem:[%s1109_s0 + $0xb8] sm:$0xf0] }
  0x16   :  { %340 = vmatpush.bf16.msra.mxu0 %v787_v15 }
  0x17   :  { %808 = vmatpush.bf16.msra.mxu3 %v787_v15  ;;  %389 = vmatpush.bf16.msra.mxu1 %v795_v16  ;;  %v781_v15 = vld [vmem:[%s1109_s0 + $0xa0] sm:$0xf0] }
  0x1a   :  { %754 = vmatmul.msk.bf16.gmra.mxu2 %vm310_vm0, %v608_v19  ;;  %341 = vmatpush.bf16.msra.mxu0 %v786_v20  ;;  %v776_v19 = vld [vmem:[%s1109_s0 + $0x7c] sm:$0xf] }
  0x1b   :  { %809 = vmatpush.bf16.msra.mxu3 %v786_v20  ;;  %390 = vmatpush.bf16.msra.mxu1 %v794_v21  ;;  %v649_v20 = vld [vmem:[%s1109_s0 + $0x84] sm:$0xf0] }
  0x1e   :  { %342 = vmatpush.bf16.msra.mxu0 %v785_v22 }
  0x1f   :  { %810 = vmatpush.bf16.msra.mxu3 %v785_v22  ;;  %391 = vmatpush.bf16.msra.mxu1 %v793_v23  ;;  %v652_v22 = vor.u32 %v776_v19, %v649_v20 }
  0x21   :  { %343 = vmatmul.bf16.vlgmr.msra.gmra.mxu0 %v588_v30 }
  0x22   :  { %373 = vmatmul.bf16.vlgmr.msra.gmra.mxu3 %v660_v31  ;;  %392 = vmatmul.bf16.vlgmr.msra.gmra.mxu1 %v592_v32 }
  0x23   :  { %811 = vmatpush.bf16.msrb.mxu3 %v800_v1  ;;  %v673_v1 = vld [vmem:[%s1109_s0 + $0xb4] sm:$0xf0] }
  0x27   :  { %812 = vmatpush.bf16.msrb.mxu3 %v799_v4  ;;  %v676_v4 = vor.u32 %v782_v0, %v673_v1 }
  0x2a   :  { %755 = vmatmul.msk.bf16.gmra.mxu2 %vm310_vm0, %v620_v35 }
  0x2b   :  { %813 = vmatpush.bf16.msrb.mxu3 %v798_v10  ;;  %v773_v10 = vld [vmem:[%s1109_s0 + $0x64] sm:$0xf] }
  0x2c   :  { %v640_v13 = vor.u32 %v773_v10, %v637_v11 }
  0x2f   :  { %814 = vmatpush.bf16.msrb.mxu3 %v797_v12  ;;  %v636_v12 = vor.u32 %v774_v9, %v635_v8 }
  0x31   :  { %348 = vmatmul.bf16.gmra.mxu0 %v600_v42 }
  0x32   :  { %378 = vmatmul.bf16.gmra.mxu3 %v672_v43  ;;  %397 = vmatmul.bf16.gmra.mxu1 %v604_v44 }
  0x33   :  { %815 = vmatpush.bf16.msrb.mxu3 %v796_v14  ;;  %v667_v14 = vld [vmem:[%s1109_s0 + $0x98] sm:$0xf] }
  0x37   :  { %816 = vmatpush.bf16.msrb.mxu3 %v795_v16  ;;  %v668_v16 = vor.u32 %v781_v15, %v667_v14 }
  0x3a   :  { %756 = vmatmul.msk.bf16.gmra.mxu2 %vm310_vm0, %v632_v47 }
  0x3b   :  { %817 = vmatpush.bf16.msrb.mxu3 %v794_v21  ;;  %v648_v21 = vor.u32 %v777_v18, %v647_v17 }
  0x3f   :  { %818 = vmatpush.bf16.msrb.mxu3 %v793_v23  ;;  %v679_v23 = vld [vmem:[%s1109_s0 + $0xb0] sm:$0xf] }
  0x40   :  { %v680_v25 = vor.u32 %v784_v24, %v679_v23 }
  0x41   :  { %353 = vmatmul.bf16.gmra.mxu0 %v612_v54 }
  0x42   :  { %402 = vmatmul.bf16.gmra.mxu1 %v616_v55  ;;  %422 = vmatmul.bf16.vlgmr.msrb.gmra.mxu3 %v664_v56 }
  0x4a   :  { %757 = vmatmul.msk.bf16.gmra.mxu2 %vm310_vm0, %v644_v59 }
  0x51   :  { %358 = vmatmul.bf16.gmra.mxu0 %v624_v2 }
  0x52   :  { %407 = vmatmul.bf16.gmra.mxu1 %v628_v3  ;;  %427 = vmatmul.bf16.gmra.mxu3 %v676_v4 }
  0x5a   :  { %758 = vmatmul.msk.bf16.gmra.mxu2 %vm310_vm0, %v656_v7 }
  0x61   :  { %363 = vmatmul.bf16.gmra.mxu0 %v636_v12 }
  0x62   :  { %412 = vmatmul.bf16.gmra.mxu1 %v640_v13 }
  0x6a   :  { %759 = vmatmul.msk.bf16.gmra.mxu2 %vm310_vm0, %v668_v16 }
  0x71   :  { %368 = vmatmul.bf16.gmra.mxu0 %v648_v21 }
  0x72   :  { %417 = vmatmul.bf16.gmra.mxu1 %v652_v22 }
  0x7a   :  { %760 = vmatmul.msk.bf16.gmra.mxu2 %vm310_vm0, %v680_v25 }
  0x8d   :  { %v442_v26 = vpop.f32.mrf.mxu2 }
  0x95   :  { %v444_v27 = vpop.f32.mrf.mxu2 }
  0x9d   :  { %v447_v28 = vpop.f32.mrf.mxu2 }
  0x9e   :  { %v344_v29 = vpop.f32.mrf.mxu0 }
  0x9f   :  { %v393_v30 = vpop.f32.mrf.mxu1 }
  0xa0   :  { %v394_v31 = vadd.f32 %v393_v30, %v344_v29 }
  0xa2   :  { %v443_v32 = vadd.f32 %v442_v26, %v394_v31 }
  0xa4   :  { %v482_v33 = vmax.f32 %v443_v32, 0.0 }
  0xa5   :  { %v449_v34 = vpop.f32.mrf.mxu2  ;;  %v374_v55 = vpop.f32.mrf.mxu3 }
  0xa6   :  { %498 = vst [vmem:[%s1110_s2] sm:$0xff] %v482_v33  ;;  %v346_v35 = vpop.f32.mrf.mxu0  ;;  %v535_v41 = vmul.f32 %v482_v33, %v482_v33 }
  0xa7   :  { %v395_v36 = vpop.f32.mrf.mxu1 }
  0xa8   :  { %v396_v37 = vadd.f32 %v395_v36, %v346_v35 }
  0xaa   :  { %v445_v38 = vadd.f32 %v444_v27, %v396_v37 }
  0xac   :  { %v483_v39 = vmax.f32 %v445_v38, 0.0 }
  0xad   :  { %v452_v40 = vpop.f32.mrf.mxu2  ;;  %v1059_v63 = vpop.f32.mrf.mxu3 }
  0xae   :  { %499 = vst [vmem:[%s1110_s2 + $0x8] sm:$0xff] %v483_v39  ;;  %v1051_v42 = vadd.f32 %v483_v39, %v482_v33  ;;  %v536_v43 = vmul.f32 %v483_v39, %v483_v39  ;;  %v349_v44 = vpop.f32.mrf.mxu0 }
  0xaf   :  { %v398_v45 = vpop.f32.mrf.mxu1 }
  0xb0   :  { %v551_v46 = vadd.f32 %v536_v43, %v535_v41  ;;  %v399_v47 = vadd.f32 %v398_v45, %v349_v44 }
  0xb2   :  { %v448_v48 = vadd.f32 %v447_v28, %v399_v47 }
  0xb4   :  { %v484_v49 = vmax.f32 %v448_v48, 0.0 }
  0xb5   :  { %v454_v50 = vpop.f32.mrf.mxu2  ;;  %v1067_v8 = vpop.f32.mrf.mxu3 }
  0xb6   :  { %500 = vst [vmem:[%s1110_s2 + $0x10] sm:$0xff] %v484_v49  ;;  %v351_v51 = vpop.f32.mrf.mxu0  ;;  %v537_v31 = vmul.f32 %v484_v49, %v484_v49 }
  0xb7   :  { %v400_v52 = vpop.f32.mrf.mxu1 }
  0xb8   :  { %v401_v53 = vadd.f32 %v400_v52, %v351_v51  ;;  %v552_v37 = vadd.f32 %v551_v46, %v537_v31 }
  0xba   :  { %v450_v54 = vadd.f32 %v449_v34, %v401_v53  ;;  %v515_v34 = vadd.f32 %v1051_v42, %v484_v49 }
  0xbc   :  { %v485_v56 = vmax.f32 %v450_v54, 0.0 }
  0xbd   :  { %v457_v57 = vpop.f32.mrf.mxu2  ;;  %v1072_v17 = vpop.f32.mrf.mxu3 }
  0xbe   :  { %501 = vst [vmem:[%s1110_s2 + $0x18] sm:$0xff] %v485_v56  ;;  %v354_v58 = vpop.f32.mrf.mxu0  ;;  %v538_v33 = vmul.f32 %v485_v56, %v485_v56  ;;  %v516_v41 = vadd.f32 %v515_v34, %v485_v56 }
  0xbf   :  { %v403_v59 = vpop.f32.mrf.mxu1 }
  0xc0   :  { %v404_v60 = vadd.f32 %v403_v59, %v354_v58  ;;  %v553_v45 = vadd.f32 %v552_v37, %v538_v33 }
  0xc2   :  { %v453_v61 = vadd.f32 %v452_v40, %v404_v60 }
  0xc4   :  { %v486_v62 = vmax.f32 %v453_v61, 0.0 }
  0xc5   :  { %v459_v0 = vpop.f32.mrf.mxu2  ;;  %v423_v25 = vpop.f32.mrf.mxu3 }
  0xc6   :  { %502 = vst [vmem:[%s1110_s2 + $0x20] sm:$0xff] %v486_v62  ;;  %v356_v1 = vpop.f32.mrf.mxu0  ;;  %v424_v35 = vadd.f32 %v423_v25, %v374_v55  ;;  %v539_v38 = vmul.f32 %v486_v62, %v486_v62 }
  0xc7   :  { %v405_v2 = vpop.f32.mrf.mxu1 }
  0xc8   :  { %v406_v3 = vadd.f32 %v405_v2, %v356_v1  ;;  %v554_v42 = vadd.f32 %v553_v45, %v539_v38 }
  0xca   :  { %v455_v4 = vadd.f32 %v454_v50, %v406_v3  ;;  %v517_v50 = vadd.f32 %v516_v41, %v486_v62 }
  0xcc   :  { %v487_v5 = vmax.f32 %v455_v4, 0.0 }
  0xcd   :  { %v462_v6 = vpop.f32.mrf.mxu2  ;;  %v425_v39 = vpop.f32.mrf.mxu3 }
  0xce   :  { %503 = vst [vmem:[%s1110_s2 + $0x28] sm:$0xff] %v487_v5  ;;  %v359_v7 = vpop.f32.mrf.mxu0  ;;  %v540_v47 = vmul.f32 %v487_v5, %v487_v5  ;;  %v518_v53 = vadd.f32 %v517_v50, %v487_v5  ;;  %v426_v56 = vadd.f32 %v425_v39, %v1059_v63 }
  0xcf   :  { %v408_v9 = vpop.f32.mrf.mxu1 }
  0xd0   :  { %v409_v10 = vadd.f32 %v408_v9, %v359_v7  ;;  %v555_v54 = vadd.f32 %v554_v42, %v540_v47 }
  0xd2   :  { %v458_v11 = vadd.f32 %v457_v57, %v409_v10 }
  0xd4   :  { %v488_v12 = vmax.f32 %v458_v11, 0.0 }
  0xd5   :  { %v464_v13 = vpop.f32.mrf.mxu2  ;;  %v428_v2 = vpop.f32.mrf.mxu3 }
  0xd6   :  { %504 = vst [vmem:[%s1110_s2 + $0x30] sm:$0xff] %v488_v12  ;;  %v361_v14 = vpop.f32.mrf.mxu0  ;;  %v541_v49 = vmul.f32 %v488_v12, %v488_v12  ;;  %v519_v57 = vadd.f32 %v518_v53, %v488_v12 }
  0xd7   :  { %v410_v15 = vpop.f32.mrf.mxu1 }
  0xd8   :  { %v411_v16 = vadd.f32 %v410_v15, %v361_v14  ;;  %v556_v59 = vadd.f32 %v555_v54, %v541_v49 }
  0xda   :  { %v460_v18 = vadd.f32 %v459_v0, %v411_v16 }
  0xdc   :  { %v489_v19 = vmax.f32 %v460_v18, 0.0 }
  0xdd   :  { %v467_v20 = vpop.f32.mrf.mxu2 }
  0xde   :  { %505 = vst [vmem:[%s1110_s2 + $0x38] sm:$0xff] %v489_v19  ;;  %v364_v21 = vpop.f32.mrf.mxu0  ;;  %v542_v55 = vmul.f32 %v489_v19, %v489_v19  ;;  %v520_v61 = vadd.f32 %v519_v57, %v489_v19 }
  0xdf   :  { %v413_v22 = vpop.f32.mrf.mxu1 }
  0xe0   :  { %v414_v23 = vadd.f32 %v413_v22, %v364_v21  ;;  %v557_v3 = vadd.f32 %v556_v59, %v542_v55 }
  0xe2   :  { %v463_v24 = vadd.f32 %v462_v6, %v414_v23 }
  0xe4   :  { %v490_v26 = vmax.f32 %v463_v24, 0.0 }
  0xe5   :  { %v469_v27 = vpop.f32.mrf.mxu2 }
  0xe6   :  { %506 = vst [vmem:[%s1110_s2 + $0x40] sm:$0xff] %v490_v26  ;;  %v366_v28 = vpop.f32.mrf.mxu0  ;;  %v543_v62 = vmul.f32 %v490_v26, %v490_v26  ;;  %v521_v5 = vadd.f32 %v520_v61, %v490_v26 }
  0xe7   :  { %v415_v29 = vpop.f32.mrf.mxu1 }
  0xe8   :  { %v416_v30 = vadd.f32 %v415_v29, %v366_v28  ;;  %v558_v63 = vadd.f32 %v557_v3, %v543_v62  ;;  %v430_v28 = vpop.f32.mrf.mxu3 }
  0xea   :  { %v465_v32 = vadd.f32 %v464_v13, %v416_v30  ;;  %v429_v13 = vadd.f32 %v428_v2, %v1067_v8 }
  0xec   :  { %v491_v36 = vmax.f32 %v465_v32, 0.0 }
  0xed   :  { %v472_v40 = vpop.f32.mrf.mxu2 }
  0xee   :  { %507 = vst [vmem:[%s1110_s2 + $0x48] sm:$0xff] %v491_v36  ;;  %v473_v43 = vadd.f32 %v472_v40, %v424_v35  ;;  %v369_v44 = vpop.f32.mrf.mxu0  ;;  %v544_v6 = vmul.f32 %v491_v36, %v491_v36  ;;  %v522_v10 = vadd.f32 %v521_v5, %v491_v36 }
  0xef   :  { %v418_v48 = vpop.f32.mrf.mxu1 }
  0xf0   :  { %v494_v51 = vmax.f32 %v473_v43, 0.0  ;;  %v419_v52 = vadd.f32 %v418_v48, %v369_v44  ;;  %v559_v14 = vadd.f32 %v558_v63, %v544_v6 }
  0xf2   :  { %510 = vst [vmem:[%s1110_s2 + $0x60] sm:$0xff] %v494_v51  ;;  %v468_v46 = vadd.f32 %v467_v20, %v419_v52  ;;  %v547_v23 = vmul.f32 %v494_v51, %v494_v51 }
  0xf4   :  { %v492_v58 = vmax.f32 %v468_v46, 0.0 }
  0xf5   :  { %v474_v60 = vpop.f32.mrf.mxu2 }
  0xf6   :  { %508 = vst [vmem:[%s1110_s2 + $0x50] sm:$0xff] %v492_v58  ;;  %v475_v0 = vadd.f32 %v474_v60, %v426_v56  ;;  %v371_v1 = vpop.f32.mrf.mxu0  ;;  %v545_v11 = vmul.f32 %v492_v58, %v492_v58  ;;  %v523_v15 = vadd.f32 %v522_v10, %v492_v58 }
  0xf7   :  { %v420_v4 = vpop.f32.mrf.mxu1 }
  0xf8   :  { %v495_v7 = vmax.f32 %v475_v0, 0.0  ;;  %v421_v9 = vadd.f32 %v420_v4, %v371_v1  ;;  %v560_v19 = vadd.f32 %v559_v14, %v545_v11 }
  0xfa   :  { %511 = vst [vmem:[%s1110_s2 + $0x68] sm:$0xff] %v495_v7  ;;  %v470_v12 = vadd.f32 %v469_v27, %v421_v9  ;;  %v431_v27 = vadd.f32 %v430_v28, %v1072_v17  ;;  %v548_v29 = vmul.f32 %v495_v7, %v495_v7 }
  0xfc   :  { %v493_v16 = vmax.f32 %v470_v12, 0.0 }
  0xfd   :  { %v477_v18 = vpop.f32.mrf.mxu2 }
  0xfe   :  { %509 = vst [vmem:[%s1110_s2 + $0x58] sm:$0xff] %v493_v16  ;;  %v524_v20 = vadd.f32 %v523_v15, %v493_v16  ;;  %v546_v21 = vmul.f32 %v493_v16, %v493_v16  ;;  %v478_v22 = vadd.f32 %v477_v18, %v429_v13 }
 0x100   :  { %v561_v24 = vadd.f32 %v560_v19, %v546_v21  ;;  %v496_v25 = vmax.f32 %v478_v22, 0.0  ;;  %v525_v26 = vadd.f32 %v524_v20, %v494_v51 }
 0x102   :  { %512 = vst [vmem:[%s1110_s2 + $0x70] sm:$0xff] %v496_v25  ;;  %v562_v8 = vadd.f32 %v561_v24, %v547_v23  ;;  %v526_v30 = vadd.f32 %v525_v26, %v495_v7  ;;  %v549_v35 = vmul.f32 %v496_v25, %v496_v25 }
 0x104   :  { %v563_v32 = vadd.f32 %v562_v8, %v548_v29  ;;  %v527_v34 = vadd.f32 %v526_v30, %v496_v25 }
 0x105   :  { %v479_v31 = vpop.f32.mrf.mxu2 }
 0x106   :  { %v480_v33 = vadd.f32 %v479_v31, %v431_v27  ;;  %v564_v37 = vadd.f32 %v563_v32, %v549_v35 }
 0x108   :  { %v497_v36 = vmax.f32 %v480_v33, 0.0 }
 0x10a   :  { %513 = vst [vmem:[%s1110_s2 + $0x78] sm:$0xff] %v497_v36  ;;  %v528_v38 = vadd.f32 %v527_v34, %v497_v36  ;;  %v550_v39 = vmul.f32 %v497_v36, %v497_v36 }
 0x10c   :  { %v529_v40 = vrot.slane %v528_v38, 4  ;;  %v565_v41 = vadd.f32 %v564_v37, %v550_v39 }
 0x10e   :  { %v530_v43 = vadd.f32 %v529_v40, %v528_v38  ;;  %v566_v44 = vrot.slane %v565_v41, 4 }
 0x110   :  { %v531_v17 = vrot.slane %v530_v43, 2  ;;  %v567_v45 = vadd.f32 %v566_v44, %v565_v41 }
 0x112   :  { %v532_v47 = vadd.f32 %v531_v17, %v530_v43  ;;  %v568_v48 = vrot.slane %v567_v45, 2 }
 0x114   :  { %v533_v50 = vrot.slane %v532_v47, 1  ;;  %v569_v51 = vadd.f32 %v568_v48, %v567_v45 }
 0x116   :  { %v570_v52 = vrot.slane %v569_v51, 1  ;;  %v534_v42 = vadd.f32 %v533_v50, %v532_v47 }
 0x118   :  { %v571_v49 = vadd.f32 %v570_v52, %v569_v51 }
 0x11a   :  { %v573_v53 = vsel %vm572_vm1, %v534_v42, %v571_v49 }
 0x11b   :  { %v575_v46 = vsel %vm574_vm2, %v573_v53, 0.0 }
 0x11c   :  { %576 = vst [vmem:[%s1111_s3] sm:$0xff] %v575_v46 }

// kernel: resnet_forward.34
= control target key start
LH: loop header
LB: loop body
LE: loop exit
PB: predicated region body
PF: predicated region fallthrough
CT: control target
= control target key end

     0   :  { %s214_s0 = inlined_call_operand.vmem [shape: f32[128,128], index: 0, kind: input, shape index: {}]   ;;  %s215_s1 = inlined_call_operand.vmem [shape: f32[1,128], index: 1, kind: input, shape index: {}]   ;;  %s216_s2 = inlined_call_operand.vmem [shape: f32[1,128], index: 2, kind: input, shape index: {}]   ;;  %s217_s3 = inlined_call_operand.vmem [shape: f32[128,128], index: 3, kind: output, shape index: {}]  }
   0x1   :  { %v14_v0 = vld [vmem:[%s214_s0] sm:$0xff]  ;;  %v15_v3 = vld [vmem:[%s214_s0 + $0x8] sm:$0xff]  ;;  %v16_v6 = vld [vmem:[%s214_s0 + $0x10] sm:$0xff] }
   0x2   :  { %v90_v1 = vld [vmem:[%s215_s1] ss:$0 sm:$0xff]  ;;  %v17_v7 = vld [vmem:[%s214_s0 + $0x18] sm:$0xff]  ;;  %v19_v12 = vld [vmem:[%s214_s0 + $0x28] sm:$0xff] }
   0x3   :  { %v91_v2 = vld [vmem:[%s216_s2] ss:$0 sm:$0xff]  ;;  %v34_v4 = vmul.f32 %v90_v1, %v14_v0  ;;  %v35_v5 = vmul.f32 %v90_v1, %v15_v3  ;;  %v36_v9 = vmul.f32 %v90_v1, %v16_v6  ;;  %v37_v10 = vmul.f32 %v90_v1, %v17_v7  ;;  %v20_v13 = vld [vmem:[%s214_s0 + $0x30] sm:$0xff]  ;;  %v21_v14 = vld [vmem:[%s214_s0 + $0x38] sm:$0xff] }
   0x4   :  { %v18_v8 = vld [vmem:[%s214_s0 + $0x20] sm:$0xff]  ;;  %v39_v17 = vmul.f32 %v90_v1, %v19_v12  ;;  %v40_v18 = vmul.f32 %v90_v1, %v20_v13  ;;  %v23_v20 = vld [vmem:[%s214_s0 + $0x48] sm:$0xff]  ;;  %v41_v23 = vmul.f32 %v90_v1, %v21_v14  ;;  %v24_v24 = vld [vmem:[%s214_s0 + $0x50] sm:$0xff] }
   0x5   :  { %v38_v11 = vmul.f32 %v90_v1, %v18_v8  ;;  %v54_v15 = vadd.f32 %v91_v2, %v34_v4  ;;  %v55_v16 = vadd.f32 %v91_v2, %v35_v5  ;;  %v22_v19 = vld [vmem:[%s214_s0 + $0x40] sm:$0xff]  ;;  %v56_v21 = vadd.f32 %v91_v2, %v36_v9  ;;  %v25_v27 = vld [vmem:[%s214_s0 + $0x58] sm:$0xff]  ;;  %v27_v33 = vld [vmem:[%s214_s0 + $0x68] sm:$0xff] }
   0x6   :  { %v57_v22 = vadd.f32 %v91_v2, %v37_v10  ;;  %v42_v26 = vmul.f32 %v90_v1, %v22_v19  ;;  %v59_v28 = vadd.f32 %v91_v2, %v39_v17  ;;  %v43_v29 = vmul.f32 %v90_v1, %v23_v20  ;;  %v26_v30 = vld [vmem:[%s214_s0 + $0x60] sm:$0xff]  ;;  %v28_v36 = vld [vmem:[%s214_s0 + $0x70] sm:$0xff]  ;;  %v29_v39 = vld [vmem:[%s214_s0 + $0x78] sm:$0xff] }
   0x7   :  { %70 = vst [vmem:[%s217_s3] sm:$0xff] %v54_v15  ;;  %v58_v25 = vadd.f32 %v91_v2, %v38_v11  ;;  %v60_v31 = vadd.f32 %v91_v2, %v40_v18  ;;  %v44_v32 = vmul.f32 %v90_v1, %v24_v24  ;;  %v61_v34 = vadd.f32 %v91_v2, %v41_v23 }
   0x8   :  { %71 = vst [vmem:[%s217_s3 + $0x8] sm:$0xff] %v55_v16  ;;  %v45_v35 = vmul.f32 %v90_v1, %v25_v27  ;;  %v62_v37 = vadd.f32 %v91_v2, %v42_v26  ;;  %v46_v38 = vmul.f32 %v90_v1, %v26_v30  ;;  %v63_v40 = vadd.f32 %v91_v2, %v43_v29 }
   0x9   :  { %72 = vst [vmem:[%s217_s3 + $0x10] sm:$0xff] %v56_v21  ;;  %v47_v41 = vmul.f32 %v90_v1, %v27_v33  ;;  %v64_v42 = vadd.f32 %v91_v2, %v44_v32  ;;  %v48_v43 = vmul.f32 %v90_v1, %v28_v36  ;;  %v49_v45 = vmul.f32 %v90_v1, %v29_v39 }
   0xa   :  { %73 = vst [vmem:[%s217_s3 + $0x18] sm:$0xff] %v57_v22  ;;  %v65_v44 = vadd.f32 %v91_v2, %v45_v35  ;;  %v66_v46 = vadd.f32 %v91_v2, %v46_v38 }
   0xb   :  { %74 = vst [vmem:[%s217_s3 + $0x20] sm:$0xff] %v58_v25  ;;  %v67_v47 = vadd.f32 %v91_v2, %v47_v41  ;;  %v68_v48 = vadd.f32 %v91_v2, %v48_v43  ;;  %v69_v49 = vadd.f32 %v91_v2, %v49_v45 }
   0xc   :  { %75 = vst [vmem:[%s217_s3 + $0x28] sm:$0xff] %v59_v28 }
   0xd   :  { %76 = vst [vmem:[%s217_s3 + $0x30] sm:$0xff] %v60_v31 }
   0xe   :  { %77 = vst [vmem:[%s217_s3 + $0x38] sm:$0xff] %v61_v34 }
   0xf   :  { %78 = vst [vmem:[%s217_s3 + $0x40] sm:$0xff] %v62_v37 }
  0x10   :  { %79 = vst [vmem:[%s217_s3 + $0x48] sm:$0xff] %v63_v40 }
  0x11   :  { %80 = vst [vmem:[%s217_s3 + $0x50] sm:$0xff] %v64_v42 }
  0x12   :  { %81 = vst [vmem:[%s217_s3 + $0x58] sm:$0xff] %v65_v44 }
  0x13   :  { %82 = vst [vmem:[%s217_s3 + $0x60] sm:$0xff] %v66_v46 }
  0x14   :  { %83 = vst [vmem:[%s217_s3 + $0x68] sm:$0xff] %v67_v47 }
  0x15   :  { %84 = vst [vmem:[%s217_s3 + $0x70] sm:$0xff] %v68_v48 }
  0x16   :  { %85 = vst [vmem:[%s217_s3 + $0x78] sm:$0xff] %v69_v49 }

// kernel: resnet_forward.35
= control target key start
LH: loop header
LB: loop body
LE: loop exit
PB: predicated region body
PF: predicated region fallthrough
CT: control target
= control target key end

     0   :  { %s1328_s12 = smov 0   ;;  %s1330_s13 = smov 0   ;;  %s1627_s0 = inlined_call_operand.vmem [shape: bf16[512,144], index: 0, kind: input, shape index: {}]   ;;  %s1628_s1 = inlined_call_operand.vmem [shape: bf16[144,128], index: 1, kind: input, shape index: {}]   ;;  %s1629_s2 = inlined_call_operand.vmem [shape: f32[512,128], index: 2, kind: output, shape index: {0}]   ;;  %s1630_s3 = inlined_call_operand.vmem [shape: f32[2,8,128], index: 3, kind: output, shape index: {1}]  }
   0x1   :  { %s1332_s14 = smov 0  }
   0x2 LB: > { %s26_s15 = sadd.s32 1, %s1302_s13  ;;  %p1020_p0 = scmp.ge.s32.totalorder %s1306_s14, 1  ;;  %s1306_s14 = sphi %s1332_s14, %s14_s14   ;;  %s1302_s13 = sphi %s1330_s13, %s1632_s13   ;;  %s1298_s12 = sphi %s1328_s12, %s1631_s12  }
   0x3   : > { %p28_p1 = scmp.ge.s32.totalorder %s26_s15, 2  ;;  %p167_p2 = scmp.lt.s32.totalorder %s1306_s14, 3 }
   0x5   : > { %s1634_s15 = smov (%p28_p1, %s26_s15), 0  ;;  %p168_p3 = pnand %p1020_p0, %p167_p2 }
   0x6   : > { %s1021_s20 = sshll.u32 (!%p168_p3), %s1298_s12, 5  ;;  %p226_p5 = scmp.lt.s32.totalorder (!%p168_p3), %s1298_s12, 1 }
   0x7   : > { %171 = sbr.rel (%p168_p3) target bundleno = 345 (0x159), region = 28  ;;  %p207_p4 = scmp.lt.s32.totalorder (!%p168_p3), %s1021_s20, 63 }
   0xc   : > { %v1249_v0 = vld [vmem:[%s1628_s1 + $0x38] sm:$0xff]  ;;  %v1250_v1 = vld [vmem:[%s1628_s1 + $0x40] sm:$0xff]  ;;  %v1248_v2 = vld [vmem:[%s1628_s1 + $0x30] sm:$0xff]  ;;  %s1636_s20 = smov (!%p207_p4, %s1021_s20), 63  ;;  %vm482_vm0 = vcmask 130048   ;;  %s1638_s12 = smov (!%p226_p5, %s1298_s12), 1 }
   0xd   : > { %531 = vmatpush.bf16.msra.mxu0 %v1249_v0  ;;  %627 = vmatpush.bf16.msra.mxu1 %v1250_v1  ;;  %s1209_s23 = sshll.u32 %s1636_s20, 3  ;;  %v1247_v3 = vld [vmem:[%s1628_s1 + $0x28] sm:$0xff]  ;;  %v1246_v7 = vld [vmem:[%s1628_s1 + $0x20] sm:$0xff]  ;;  %v1245_v8 = vld [vmem:[%s1628_s1 + $0x18] sm:$0xff]  ;;  %s1026_s19 = sshll.u32 %s1638_s12, 3  ;;  %vm879_vm1 = vcmask 1040384  }
   0xe   : > { %1251 = vmatpush.bf16.msra.mxu2 %v1249_v0  ;;  %1259 = vmatpush.bf16.msra.mxu3 %v1250_v1  ;;  %s1366_s26 = scalar_lea.vmem %s1627_s0, %s1209_s23  ;;  %v1244_v9 = vld [vmem:[%s1628_s1 + $0x10] sm:$0xff]  ;;  %v1243_v13 = vld [vmem:[%s1628_s1 + $0x8] sm:$0xff]  ;;  %v1242_v14 = vld [vmem:[%s1628_s1] sm:$0xff]  ;;  %s1471_s18 = scalar_lea.vmem %s1629_s2, %s1209_s23  ;;  %vm881_vm2 = vcmask 1041408  }
   0xf   : > { %v1210_v4 = vld [vmem:[%s1366_s26 + $0x4] sm:$0xf]  ;;  %v1031_v5 = vld [vmem:[%s1366_s26 + $0x8] sm:$0xf0]  ;;  %v1212_v10 = vld [vmem:[%s1366_s26 + $0x14] sm:$0xf]  ;;  %s232_s22 = scalar_lea.vmem %s1630_s3, %s1026_s19 }
  0x10   : > { %v1034_v6 = vor.u32 %v1210_v4, %v1031_v5  ;;  %v1039_v11 = vld [vmem:[%s1366_s26 + $0x18] sm:$0xf0]  ;;  %v1029_v15 = vld [vmem:[%s1366_s26] sm:$0xf]  ;;  %v1211_v16 = vld [vmem:[%s1366_s26 + $0x4] sm:$0xf0] }
  0x11   : > { %532 = vmatpush.bf16.msra.mxu0 %v1248_v2  ;;  %v1042_v12 = vor.u32 %v1212_v10, %v1039_v11  ;;  %v1093_v17 = vld [vmem:[%s1366_s26 + $0x80] sm:$0xf]  ;;  %v1227_v18 = vld [vmem:[%s1366_s26 + $0x84] sm:$0xf0]  ;;  %v1030_v19 = vor.u32 %v1211_v16, %v1029_v15  ;;  %v1228_v21 = vld [vmem:[%s1366_s26 + $0x94] sm:$0xf] }
  0x12   : > { %1252 = vmatpush.bf16.msra.mxu2 %v1248_v2  ;;  %1191 = vmatmul.msk.bf16.vlgmr.msra.gmra.mxu1 %vm482_vm0, %v1034_v6  ;;  %v1094_v20 = vor.u32 %v1227_v18, %v1093_v17  ;;  %v1103_v22 = vld [vmem:[%s1366_s26 + $0x98] sm:$0xf0]  ;;  %v1214_v24 = vld [vmem:[%s1366_s26 + $0x24] sm:$0xf]  ;;  %v1047_v25 = vld [vmem:[%s1366_s26 + $0x28] sm:$0xf0] }
  0x13   : > { %v1106_v23 = vor.u32 %v1228_v21, %v1103_v22  ;;  %v1050_v26 = vor.u32 %v1214_v24, %v1047_v25  ;;  %v1037_v27 = vld [vmem:[%s1366_s26 + $0x10] sm:$0xf]  ;;  %v1213_v28 = vld [vmem:[%s1366_s26 + $0x14] sm:$0xf0]  ;;  %v1230_v33 = vld [vmem:[%s1366_s26 + $0xa4] sm:$0xf] }
  0x14   : > { %v1101_v29 = vld [vmem:[%s1366_s26 + $0x90] sm:$0xf]  ;;  %v1229_v30 = vld [vmem:[%s1366_s26 + $0x94] sm:$0xf0]  ;;  %v1038_v31 = vor.u32 %v1213_v28, %v1037_v27  ;;  %v1111_v34 = vld [vmem:[%s1366_s26 + $0xa8] sm:$0xf0] }
  0x15   : > { %533 = vmatpush.bf16.msra.mxu0 %v1247_v3  ;;  %1200 = vmatmul.msk.bf16.vlgmr.msra.gmra.mxu3 %vm482_vm0, %v1106_v23  ;;  %v1102_v32 = vor.u32 %v1229_v30, %v1101_v29  ;;  %v1114_v35 = vor.u32 %v1230_v33, %v1111_v34  ;;  %v1216_v36 = vld [vmem:[%s1366_s26 + $0x34] sm:$0xf]  ;;  %v1055_v37 = vld [vmem:[%s1366_s26 + $0x38] sm:$0xf0]  ;;  %v1045_v39 = vld [vmem:[%s1366_s26 + $0x20] sm:$0xf] }
  0x16   : > { %1253 = vmatpush.bf16.msra.mxu2 %v1247_v3  ;;  %v1058_v38 = vor.u32 %v1216_v36, %v1055_v37  ;;  %v1215_v40 = vld [vmem:[%s1366_s26 + $0x24] sm:$0xf0]  ;;  %v1109_v41 = vld [vmem:[%s1366_s26 + $0xa0] sm:$0xf]  ;;  %v1232_v45 = vld [vmem:[%s1366_s26 + $0xb4] sm:$0xf] }
  0x17   : > { %v1231_v42 = vld [vmem:[%s1366_s26 + $0xa4] sm:$0xf0]  ;;  %v1046_v43 = vor.u32 %v1215_v40, %v1045_v39  ;;  %v1119_v46 = vld [vmem:[%s1366_s26 + $0xb8] sm:$0xf0]  ;;  %v1218_v48 = vld [vmem:[%s1366_s26 + $0x44] sm:$0xf] }
  0x18   : > { %v1110_v44 = vor.u32 %v1231_v42, %v1109_v41  ;;  %v1122_v47 = vor.u32 %v1232_v45, %v1119_v46  ;;  %v1063_v49 = vld [vmem:[%s1366_s26 + $0x48] sm:$0xf0]  ;;  %v1053_v51 = vld [vmem:[%s1366_s26 + $0x30] sm:$0xf]  ;;  %v1217_v52 = vld [vmem:[%s1366_s26 + $0x34] sm:$0xf0] }
  0x19   : > { %534 = vmatpush.bf16.msra.mxu0 %v1246_v7  ;;  %v1066_v50 = vor.u32 %v1218_v48, %v1063_v49  ;;  %v1117_v53 = vld [vmem:[%s1366_s26 + $0xb0] sm:$0xf]  ;;  %v1233_v54 = vld [vmem:[%s1366_s26 + $0xb4] sm:$0xf0]  ;;  %v1054_v55 = vor.u32 %v1217_v52, %v1053_v51  ;;  %v1234_v57 = vld [vmem:[%s1366_s26 + $0xc4] sm:$0xf] }
  0x1a   : > { %1254 = vmatpush.bf16.msra.mxu2 %v1246_v7  ;;  %v1118_v56 = vor.u32 %v1233_v54, %v1117_v53  ;;  %v1127_v58 = vld [vmem:[%s1366_s26 + $0xc8] sm:$0xf0]  ;;  %v1220_v60 = vld [vmem:[%s1366_s26 + $0x54] sm:$0xf]  ;;  %v1071_v61 = vld [vmem:[%s1366_s26 + $0x58] sm:$0xf0] }
  0x1b   : > { %v1130_v59 = vor.u32 %v1234_v57, %v1127_v58  ;;  %v1074_v62 = vor.u32 %v1220_v60, %v1071_v61  ;;  %v1061_v63 = vld [vmem:[%s1366_s26 + $0x40] sm:$0xf]  ;;  %v1219_v0 = vld [vmem:[%s1366_s26 + $0x44] sm:$0xf0]  ;;  %v1236_v5 = vld [vmem:[%s1366_s26 + $0xd4] sm:$0xf] }
  0x1c   : > { %v1125_v1 = vld [vmem:[%s1366_s26 + $0xc0] sm:$0xf]  ;;  %v1235_v2 = vld [vmem:[%s1366_s26 + $0xc4] sm:$0xf0]  ;;  %v1062_v3 = vor.u32 %v1219_v0, %v1061_v63  ;;  %v1135_v6 = vld [vmem:[%s1366_s26 + $0xd8] sm:$0xf0] }
  0x1d   : > { %535 = vmatpush.bf16.msra.mxu0 %v1245_v8  ;;  %v1126_v4 = vor.u32 %v1235_v2, %v1125_v1  ;;  %v1138_v7 = vor.u32 %v1236_v5, %v1135_v6  ;;  %v1069_v11 = vld [vmem:[%s1366_s26 + $0x50] sm:$0xf]  ;;  %v1238_v17 = vld [vmem:[%s1366_s26 + $0xe4] sm:$0xf]  ;;  %v1143_v18 = vld [vmem:[%s1366_s26 + $0xe8] sm:$0xf0] }
  0x1e   : > { %1255 = vmatpush.bf16.msra.mxu2 %v1245_v8  ;;  %v1222_v8 = vld [vmem:[%s1366_s26 + $0x64] sm:$0xf]  ;;  %v1087_v21 = vld [vmem:[%s1366_s26 + $0x78] sm:$0xf0]  ;;  %v1077_v23 = vld [vmem:[%s1366_s26 + $0x60] sm:$0xf] }
  0x1f   : > { %v1223_v24 = vld [vmem:[%s1366_s26 + $0x64] sm:$0xf0]  ;;  %v1141_v25 = vld [vmem:[%s1366_s26 + $0xe0] sm:$0xf]  ;;  %v1240_v29 = vld [vmem:[%s1366_s26 + $0xf4] sm:$0xf] }
  0x20   : > { %v1078_v27 = vor.u32 %v1223_v24, %v1077_v23  ;;  %v1151_v30 = vld [vmem:[%s1366_s26 + $0xf8] sm:$0xf0]  ;;  %v1095_v33 = vld [vmem:[%s1366_s26 + $0x88] sm:$0xf0]  ;;  %v1085_v36 = vld [vmem:[%s1366_s26 + $0x70] sm:$0xf] }
  0x21   : > { %536 = vmatpush.bf16.msra.mxu0 %v1244_v9  ;;  %v1225_v37 = vld [vmem:[%s1366_s26 + $0x74] sm:$0xf0] }
  0x22   : > { %1256 = vmatpush.bf16.msra.mxu2 %v1244_v9  ;;  %1192 = vmatmul.msk.bf16.gmra.mxu1 %vm482_vm0, %v1042_v12  ;;  %v1079_v9 = vld [vmem:[%s1366_s26 + $0x68] sm:$0xf0]  ;;  %v1221_v12 = vld [vmem:[%s1366_s26 + $0x54] sm:$0xf0]  ;;  %v1086_v40 = vor.u32 %v1225_v37, %v1085_v36 }
  0x23   : > { %v1082_v10 = vor.u32 %v1222_v8, %v1079_v9  ;;  %v1070_v15 = vor.u32 %v1221_v12, %v1069_v11  ;;  %v1241_v39 = vld [vmem:[%s1366_s26 + $0xf4] sm:$0xf0] }
  0x25   : > { %537 = vmatpush.bf16.msra.mxu0 %v1243_v13  ;;  %1201 = vmatmul.msk.bf16.gmra.mxu3 %vm482_vm0, %v1114_v35 }
  0x26   : > { %1257 = vmatpush.bf16.msra.mxu2 %v1243_v13  ;;  %v1133_v13 = vld [vmem:[%s1366_s26 + $0xd0] sm:$0xf] }
  0x29   : > { %538 = vmatpush.bf16.msra.mxu0 %v1242_v14 }
  0x2a   : > { %1258 = vmatpush.bf16.msra.mxu2 %v1242_v14  ;;  %v1237_v14 = vld [vmem:[%s1366_s26 + $0xd4] sm:$0xf0] }
  0x2b   : > { %v1134_v16 = vor.u32 %v1237_v14, %v1133_v13 }
  0x2c   : > { %539 = vmatmul.bf16.vlgmr.msra.gmra.mxu0 %v1030_v19  ;;  %v1146_v19 = vor.u32 %v1238_v17, %v1143_v18 }
  0x2d   : > { %579 = vmatmul.bf16.vlgmr.msra.gmra.mxu2 %v1094_v20  ;;  %v1224_v20 = vld [vmem:[%s1366_s26 + $0x74] sm:$0xf] }
  0x2e   : > { %v1090_v22 = vor.u32 %v1224_v20, %v1087_v21 }
  0x32   : > { %1193 = vmatmul.msk.bf16.gmra.mxu1 %vm482_vm0, %v1050_v26  ;;  %v1239_v26 = vld [vmem:[%s1366_s26 + $0xe4] sm:$0xf0] }
  0x33   : > { %v1142_v28 = vor.u32 %v1239_v26, %v1141_v25 }
  0x35   : > { %1202 = vmatmul.msk.bf16.gmra.mxu3 %vm482_vm0, %v1122_v47 }
  0x3c   : > { %544 = vmatmul.bf16.gmra.mxu0 %v1038_v31  ;;  %v1154_v31 = vor.u32 %v1240_v29, %v1151_v30 }
  0x3d   : > { %584 = vmatmul.bf16.gmra.mxu2 %v1102_v32  ;;  %v1226_v32 = vld [vmem:[%s1366_s26 + $0x84] sm:$0xf] }
  0x3e   : > { %v1098_v34 = vor.u32 %v1226_v32, %v1095_v33 }
  0x42   : > { %1194 = vmatmul.msk.bf16.gmra.mxu1 %vm482_vm0, %v1058_v38  ;;  %v1149_v38 = vld [vmem:[%s1366_s26 + $0xf0] sm:$0xf] }
  0x43   : > { %v1150_v41 = vor.u32 %v1241_v39, %v1149_v38 }
  0x45   : > { %1203 = vmatmul.msk.bf16.gmra.mxu3 %vm482_vm0, %v1130_v59 }
  0x4c   : > { %549 = vmatmul.bf16.gmra.mxu0 %v1046_v43 }
  0x4d   : > { %589 = vmatmul.bf16.gmra.mxu2 %v1110_v44 }
  0x52   : > { %1195 = vmatmul.msk.bf16.gmra.mxu1 %vm482_vm0, %v1066_v50 }
  0x55   : > { %1204 = vmatmul.msk.bf16.gmra.mxu3 %vm482_vm0, %v1138_v7 }
  0x5c   : > { %554 = vmatmul.bf16.gmra.mxu0 %v1054_v55 }
  0x5d   : > { %594 = vmatmul.bf16.gmra.mxu2 %v1118_v56 }
  0x62   : > { %1196 = vmatmul.msk.bf16.gmra.mxu1 %vm482_vm0, %v1074_v62 }
  0x65   : > { %1205 = vmatmul.msk.bf16.gmra.mxu3 %vm482_vm0, %v1146_v19 }
  0x6c   : > { %559 = vmatmul.bf16.gmra.mxu0 %v1062_v3 }
  0x6d   : > { %599 = vmatmul.bf16.gmra.mxu2 %v1126_v4 }
  0x72   : > { %1197 = vmatmul.msk.bf16.gmra.mxu1 %vm482_vm0, %v1082_v10 }
  0x75   : > { %1206 = vmatmul.msk.bf16.gmra.mxu3 %vm482_vm0, %v1154_v31 }
  0x7c   : > { %564 = vmatmul.bf16.gmra.mxu0 %v1070_v15 }
  0x7d   : > { %604 = vmatmul.bf16.gmra.mxu2 %v1134_v16 }
  0x82   : > { %1198 = vmatmul.msk.bf16.gmra.mxu1 %vm482_vm0, %v1090_v22 }
  0x8c   : > { %569 = vmatmul.bf16.gmra.mxu0 %v1078_v27 }
  0x8d   : > { %609 = vmatmul.bf16.gmra.mxu2 %v1142_v28 }
  0x8f   : > { %v629_v35 = vpop.f32.mrf.mxu1 }
  0x92   : > { %1199 = vmatmul.msk.bf16.gmra.mxu1 %vm482_vm0, %v1098_v34 }
  0x97   : > { %v631_v42 = vpop.f32.mrf.mxu1 }
  0x98   : > { %v674_v52 = vpop.f32.mrf.mxu3 }
  0x9c   : > { %574 = vmatmul.bf16.gmra.mxu0 %v1086_v40 }
  0x9d   : > { %614 = vmatmul.bf16.gmra.mxu2 %v1150_v41 }
  0x9f   : > { %v634_v43 = vpop.f32.mrf.mxu1 }
  0xa0   : > { %v676_v62 = vpop.f32.mrf.mxu3 }
  0xa7   : > { %v636_v46 = vpop.f32.mrf.mxu1 }
  0xa8   : > { %v679_v8 = vpop.f32.mrf.mxu3 }
  0xa9   : > { %v540_v44 = vpop.f32.mrf.mxu0 }
  0xaa   : > { %v630_v45 = vadd.f32 %v629_v35, %v540_v44 }
  0xac   : > { %v709_v47 = vmax.f32 %v630_v45, 0.0 }
  0xae   : > { %741 = vst [vmem:[%s1471_s18] sm:$0xff] %v709_v47  ;;  %v810_v54 = vmul.f32 %v709_v47, %v709_v47 }
  0xaf   : > { %v639_v51 = vpop.f32.mrf.mxu1 }
  0xb0   : > { %v1474_v48 = vpop.f32.mrf.mxu2  ;;  %v681_v19 = vpop.f32.mrf.mxu3 }
  0xb1   : > { %v542_v49 = vpop.f32.mrf.mxu0 }
  0xb2   : > { %v632_v50 = vadd.f32 %v631_v42, %v542_v49 }
  0xb4   : > { %v710_v53 = vmax.f32 %v632_v50, 0.0 }
  0xb6   : > { %742 = vst [vmem:[%s1471_s18 + $0x8] sm:$0xff] %v710_v53  ;;  %v773_v55 = vadd.f32 %v710_v53, %v709_v47  ;;  %v811_v56 = vmul.f32 %v710_v53, %v710_v53 }
  0xb7   : > { %v641_v61 = vpop.f32.mrf.mxu1 }
  0xb8   : > { %v842_v57 = vadd.f32 %v811_v56, %v810_v54  ;;  %v1477_v58 = vpop.f32.mrf.mxu2  ;;  %v684_v30 = vpop.f32.mrf.mxu3 }
  0xb9   : > { %v545_v59 = vpop.f32.mrf.mxu0 }
  0xba   : > { %v635_v60 = vadd.f32 %v634_v43, %v545_v59 }
  0xbc   : > { %v711_v63 = vmax.f32 %v635_v60, 0.0 }
  0xbe   : > { %743 = vst [vmem:[%s1471_s18 + $0x10] sm:$0xff] %v711_v63  ;;  %v774_v0 = vadd.f32 %v773_v55, %v711_v63  ;;  %v812_v1 = vmul.f32 %v711_v63, %v711_v63 }
  0xbf   : > { %v644_v7 = vpop.f32.mrf.mxu1 }
  0xc0   : > { %v843_v2 = vadd.f32 %v842_v57, %v812_v1  ;;  %v585_v3 = vpop.f32.mrf.mxu2  ;;  %v686_v38 = vpop.f32.mrf.mxu3 }
  0xc1   : > { %v547_v4 = vpop.f32.mrf.mxu0  ;;  %v675_v5 = vadd.f32 %v674_v52, %v585_v3 }
  0xc2   : > { %v637_v6 = vadd.f32 %v636_v46, %v547_v4 }
  0xc3   : > { %v1480_v9 = vmax.f32 %v675_v5, 0.0 }
  0xc4   : > { %v712_v10 = vmax.f32 %v637_v6, 0.0 }
  0xc5   : > { %759 = vst [vmem:[%s1471_s18 + $0x90] sm:$0xff] %v1480_v9 }
  0xc6   : > { %744 = vst [vmem:[%s1471_s18 + $0x18] sm:$0xff] %v712_v10  ;;  %v775_v11 = vadd.f32 %v774_v0, %v712_v10  ;;  %v813_v12 = vmul.f32 %v712_v10, %v712_v10 }
  0xc7   : > { %v646_v18 = vpop.f32.mrf.mxu1 }
  0xc8   : > { %v844_v13 = vadd.f32 %v843_v2, %v813_v12  ;;  %v587_v14 = vpop.f32.mrf.mxu2  ;;  %v689_v46 = vpop.f32.mrf.mxu3 }
  0xc9   : > { %v550_v15 = vpop.f32.mrf.mxu0  ;;  %v677_v16 = vadd.f32 %v676_v62, %v587_v14 }
  0xca   : > { %v640_v17 = vadd.f32 %v639_v51, %v550_v15 }
  0xcb   : > { %v1485_v20 = vmax.f32 %v677_v16, 0.0 }
  0xcc   : > { %v713_v21 = vmax.f32 %v640_v17, 0.0 }
  0xcd   : > { %760 = vst [vmem:[%s1471_s18 + $0x98] sm:$0xff] %v1485_v20 }
  0xce   : > { %745 = vst [vmem:[%s1471_s18 + $0x20] sm:$0xff] %v713_v21  ;;  %v1490_v22 = vadd.f32 %v775_v11, %v713_v21  ;;  %v814_v23 = vmul.f32 %v713_v21, %v713_v21 }
  0xcf   : > { %v649_v29 = vpop.f32.mrf.mxu1 }
  0xd0   : > { %v1492_v24 = vadd.f32 %v844_v13, %v814_v23  ;;  %v590_v25 = vpop.f32.mrf.mxu2  ;;  %v691_v55 = vpop.f32.mrf.mxu3 }
  0xd1   : > { %v552_v26 = vpop.f32.mrf.mxu0  ;;  %v680_v27 = vadd.f32 %v679_v8, %v590_v25 }
  0xd2   : > { %v642_v28 = vadd.f32 %v641_v61, %v552_v26 }
  0xd3   : > { %v1494_v31 = vmax.f32 %v680_v27, 0.0 }
  0xd4   : > { %v1496_v32 = vmax.f32 %v642_v28, 0.0 }
  0xd5   : > { %761 = vst [vmem:[%s1471_s18 + $0xa0] sm:$0xff] %v1494_v31 }
  0xd6   : > { %746 = vst [vmem:[%s1471_s18 + $0x28] sm:$0xff] %v1496_v32 }
  0xd7   : > { %v651_v37 = vpop.f32.mrf.mxu1 }
  0xd8   : > { %v592_v33 = vpop.f32.mrf.mxu2  ;;  %v694_v2 = vpop.f32.mrf.mxu3 }
  0xd9   : > { %v555_v34 = vpop.f32.mrf.mxu0  ;;  %v682_v35 = vadd.f32 %v681_v19, %v592_v33 }
  0xda   : > { %v645_v36 = vadd.f32 %v644_v7, %v555_v34 }
  0xdb   : > { %v1502_v39 = vmax.f32 %v682_v35, 0.0 }
  0xdc   : > { %v1504_v40 = vmax.f32 %v645_v36, 0.0  ;;  %v777_v36 = vadd.f32 %v1490_v22, %v1496_v32 }
  0xdd   : > { %762 = vst [vmem:[%s1471_s18 + $0xa8] sm:$0xff] %v1502_v39 }
  0xde   : > { %747 = vst [vmem:[%s1471_s18 + $0x30] sm:$0xff] %v1504_v40 }
  0xdf   : > { %v654_v45 = vpop.f32.mrf.mxu1 }
  0xe0   : > { %v595_v41 = vpop.f32.mrf.mxu2  ;;  %v696_v11 = vpop.f32.mrf.mxu3 }
  0xe1   : > { %v557_v42 = vpop.f32.mrf.mxu0  ;;  %v685_v43 = vadd.f32 %v684_v30, %v595_v41  ;;  %v815_v30 = vmul.f32 %v1496_v32, %v1496_v32 }
  0xe2   : > { %v647_v44 = vadd.f32 %v646_v18, %v557_v42 }
  0xe3   : > { %v1510_v47 = vmax.f32 %v685_v43, 0.0 }
  0xe4   : > { %v1512_v49 = vmax.f32 %v647_v44, 0.0 }
  0xe5   : > { %763 = vst [vmem:[%s1471_s18 + $0xb0] sm:$0xff] %v1510_v47 }
  0xe6   : > { %748 = vst [vmem:[%s1471_s18 + $0x38] sm:$0xff] %v1512_v49 }
  0xe7   : > { %v656_v54 = vpop.f32.mrf.mxu1 }
  0xe8   : > { %v597_v50 = vpop.f32.mrf.mxu2  ;;  %v699_v21 = vpop.f32.mrf.mxu3 }
  0xe9   : > { %v560_v51 = vpop.f32.mrf.mxu0  ;;  %v687_v52 = vadd.f32 %v686_v38, %v597_v50  ;;  %v817_v50 = vmul.f32 %v1512_v49, %v1512_v49 }
  0xea   : > { %v650_v53 = vadd.f32 %v649_v29, %v560_v51 }
  0xeb   : > { %v1518_v56 = vmax.f32 %v687_v52, 0.0 }
  0xec   : > { %v1520_v57 = vmax.f32 %v650_v53, 0.0 }
  0xed   : > { %764 = vst [vmem:[%s1471_s18 + $0xb8] sm:$0xff] %v1518_v56 }
  0xee   : > { %749 = vst [vmem:[%s1471_s18 + $0x40] sm:$0xff] %v1520_v57  ;;  %v818_v53 = vmul.f32 %v1520_v57, %v1520_v57 }
  0xef   : > { %v659_v63 = vpop.f32.mrf.mxu1 }
  0xf0   : > { %v600_v59 = vpop.f32.mrf.mxu2  ;;  %v701_v42 = vpop.f32.mrf.mxu3 }
  0xf1   : > { %v562_v60 = vpop.f32.mrf.mxu0  ;;  %v690_v61 = vadd.f32 %v689_v46, %v600_v59  ;;  %v778_v46 = vadd.f32 %v777_v36, %v1504_v40 }
  0xf2   : > { %v652_v62 = vadd.f32 %v651_v37, %v562_v60  ;;  %v816_v37 = vmul.f32 %v1504_v40, %v1504_v40 }
  0xf3   : > { %v1526_v0 = vmax.f32 %v690_v61, 0.0  ;;  %v779_v52 = vadd.f32 %v778_v46, %v1512_v49 }
  0xf4   : > { %v718_v1 = vmax.f32 %v652_v62, 0.0 }
  0xf5   : > { %765 = vst [vmem:[%s1471_s18 + $0xc0] sm:$0xff] %v1526_v0 }
  0xf6   : > { %750 = vst [vmem:[%s1471_s18 + $0x48] sm:$0xff] %v718_v1 }
  0xf7   : > { %v661_v7 = vpop.f32.mrf.mxu1 }
  0xf8   : > { %v602_v3 = vpop.f32.mrf.mxu2 }
  0xf9   : > { %v565_v4 = vpop.f32.mrf.mxu0  ;;  %v692_v5 = vadd.f32 %v691_v55, %v602_v3 }
  0xfa   : > { %v655_v6 = vadd.f32 %v654_v45, %v565_v4  ;;  %v846_v45 = vadd.f32 %v1492_v24, %v815_v30  ;;  %v780_v24 = vadd.f32 %v779_v52, %v1520_v57 }
  0xfb   : > { %v1531_v8 = vmax.f32 %v692_v5, 0.0 }
  0xfc   : > { %v719_v10 = vmax.f32 %v655_v6, 0.0  ;;  %v847_v51 = vadd.f32 %v846_v45, %v816_v37  ;;  %v781_v61 = vadd.f32 %v780_v24, %v718_v1 }
  0xfd   : > { %766 = vst [vmem:[%s1471_s18 + $0xc8] sm:$0xff] %v1531_v8 }
  0xfe   : > { %751 = vst [vmem:[%s1471_s18 + $0x50] sm:$0xff] %v719_v10  ;;  %v820_v62 = vmul.f32 %v719_v10, %v719_v10  ;;  %v782_v5 = vadd.f32 %v781_v61, %v719_v10  ;;  %v832_v61 = vmul.f32 %v1510_v47, %v1510_v47 }
  0xff   : > { %v664_v16 = vpop.f32.mrf.mxu1 }
 0x100   : > { %v605_v12 = vpop.f32.mrf.mxu2 }
 0x101   : > { %v567_v13 = vpop.f32.mrf.mxu0  ;;  %v695_v14 = vadd.f32 %v694_v2, %v605_v12 }
 0x102   : > { %v657_v15 = vadd.f32 %v656_v54, %v567_v13  ;;  %v819_v54 = vmul.f32 %v718_v1, %v718_v1 }
 0x103   : > { %v1536_v17 = vmax.f32 %v695_v14, 0.0 }
 0x104   : > { %v720_v18 = vmax.f32 %v657_v15, 0.0 }
 0x105   : > { %767 = vst [vmem:[%s1471_s18 + $0xd0] sm:$0xff] %v1536_v17 }
 0x106   : > { %752 = vst [vmem:[%s1471_s18 + $0x58] sm:$0xff] %v720_v18  ;;  %v821_v6 = vmul.f32 %v720_v18, %v720_v18  ;;  %v783_v13 = vadd.f32 %v782_v5, %v720_v18 }
 0x107   : > { %v666_v27 = vpop.f32.mrf.mxu1 }
 0x108   : > { %v607_v19 = vpop.f32.mrf.mxu2 }
 0x109   : > { %v570_v23 = vpop.f32.mrf.mxu0  ;;  %v697_v25 = vadd.f32 %v696_v11, %v607_v19 }
 0x10a   : > { %v660_v26 = vadd.f32 %v659_v63, %v570_v23 }
 0x10b   : > { %v1541_v28 = vmax.f32 %v697_v25, 0.0 }
 0x10c   : > { %v721_v29 = vmax.f32 %v660_v26, 0.0 }
 0x10d   : > { %768 = vst [vmem:[%s1471_s18 + $0xd8] sm:$0xff] %v1541_v28 }
 0x10e   : > { %753 = vst [vmem:[%s1471_s18 + $0x60] sm:$0xff] %v721_v29  ;;  %v822_v1 = vmul.f32 %v721_v29, %v721_v29  ;;  %v784_v15 = vadd.f32 %v783_v13, %v721_v29 }
 0x10f   : > { %v669_v41 = vpop.f32.mrf.mxu1 }
 0x110   : > { %v610_v33 = vpop.f32.mrf.mxu2  ;;  %v670_v43 = vadd.f32 %v669_v41, %v1474_v48  ;;  %v848_v48 = vadd.f32 %v847_v51, %v817_v50  ;;  %v828_v51 = vmul.f32 %v1480_v9, %v1480_v9 }
 0x111   : > { %v572_v34 = vpop.f32.mrf.mxu0  ;;  %v700_v35 = vadd.f32 %v699_v21, %v610_v33 }
 0x112   : > { %v662_v38 = vadd.f32 %v661_v7, %v572_v34  ;;  %v725_v32 = vmax.f32 %v670_v43, 0.0  ;;  %v849_v60 = vadd.f32 %v848_v48, %v818_v53  ;;  %v704_v7 = vpop.f32.mrf.mxu3  ;;  %v829_v48 = vmul.f32 %v1485_v20, %v1485_v20 }
 0x113   : > { %v1553_v44 = vmax.f32 %v700_v35, 0.0 }
 0x114   : > { %v722_v22 = vmax.f32 %v662_v38, 0.0  ;;  %757 = vst [vmem:[%s1471_s18 + $0x80] sm:$0xff] %v725_v32  ;;  %v850_v4 = vadd.f32 %v849_v60, %v819_v54  ;;  %v826_v29 = vmul.f32 %v725_v32, %v725_v32  ;;  %v830_v54 = vmul.f32 %v1494_v31, %v1494_v31 }
 0x115   : > { %769 = vst [vmem:[%s1471_s18 + $0xe0] sm:$0xff] %v1553_v44 }
 0x116   : > { %754 = vst [vmem:[%s1471_s18 + $0x68] sm:$0xff] %v722_v22  ;;  %v851_v12 = vadd.f32 %v850_v4, %v820_v62  ;;  %v785_v23 = vadd.f32 %v784_v15, %v722_v22 }
 0x117   : > { %v671_v49 = vpop.f32.mrf.mxu1 }
 0x118   : > { %v612_v40 = vpop.f32.mrf.mxu2  ;;  %v672_v2 = vadd.f32 %v671_v49, %v1477_v58  ;;  %v852_v14 = vadd.f32 %v851_v12, %v821_v6  ;;  %v823_v58 = vmul.f32 %v722_v22, %v722_v22 }
 0x119   : > { %v575_v55 = vpop.f32.mrf.mxu0  ;;  %v702_v59 = vadd.f32 %v701_v42, %v612_v40 }
 0x11a   : > { %v665_v63 = vadd.f32 %v664_v16, %v575_v55  ;;  %v726_v11 = vmax.f32 %v672_v2, 0.0  ;;  %v853_v10 = vadd.f32 %v852_v14, %v822_v1  ;;  %v706_v38 = vpop.f32.mrf.mxu3  ;;  %v838_v1 = vmul.f32 %v1553_v44, %v1553_v44 }
 0x11b   : > { %v1568_v3 = vmax.f32 %v702_v59, 0.0  ;;  %v831_v59 = vmul.f32 %v1502_v39, %v1502_v39 }
 0x11c   : > { %v723_v57 = vmax.f32 %v665_v63, 0.0  ;;  %758 = vst [vmem:[%s1471_s18 + $0x88] sm:$0xff] %v726_v11  ;;  %v854_v33 = vadd.f32 %v853_v10, %v823_v58  ;;  %v827_v46 = vmul.f32 %v726_v11, %v726_v11 }
 0x11d   : > { %770 = vst [vmem:[%s1471_s18 + $0xe8] sm:$0xff] %v1568_v3 }
 0x11e   : > { %755 = vst [vmem:[%s1471_s18 + $0x70] sm:$0xff] %v723_v57  ;;  %v824_v25 = vmul.f32 %v723_v57, %v723_v57  ;;  %v786_v34 = vadd.f32 %v785_v23, %v723_v57 }
 0x120   : > { %v615_v16 = vpop.f32.mrf.mxu2  ;;  %v855_v18 = vadd.f32 %v854_v33, %v824_v25 }
 0x121   : > { %v577_v19 = vpop.f32.mrf.mxu0  ;;  %v705_v21 = vadd.f32 %v704_v7, %v615_v16 }
 0x122   : > { %v667_v26 = vadd.f32 %v666_v27, %v577_v19 }
 0x123   : > { %v739_v30 = vmax.f32 %v705_v21, 0.0 }
 0x124   : > { %v724_v35 = vmax.f32 %v667_v26, 0.0 }
 0x125   : > { %771 = vst [vmem:[%s1471_s18 + $0xf0] sm:$0xff] %v739_v30  ;;  %v840_v19 = vmul.f32 %v739_v30, %v739_v30 }
 0x126   : > { %756 = vst [vmem:[%s1471_s18 + $0x78] sm:$0xff] %v724_v35  ;;  %v787_v36 = vadd.f32 %v786_v34, %v724_v35  ;;  %v825_v37 = vmul.f32 %v724_v35, %v724_v35 }
 0x128   : > { %v788_v41 = vadd.f32 %v787_v36, %v725_v32  ;;  %v856_v42 = vadd.f32 %v855_v18, %v825_v37  ;;  %v617_v43 = vpop.f32.mrf.mxu2 }
 0x129   : > { %v707_v45 = vadd.f32 %v706_v38, %v617_v43 }
 0x12a   : > { %v789_v50 = vadd.f32 %v788_v41, %v726_v11  ;;  %v857_v22 = vadd.f32 %v856_v42, %v826_v29 }
 0x12b   : > { %v740_v27 = vmax.f32 %v707_v45, 0.0 }
 0x12c   : > { %v790_v52 = vadd.f32 %v789_v50, %v1480_v9  ;;  %v858_v53 = vadd.f32 %v857_v22, %v827_v46 }
 0x12d   : > { %772 = vst [vmem:[%s1471_s18 + $0xf8] sm:$0xff] %v740_v27  ;;  %v841_v10 = vmul.f32 %v740_v27, %v740_v27 }
 0x12e   : > { %v791_v24 = vadd.f32 %v790_v52, %v1485_v20  ;;  %v859_v32 = vadd.f32 %v858_v53, %v828_v51  ;;  %v833_v20 = vmul.f32 %v1518_v56, %v1518_v56 }
 0x130   : > { %v792_v40 = vadd.f32 %v791_v24, %v1494_v31  ;;  %v860_v55 = vadd.f32 %v859_v32, %v829_v48  ;;  %v834_v31 = vmul.f32 %v1526_v0, %v1526_v0 }
 0x132   : > { %v793_v60 = vadd.f32 %v792_v40, %v1502_v39  ;;  %v861_v9 = vadd.f32 %v860_v55, %v830_v54  ;;  %v835_v39 = vmul.f32 %v1531_v8, %v1531_v8 }
 0x134   : > { %v862_v62 = vadd.f32 %v861_v9, %v831_v59  ;;  %v794_v63 = vadd.f32 %v793_v60, %v1510_v47  ;;  %v836_v47 = vmul.f32 %v1536_v17, %v1536_v17 }
 0x136   : > { %v795_v49 = vadd.f32 %v794_v63, %v1518_v56  ;;  %v863_v2 = vadd.f32 %v862_v62, %v832_v61  ;;  %v837_v56 = vmul.f32 %v1541_v28, %v1541_v28 }
 0x138   : > { %v796_v4 = vadd.f32 %v795_v49, %v1526_v0  ;;  %v864_v5 = vadd.f32 %v863_v2, %v833_v20 }
 0x13a   : > { %v797_v6 = vadd.f32 %v796_v4, %v1531_v8  ;;  %v865_v57 = vadd.f32 %v864_v5, %v834_v31 }
 0x13c   : > { %v798_v7 = vadd.f32 %v797_v6, %v1536_v17  ;;  %v866_v11 = vadd.f32 %v865_v57, %v835_v39  ;;  %v839_v17 = vmul.f32 %v1568_v3, %v1568_v3 }
 0x13e   : > { %v799_v12 = vadd.f32 %v798_v7, %v1541_v28  ;;  %v867_v0 = vadd.f32 %v866_v11, %v836_v47 }
 0x140   : > { %v800_v13 = vadd.f32 %v799_v12, %v1553_v44  ;;  %v868_v8 = vadd.f32 %v867_v0, %v837_v56 }
 0x142   : > { %v869_v14 = vadd.f32 %v868_v8, %v838_v1  ;;  %v801_v15 = vadd.f32 %v800_v13, %v1568_v3 }
 0x144   : > { %v870_v58 = vadd.f32 %v869_v14, %v839_v17  ;;  %v802_v16 = vadd.f32 %v801_v15, %v739_v30 }
 0x146   : > { %v871_v21 = vadd.f32 %v870_v58, %v840_v19  ;;  %v803_v28 = vadd.f32 %v802_v16, %v740_v27 }
 0x148   : > { %v804_v23 = vrot.slane %v803_v28, 4  ;;  %v872_v25 = vadd.f32 %v871_v21, %v841_v10 }
 0x14a   : > { %v805_v26 = vadd.f32 %v804_v23, %v803_v28  ;;  %v873_v33 = vrot.slane %v872_v25, 4 }
 0x14c   : > { %v806_v44 = vrot.slane %v805_v26, 2  ;;  %v874_v34 = vadd.f32 %v873_v33, %v872_v25 }
 0x14e   : > { %v807_v35 = vadd.f32 %v806_v44, %v805_v26  ;;  %v875_v18 = vrot.slane %v874_v34, 2 }
 0x150   : > { %v808_v36 = vrot.slane %v807_v35, 1  ;;  %v876_v37 = vadd.f32 %v875_v18, %v874_v34 }
 0x152   : > { %v877_v3 = vrot.slane %v876_v37, 1  ;;  %v809_v38 = vadd.f32 %v808_v36, %v807_v35 }
 0x154   : > { %v878_v30 = vadd.f32 %v877_v3, %v876_v37 }
 0x156   : > { %v880_v29 = vsel %vm879_vm1, %v809_v38, %v878_v30 }
 0x157   : > { %v882_v41 = vsel %vm881_vm2, %v880_v29, 0.0 }
 0x158   : > { %883 = vst [vmem:[%s232_s22] sm:$0xff] %v882_v41 }
 0x159 PF: > { %s14_s14 = sadd.s32 1, %s1306_s14   ;;  %s1631_s12 = smov %s1302_s13 }
 0x15a   : > { %p11_p6 = scmp.ge.s32.totalorder %s14_s14, 4   ;;  %s1632_s13 = smov %s1634_s15 }
 0x15c   :  { %13 = sbr.rel (!%p11_p6) target bundleno = 2 (0x2), region = 73 }

// kernel: resnet_forward.36
= control target key start
LH: loop header
LB: loop body
LE: loop exit
PB: predicated region body
PF: predicated region fallthrough
CT: control target
= control target key end

     0   :  { %s554_s12 = smov 0   ;;  %s556_s13 = smov 0   ;;  %s729_s0 = inlined_call_operand.vmem [shape: f32[512,128], index: 0, kind: input, shape index: {}]   ;;  %s730_s1 = inlined_call_operand.vmem [shape: f32[1,128], index: 1, kind: input, shape index: {}]   ;;  %s731_s2 = inlined_call_operand.vmem [shape: f32[1,128], index: 2, kind: input, shape index: {}]   ;;  %s732_s3 = inlined_call_operand.vmem [shape: f32[512,128], index: 3, kind: output, shape index: {}]  }
   0x1   :  { %s558_s14 = smov 0  }
   0x2 LB: > { %s25_s15 = sadd.s32 1, %s528_s13  ;;  %p477_p0 = scmp.ge.s32.totalorder %s532_s14, 1  ;;  %s532_s14 = sphi %s558_s14, %s13_s14   ;;  %s528_s13 = sphi %s556_s13, %s734_s13   ;;  %s524_s12 = sphi %s554_s12, %s733_s12  }
   0x3   : > { %p27_p1 = scmp.ge.s32.totalorder %s25_s15, 2  ;;  %p173_p2 = scmp.lt.s32.totalorder %s532_s14, 3 }
   0x5   : > { %s736_s15 = smov (%p27_p1, %s25_s15), 0  ;;  %p174_p3 = pnand %p477_p0, %p173_p2 }
   0x6   : > { %s478_s16 = sshll.u32 (!%p174_p3), %s524_s12, 5 }
   0x7   : > { %177 = sbr.rel (%p174_p3) target bundleno = 52 (0x34), region = 32  ;;  %p210_p4 = scmp.lt.s32.totalorder (!%p174_p3), %s478_s16, 63 }
   0xc   : > { %s738_s16 = smov (!%p210_p4, %s478_s16), 63  ;;  %v575_v0 = vld [vmem:[%s730_s1] ss:$0 sm:$0xff] }
   0xd   : > { %s479_s19 = sshll.u32 %s738_s16, 3  ;;  %v585_v1 = vld [vmem:[%s731_s2] ss:$0 sm:$0xff] }
   0xe   : > { %s580_s22 = scalar_lea.vmem %s729_s0, %s479_s19  ;;  %s599_s27 = scalar_lea.vmem %s732_s3, %s479_s19 }
   0xf   : > { %v233_v2 = vld [vmem:[%s580_s22] sm:$0xff]  ;;  %v234_v3 = vld [vmem:[%s580_s22 + $0x8] sm:$0xff]  ;;  %v235_v4 = vld [vmem:[%s580_s22 + $0x10] sm:$0xff] }
  0x10   : > { %v269_v5 = vmul.f32 %v575_v0, %v233_v2  ;;  %v270_v6 = vmul.f32 %v575_v0, %v234_v3  ;;  %v271_v7 = vmul.f32 %v575_v0, %v235_v4  ;;  %v236_v8 = vld [vmem:[%s580_s22 + $0x18] sm:$0xff]  ;;  %v237_v9 = vld [vmem:[%s580_s22 + $0x20] sm:$0xff]  ;;  %v238_v10 = vld [vmem:[%s580_s22 + $0x28] sm:$0xff] }
  0x11   : > { %v272_v11 = vmul.f32 %v575_v0, %v236_v8  ;;  %v273_v12 = vmul.f32 %v575_v0, %v237_v9  ;;  %v274_v13 = vmul.f32 %v575_v0, %v238_v10  ;;  %v239_v14 = vld [vmem:[%s580_s22 + $0x30] sm:$0xff]  ;;  %v240_v15 = vld [vmem:[%s580_s22 + $0x38] sm:$0xff]  ;;  %v241_v16 = vld [vmem:[%s580_s22 + $0x40] sm:$0xff] }
  0x12   : > { %v305_v17 = vadd.f32 %v585_v1, %v269_v5  ;;  %v306_v18 = vadd.f32 %v585_v1, %v270_v6  ;;  %v307_v19 = vadd.f32 %v585_v1, %v271_v7  ;;  %v275_v20 = vmul.f32 %v575_v0, %v239_v14  ;;  %v242_v21 = vld [vmem:[%s580_s22 + $0x48] sm:$0xff]  ;;  %v243_v24 = vld [vmem:[%s580_s22 + $0x50] sm:$0xff]  ;;  %v244_v27 = vld [vmem:[%s580_s22 + $0x58] sm:$0xff] }
  0x13   : > { %v308_v22 = vadd.f32 %v585_v1, %v272_v11  ;;  %v276_v23 = vmul.f32 %v575_v0, %v240_v15  ;;  %v309_v25 = vadd.f32 %v585_v1, %v273_v12  ;;  %v277_v26 = vmul.f32 %v575_v0, %v241_v16  ;;  %v245_v30 = vld [vmem:[%s580_s22 + $0x60] sm:$0xff]  ;;  %v246_v33 = vld [vmem:[%s580_s22 + $0x68] sm:$0xff]  ;;  %v247_v36 = vld [vmem:[%s580_s22 + $0x70] sm:$0xff] }
  0x14   : > { %337 = vst [vmem:[%s599_s27] sm:$0xff] %v305_v17  ;;  %v310_v28 = vadd.f32 %v585_v1, %v274_v13  ;;  %v278_v29 = vmul.f32 %v575_v0, %v242_v21  ;;  %v311_v31 = vadd.f32 %v585_v1, %v275_v20  ;;  %v279_v32 = vmul.f32 %v575_v0, %v243_v24  ;;  %v248_v39 = vld [vmem:[%s580_s22 + $0x78] sm:$0xff]  ;;  %v249_v42 = vld [vmem:[%s580_s22 + $0x80] sm:$0xff]  ;;  %v250_v45 = vld [vmem:[%s580_s22 + $0x88] sm:$0xff] }
  0x15   : > { %338 = vst [vmem:[%s599_s27 + $0x8] sm:$0xff] %v306_v18  ;;  %v312_v34 = vadd.f32 %v585_v1, %v276_v23  ;;  %v280_v35 = vmul.f32 %v575_v0, %v244_v27  ;;  %v313_v37 = vadd.f32 %v585_v1, %v277_v26  ;;  %v281_v38 = vmul.f32 %v575_v0, %v245_v30  ;;  %v251_v48 = vld [vmem:[%s580_s22 + $0x90] sm:$0xff]  ;;  %v252_v51 = vld [vmem:[%s580_s22 + $0x98] sm:$0xff]  ;;  %v253_v54 = vld [vmem:[%s580_s22 + $0xa0] sm:$0xff] }
  0x16   : > { %339 = vst [vmem:[%s599_s27 + $0x10] sm:$0xff] %v307_v19  ;;  %v314_v40 = vadd.f32 %v585_v1, %v278_v29  ;;  %v282_v41 = vmul.f32 %v575_v0, %v246_v33  ;;  %v315_v43 = vadd.f32 %v585_v1, %v279_v32  ;;  %v283_v44 = vmul.f32 %v575_v0, %v247_v36  ;;  %v254_v57 = vld [vmem:[%s580_s22 + $0xa8] sm:$0xff]  ;;  %v255_v60 = vld [vmem:[%s580_s22 + $0xb0] sm:$0xff]  ;;  %v256_v63 = vld [vmem:[%s580_s22 + $0xb8] sm:$0xff] }
  0x17   : > { %340 = vst [vmem:[%s599_s27 + $0x18] sm:$0xff] %v308_v22  ;;  %v316_v46 = vadd.f32 %v585_v1, %v280_v35  ;;  %v284_v47 = vmul.f32 %v575_v0, %v248_v39  ;;  %v317_v49 = vadd.f32 %v585_v1, %v281_v38  ;;  %v285_v50 = vmul.f32 %v575_v0, %v249_v42  ;;  %v257_v4 = vld [vmem:[%s580_s22 + $0xc0] sm:$0xff]  ;;  %v258_v7 = vld [vmem:[%s580_s22 + $0xc8] sm:$0xff]  ;;  %v259_v10 = vld [vmem:[%s580_s22 + $0xd0] sm:$0xff] }
  0x18   : > { %341 = vst [vmem:[%s599_s27 + $0x20] sm:$0xff] %v309_v25  ;;  %v318_v52 = vadd.f32 %v585_v1, %v282_v41  ;;  %v286_v53 = vmul.f32 %v575_v0, %v250_v45  ;;  %v319_v55 = vadd.f32 %v585_v1, %v283_v44  ;;  %v287_v56 = vmul.f32 %v575_v0, %v251_v48  ;;  %v260_v13 = vld [vmem:[%s580_s22 + $0xd8] sm:$0xff]  ;;  %v261_v16 = vld [vmem:[%s580_s22 + $0xe0] sm:$0xff]  ;;  %v262_v19 = vld [vmem:[%s580_s22 + $0xe8] sm:$0xff] }
  0x19   : > { %342 = vst [vmem:[%s599_s27 + $0x28] sm:$0xff] %v310_v28  ;;  %v320_v58 = vadd.f32 %v585_v1, %v284_v47  ;;  %v288_v59 = vmul.f32 %v575_v0, %v252_v51  ;;  %v321_v61 = vadd.f32 %v585_v1, %v285_v50  ;;  %v289_v62 = vmul.f32 %v575_v0, %v253_v54  ;;  %v263_v22 = vld [vmem:[%s580_s22 + $0xf0] sm:$0xff]  ;;  %v264_v25 = vld [vmem:[%s580_s22 + $0xf8] sm:$0xff] }
  0x1a   : > { %343 = vst [vmem:[%s599_s27 + $0x30] sm:$0xff] %v311_v31  ;;  %v322_v2 = vadd.f32 %v585_v1, %v286_v53  ;;  %v290_v3 = vmul.f32 %v575_v0, %v254_v57  ;;  %v323_v5 = vadd.f32 %v585_v1, %v287_v56  ;;  %v291_v6 = vmul.f32 %v575_v0, %v255_v60 }
  0x1b   : > { %344 = vst [vmem:[%s599_s27 + $0x38] sm:$0xff] %v312_v34  ;;  %v324_v8 = vadd.f32 %v585_v1, %v288_v59  ;;  %v292_v9 = vmul.f32 %v575_v0, %v256_v63  ;;  %v325_v11 = vadd.f32 %v585_v1, %v289_v62  ;;  %v293_v12 = vmul.f32 %v575_v0, %v257_v4 }
  0x1c   : > { %345 = vst [vmem:[%s599_s27 + $0x40] sm:$0xff] %v313_v37  ;;  %v326_v14 = vadd.f32 %v585_v1, %v290_v3  ;;  %v294_v15 = vmul.f32 %v575_v0, %v258_v7  ;;  %v327_v17 = vadd.f32 %v585_v1, %v291_v6  ;;  %v295_v18 = vmul.f32 %v575_v0, %v259_v10 }
  0x1d   : > { %346 = vst [vmem:[%s599_s27 + $0x48] sm:$0xff] %v314_v40  ;;  %v328_v20 = vadd.f32 %v585_v1, %v292_v9  ;;  %v296_v21 = vmul.f32 %v575_v0, %v260_v13  ;;  %v329_v23 = vadd.f32 %v585_v1, %v293_v12  ;;  %v297_v24 = vmul.f32 %v575_v0, %v261_v16 }
  0x1e   : > { %347 = vst [vmem:[%s599_s27 + $0x50] sm:$0xff] %v315_v43  ;;  %v330_v26 = vadd.f32 %v585_v1, %v294_v15  ;;  %v298_v27 = vmul.f32 %v575_v0, %v262_v19  ;;  %v331_v28 = vadd.f32 %v585_v1, %v295_v18  ;;  %v299_v29 = vmul.f32 %v575_v0, %v263_v22 }
  0x1f   : > { %348 = vst [vmem:[%s599_s27 + $0x58] sm:$0xff] %v316_v46  ;;  %v332_v30 = vadd.f32 %v585_v1, %v296_v21  ;;  %v300_v31 = vmul.f32 %v575_v0, %v264_v25  ;;  %v333_v32 = vadd.f32 %v585_v1, %v297_v24 }
  0x20   : > { %349 = vst [vmem:[%s599_s27 + $0x60] sm:$0xff] %v317_v49  ;;  %v334_v33 = vadd.f32 %v585_v1, %v298_v27  ;;  %v335_v34 = vadd.f32 %v585_v1, %v299_v29 }
  0x21   : > { %350 = vst [vmem:[%s599_s27 + $0x68] sm:$0xff] %v318_v52  ;;  %v336_v35 = vadd.f32 %v585_v1, %v300_v31 }
  0x22   : > { %351 = vst [vmem:[%s599_s27 + $0x70] sm:$0xff] %v319_v55 }
  0x23   : > { %352 = vst [vmem:[%s599_s27 + $0x78] sm:$0xff] %v320_v58 }
  0x24   : > { %353 = vst [vmem:[%s599_s27 + $0x80] sm:$0xff] %v321_v61 }
  0x25   : > { %354 = vst [vmem:[%s599_s27 + $0x88] sm:$0xff] %v322_v2 }
  0x26   : > { %355 = vst [vmem:[%s599_s27 + $0x90] sm:$0xff] %v323_v5 }
  0x27   : > { %356 = vst [vmem:[%s599_s27 + $0x98] sm:$0xff] %v324_v8 }
  0x28   : > { %357 = vst [vmem:[%s599_s27 + $0xa0] sm:$0xff] %v325_v11 }
  0x29   : > { %358 = vst [vmem:[%s599_s27 + $0xa8] sm:$0xff] %v326_v14 }
  0x2a   : > { %359 = vst [vmem:[%s599_s27 + $0xb0] sm:$0xff] %v327_v17 }
  0x2b   : > { %360 = vst [vmem:[%s599_s27 + $0xb8] sm:$0xff] %v328_v20 }
  0x2c   : > { %361 = vst [vmem:[%s599_s27 + $0xc0] sm:$0xff] %v329_v23 }
  0x2d   : > { %362 = vst [vmem:[%s599_s27 + $0xc8] sm:$0xff] %v330_v26 }
  0x2e   : > { %363 = vst [vmem:[%s599_s27 + $0xd0] sm:$0xff] %v331_v28 }
  0x2f   : > { %364 = vst [vmem:[%s599_s27 + $0xd8] sm:$0xff] %v332_v30 }
  0x30   : > { %365 = vst [vmem:[%s599_s27 + $0xe0] sm:$0xff] %v333_v32 }
  0x31   : > { %366 = vst [vmem:[%s599_s27 + $0xe8] sm:$0xff] %v334_v33 }
  0x32   : > { %367 = vst [vmem:[%s599_s27 + $0xf0] sm:$0xff] %v335_v34 }
  0x33   : > { %368 = vst [vmem:[%s599_s27 + $0xf8] sm:$0xff] %v336_v35 }
  0x34 PF: > { %s13_s14 = sadd.s32 1, %s532_s14   ;;  %s733_s12 = smov %s528_s13 }
  0x35   : > { %p10_p5 = scmp.ge.s32.totalorder %s13_s14, 4   ;;  %s734_s13 = smov %s736_s15 }
  0x37   :  { %12 = sbr.rel (!%p10_p5) target bundleno = 2 (0x2), region = 68 }

// kernel: resnet_forward.37
= control target key start
LH: loop header
LB: loop body
LE: loop exit
PB: predicated region body
PF: predicated region fallthrough
CT: control target
= control target key end

     0   :  { %s1976_s12 = smov 0   ;;  %s1978_s13 = smov 0   ;;  %s2305_s0 = inlined_call_operand.vmem [shape: bf16[512,392], index: 0, kind: input, shape index: {}]   ;;  %s2306_s1 = inlined_call_operand.vmem [shape: bf16[392,128], index: 1, kind: input, shape index: {}]   ;;  %s2307_s2 = inlined_call_operand.vmem [shape: f32[1,128], index: 2, kind: input, shape index: {}]   ;;  %s2308_s3 = inlined_call_operand.vmem [shape: f32[512,128], index: 3, kind: output, shape index: {}]  }
   0x1   :  { %s1980_s14 = smov 0  }
   0x2 LB: > { %s25_s15 = sadd.s32 1, %s1950_s13  ;;  %p1378_p0 = scmp.ge.s32.totalorder %s1954_s14, 1  ;;  %s1954_s14 = sphi %s1980_s14, %s13_s14   ;;  %s1950_s13 = sphi %s1978_s13, %s2310_s13   ;;  %s1946_s12 = sphi %s1976_s12, %s2309_s12  }
   0x3   : > { %p27_p1 = scmp.ge.s32.totalorder %s25_s15, 2  ;;  %p170_p2 = scmp.lt.s32.totalorder %s1954_s14, 3 }
   0x5   : > { %s2312_s15 = smov (%p27_p1, %s25_s15), 0  ;;  %p171_p3 = pnand %p1378_p0, %p170_p2 }
   0x6   : > { %s1379_s22 = sshll.u32 (!%p171_p3), %s1946_s12, 5 }
   0x7   : > { %174 = sbr.rel (%p171_p3) target bundleno = 438 (0x1b6), region = 32  ;;  %p206_p4 = scmp.lt.s32.totalorder (!%p171_p3), %s1379_s22, 63 }
   0xc   : > { %v1826_v0 = vld [vmem:[%s2306_s1 + $0x38] sm:$0xff]  ;;  %v1825_v3 = vld [vmem:[%s2306_s1 + $0x30] sm:$0xff]  ;;  %s2314_s22 = smov (!%p206_p4, %s1379_s22), 63  ;;  %v1824_v6 = vld [vmem:[%s2306_s1 + $0x28] sm:$0xff]  ;;  %vm846_vm0 = vcmask 1043456   ;;  %vm797_vm1 = vcmask 64512  }
   0xd   : > { %v1834_v1 = vld [vmem:[%s2306_s1 + $0x78] sm:$0xff]  ;;  %850 = vmatpush.bf16.msra.mxu0 %v1826_v0  ;;  %v1833_v4 = vld [vmem:[%s2306_s1 + $0x70] sm:$0xff]  ;;  %s1754_s29 = sshll.u32 %s2314_s22, 4  ;;  %v1832_v7 = vld [vmem:[%s2306_s1 + $0x68] sm:$0xff]  ;;  %s1383_s28 = sshll.u32 %s2314_s22, 3 }
   0xe   : > { %v1842_v2 = vld [vmem:[%s2306_s1 + $0xb8] sm:$0xff]  ;;  %939 = vmatpush.bf16.msra.mxu1 %v1834_v1  ;;  %v1841_v5 = vld [vmem:[%s2306_s1 + $0xb0] sm:$0xff]  ;;  %v341_v8 = vld [vmem:[%s2306_s1 + $0xc0] sm:$0xf]  ;;  %s2027_s11 = scalar_lea.vmem %s2305_s0, %s1754_s29  ;;  %s2180_s4 = scalar_lea.vmem %s2308_s3, %s1383_s28 }
   0xf   : > { %1028 = vmatpush.bf16.msra.mxu2 %v1842_v2  ;;  %v1840_v9 = vld [vmem:[%s2306_s1 + $0xa8] sm:$0xff]  ;;  %v747_v10 = vunpack.c.l.b16 %v341_v8  ;;  %v1396_v12 = vld [vmem:[%s2027_s11 + $0x18] sm:$0xf0]  ;;  %v1823_v14 = vld [vmem:[%s2306_s1 + $0x20] sm:$0xff] }
  0x10   : > { %v1756_v11 = vld [vmem:[%s2027_s11 + $0xc] sm:$0xf]  ;;  %v1831_v15 = vld [vmem:[%s2306_s1 + $0x60] sm:$0xff]  ;;  %v1822_v19 = vld [vmem:[%s2306_s1 + $0x18] sm:$0xff] }
  0x11   : > { %851 = vmatpush.bf16.msra.mxu0 %v1825_v3  ;;  %v772_v13 = vpack.c.b16 %v747_v10, %v747_v10  ;;  %v1839_v16 = vld [vmem:[%s2306_s1 + $0xa0] sm:$0xff]  ;;  %v1399_v18 = vor.u32 %v1756_v11, %v1396_v12  ;;  %v1830_v20 = vld [vmem:[%s2306_s1 + $0x58] sm:$0xff]  ;;  %v1821_v22 = vld [vmem:[%s2306_s1 + $0x10] sm:$0xff] }
  0x12   : > { %940 = vmatpush.bf16.msra.mxu1 %v1833_v4  ;;  %v1838_v21 = vld [vmem:[%s2306_s1 + $0x98] sm:$0xff]  ;;  %v1829_v23 = vld [vmem:[%s2306_s1 + $0x50] sm:$0xff]  ;;  %v1820_v25 = vld [vmem:[%s2306_s1 + $0x8] sm:$0xff] }
  0x13   : > { %1029 = vmatpush.bf16.msra.mxu2 %v1841_v5  ;;  %v848_v17 = vsel %vm846_vm0, %v772_v13, 0  ;;  %v1837_v24 = vld [vmem:[%s2306_s1 + $0x90] sm:$0xff]  ;;  %v1828_v26 = vld [vmem:[%s2306_s1 + $0x48] sm:$0xff]  ;;  %v1412_v29 = vld [vmem:[%s2027_s11 + $0x38] sm:$0xf0] }
  0x14   : > { %1124 = vmatpush.bf16.msra.mxu3 %v848_v17  ;;  %v1836_v27 = vld [vmem:[%s2306_s1 + $0x88] sm:$0xff]  ;;  %v1819_v30 = vld [vmem:[%s2306_s1] sm:$0xff]  ;;  %v1757_v33 = vld [vmem:[%s2027_s11 + $0xc] sm:$0xf0] }
  0x15   : > { %852 = vmatpush.bf16.msra.mxu0 %v1824_v6  ;;  %v1760_v28 = vld [vmem:[%s2027_s11 + $0x2c] sm:$0xf]  ;;  %v1827_v31 = vld [vmem:[%s2306_s1 + $0x40] sm:$0xff]  ;;  %v1388_v35 = vld [vmem:[%s2027_s11 + $0x10] sm:$0xf0] }
  0x16   : > { %941 = vmatpush.bf16.msra.mxu1 %v1832_v7  ;;  %v1386_v32 = vld [vmem:[%s2027_s11] sm:$0xf]  ;;  %v1755_v34 = vld [vmem:[%s2027_s11 + $0x4] sm:$0xf]  ;;  %v1394_v37 = vld [vmem:[%s2027_s11 + $0x8] sm:$0xf]  ;;  %v1415_v39 = vor.u32 %v1760_v28, %v1412_v29 }
  0x17   : > { %1030 = vmatpush.bf16.msra.mxu2 %v1840_v9  ;;  %1736 = vmatmul.msk.bf16.vlgmr.msra.gmra.mxu3 %vm797_vm1, %v1399_v18  ;;  %v1835_v36 = vld [vmem:[%s2306_s1 + $0x80] sm:$0xff]  ;;  %v1758_v38 = vld [vmem:[%s2027_s11 + $0x14] sm:$0xf0]  ;;  %v1387_v40 = vor.u32 %v1757_v33, %v1386_v32  ;;  %v1391_v41 = vor.u32 %v1755_v34, %v1388_v35  ;;  %v1764_v43 = vld [vmem:[%s2027_s11 + $0x4c] sm:$0xf] }
  0x18   : > { %v1395_v42 = vor.u32 %v1758_v38, %v1394_v37  ;;  %v1428_v44 = vld [vmem:[%s2027_s11 + $0x58] sm:$0xf0]  ;;  %v1402_v45 = vld [vmem:[%s2027_s11 + $0x20] sm:$0xf]  ;;  %v1761_v46 = vld [vmem:[%s2027_s11 + $0x2c] sm:$0xf0] }
  0x19   : > { %853 = vmatpush.bf16.msra.mxu0 %v1823_v14  ;;  %v1759_v47 = vld [vmem:[%s2027_s11 + $0x24] sm:$0xf]  ;;  %v1404_v48 = vld [vmem:[%s2027_s11 + $0x30] sm:$0xf0]  ;;  %v1410_v49 = vld [vmem:[%s2027_s11 + $0x28] sm:$0xf]  ;;  %v1431_v51 = vor.u32 %v1764_v43, %v1428_v44  ;;  %v1403_v52 = vor.u32 %v1761_v46, %v1402_v45 }
  0x1a   : > { %942 = vmatpush.bf16.msra.mxu1 %v1831_v15  ;;  %v1762_v50 = vld [vmem:[%s2027_s11 + $0x34] sm:$0xf0]  ;;  %v1407_v53 = vor.u32 %v1759_v47, %v1404_v48  ;;  %v1768_v55 = vld [vmem:[%s2027_s11 + $0x6c] sm:$0xf]  ;;  %v1444_v56 = vld [vmem:[%s2027_s11 + $0x78] sm:$0xf0] }
  0x1b   : > { %1031 = vmatpush.bf16.msra.mxu2 %v1839_v16  ;;  %v1411_v54 = vor.u32 %v1762_v50, %v1410_v49  ;;  %v1418_v57 = vld [vmem:[%s2027_s11 + $0x40] sm:$0xf]  ;;  %v1765_v58 = vld [vmem:[%s2027_s11 + $0x4c] sm:$0xf0]  ;;  %v1763_v59 = vld [vmem:[%s2027_s11 + $0x44] sm:$0xf]  ;;  %v1447_v63 = vor.u32 %v1768_v55, %v1444_v56 }
  0x1c   : > { %v1420_v60 = vld [vmem:[%s2027_s11 + $0x50] sm:$0xf0]  ;;  %v1426_v61 = vld [vmem:[%s2027_s11 + $0x48] sm:$0xf]  ;;  %v1766_v62 = vld [vmem:[%s2027_s11 + $0x54] sm:$0xf0]  ;;  %v1419_v0 = vor.u32 %v1765_v58, %v1418_v57 }
  0x1d   : > { %854 = vmatpush.bf16.msra.mxu0 %v1822_v19  ;;  %v1423_v1 = vor.u32 %v1763_v59, %v1420_v60  ;;  %v1427_v2 = vor.u32 %v1766_v62, %v1426_v61  ;;  %v1772_v3 = vld [vmem:[%s2027_s11 + $0x8c] sm:$0xf]  ;;  %v1460_v4 = vld [vmem:[%s2027_s11 + $0x98] sm:$0xf0]  ;;  %v1434_v5 = vld [vmem:[%s2027_s11 + $0x60] sm:$0xf] }
  0x1e   : > { %943 = vmatpush.bf16.msra.mxu1 %v1830_v20  ;;  %v1769_v6 = vld [vmem:[%s2027_s11 + $0x6c] sm:$0xf0]  ;;  %v1767_v7 = vld [vmem:[%s2027_s11 + $0x64] sm:$0xf]  ;;  %v1436_v8 = vld [vmem:[%s2027_s11 + $0x70] sm:$0xf0]  ;;  %v1463_v11 = vor.u32 %v1772_v3, %v1460_v4 }
  0x1f   : > { %1032 = vmatpush.bf16.msra.mxu2 %v1838_v21  ;;  %v1442_v9 = vld [vmem:[%s2027_s11 + $0x68] sm:$0xf]  ;;  %v1770_v10 = vld [vmem:[%s2027_s11 + $0x74] sm:$0xf0]  ;;  %v1435_v12 = vor.u32 %v1769_v6, %v1434_v5  ;;  %v1439_v13 = vor.u32 %v1767_v7, %v1436_v8  ;;  %v1776_v15 = vld [vmem:[%s2027_s11 + $0xac] sm:$0xf] }
  0x20   : > { %v1443_v14 = vor.u32 %v1770_v10, %v1442_v9  ;;  %v1476_v16 = vld [vmem:[%s2027_s11 + $0xb8] sm:$0xf0]  ;;  %v1450_v17 = vld [vmem:[%s2027_s11 + $0x80] sm:$0xf]  ;;  %v1773_v18 = vld [vmem:[%s2027_s11 + $0x8c] sm:$0xf0] }
  0x21   : > { %855 = vmatpush.bf16.msra.mxu0 %v1821_v22  ;;  %v1771_v19 = vld [vmem:[%s2027_s11 + $0x84] sm:$0xf]  ;;  %v1452_v20 = vld [vmem:[%s2027_s11 + $0x90] sm:$0xf0]  ;;  %v1458_v21 = vld [vmem:[%s2027_s11 + $0x88] sm:$0xf] }
  0x22   : > { %944 = vmatpush.bf16.msra.mxu1 %v1829_v23  ;;  %v1774_v22 = vld [vmem:[%s2027_s11 + $0x94] sm:$0xf0]  ;;  %v1479_v23 = vor.u32 %v1776_v15, %v1476_v16  ;;  %v1492_v28 = vld [vmem:[%s2027_s11 + $0xd8] sm:$0xf0]  ;;  %v1466_v29 = vld [vmem:[%s2027_s11 + $0xa0] sm:$0xf] }
  0x23   : > { %1033 = vmatpush.bf16.msra.mxu2 %v1837_v24  ;;  %v1451_v24 = vor.u32 %v1773_v18, %v1450_v17  ;;  %v1468_v32 = vld [vmem:[%s2027_s11 + $0xb0] sm:$0xf0]  ;;  %v1474_v33 = vld [vmem:[%s2027_s11 + $0xa8] sm:$0xf]  ;;  %v1778_v34 = vld [vmem:[%s2027_s11 + $0xb4] sm:$0xf0] }
  0x24   : > { %v1475_v38 = vor.u32 %v1778_v34, %v1474_v33  ;;  %v1779_v43 = vld [vmem:[%s2027_s11 + $0xc4] sm:$0xf]  ;;  %v1484_v44 = vld [vmem:[%s2027_s11 + $0xd0] sm:$0xf0]  ;;  %v1490_v45 = vld [vmem:[%s2027_s11 + $0xc8] sm:$0xf] }
  0x25   : > { %856 = vmatpush.bf16.msra.mxu0 %v1820_v25  ;;  %v1455_v25 = vor.u32 %v1771_v19, %v1452_v20  ;;  %v1782_v46 = vld [vmem:[%s2027_s11 + $0xd4] sm:$0xf0]  ;;  %v1487_v49 = vor.u32 %v1779_v43, %v1484_v44  ;;  %v1783_v55 = vld [vmem:[%s2027_s11 + $0xe4] sm:$0xf]  ;;  %v1500_v56 = vld [vmem:[%s2027_s11 + $0xf0] sm:$0xf0] }
  0x26   : > { %945 = vmatpush.bf16.msra.mxu1 %v1828_v26  ;;  %v1459_v26 = vor.u32 %v1774_v22, %v1458_v21  ;;  %v1491_v50 = vor.u32 %v1782_v46, %v1490_v45  ;;  %v1506_v57 = vld [vmem:[%s2027_s11 + $0xe8] sm:$0xf]  ;;  %v1786_v58 = vld [vmem:[%s2027_s11 + $0xf4] sm:$0xf0]  ;;  %v1503_v61 = vor.u32 %v1783_v55, %v1500_v56  ;;  %v1789_v3 = vld [vmem:[%s2027_s11 + $0x10c] sm:$0xf0] }
  0x27   : > { %1034 = vmatpush.bf16.msra.mxu2 %v1836_v27  ;;  %1737 = vmatmul.msk.bf16.gmra.mxu3 %vm797_vm1, %v1415_v39  ;;  %v1780_v27 = vld [vmem:[%s2027_s11 + $0xcc] sm:$0xf]  ;;  %v1507_v62 = vor.u32 %v1786_v58, %v1506_v57  ;;  %v1787_v4 = vld [vmem:[%s2027_s11 + $0x104] sm:$0xf]  ;;  %v1516_v5 = vld [vmem:[%s2027_s11 + $0x110] sm:$0xf0] }
  0x28   : > { %v1495_v35 = vor.u32 %v1780_v27, %v1492_v28  ;;  %v1784_v39 = vld [vmem:[%s2027_s11 + $0xec] sm:$0xf]  ;;  %v2161_v7 = vld [vmem:[%s2307_s2] ss:$0 sm:$0xff]  ;;  %v1522_v8 = vld [vmem:[%s2027_s11 + $0x108] sm:$0xf] }
  0x29   : > { %857 = vmatpush.bf16.msra.mxu0 %v1819_v30  ;;  %v1777_v30 = vld [vmem:[%s2027_s11 + $0xac] sm:$0xf0]  ;;  %v1790_v9 = vld [vmem:[%s2027_s11 + $0x114] sm:$0xf0]  ;;  %v1530_v27 = vld [vmem:[%s2027_s11 + $0x120] sm:$0xf] }
  0x2a   : > { %946 = vmatpush.bf16.msra.mxu1 %v1827_v31  ;;  %v1775_v31 = vld [vmem:[%s2027_s11 + $0xa4] sm:$0xf]  ;;  %v1523_v15 = vor.u32 %v1790_v9, %v1522_v8  ;;  %v1793_v28 = vld [vmem:[%s2027_s11 + $0x12c] sm:$0xf0]  ;;  %v1794_v33 = vld [vmem:[%s2027_s11 + $0x134] sm:$0xf0] }
  0x2b   : > { %1035 = vmatpush.bf16.msra.mxu2 %v1835_v36  ;;  %v1467_v36 = vor.u32 %v1777_v30, %v1466_v29  ;;  %v1471_v37 = vor.u32 %v1775_v31, %v1468_v32  ;;  %v1791_v29 = vld [vmem:[%s2027_s11 + $0x124] sm:$0xf]  ;;  %v1532_v30 = vld [vmem:[%s2027_s11 + $0x130] sm:$0xf0]  ;;  %v1538_v32 = vld [vmem:[%s2027_s11 + $0x128] sm:$0xf] }
  0x2c   : > { %858 = vmatmul.bf16.vlgmr.msra.gmra.mxu0 %v1387_v40  ;;  %v1508_v40 = vld [vmem:[%s2027_s11 + $0xf8] sm:$0xf0]  ;;  %v1800_v55 = vld [vmem:[%s2027_s11 + $0x16c] sm:$0xf]  ;;  %v1546_v57 = vld [vmem:[%s2027_s11 + $0x140] sm:$0xf] }
  0x2d   : > { %947 = vmatmul.bf16.vlgmr.msra.gmra.mxu1 %v1391_v41  ;;  %v1482_v41 = vld [vmem:[%s2027_s11 + $0xc0] sm:$0xf]  ;;  %v1511_v47 = vor.u32 %v1784_v39, %v1508_v40  ;;  %v1572_v56 = vld [vmem:[%s2027_s11 + $0x178] sm:$0xf0]  ;;  %v1797_v58 = vld [vmem:[%s2027_s11 + $0x14c] sm:$0xf0] }
  0x2e   : > { %1036 = vmatmul.bf16.vlgmr.msra.gmra.mxu2 %v1395_v42  ;;  %v1781_v42 = vld [vmem:[%s2027_s11 + $0xcc] sm:$0xf0] }
  0x2f   : > { %v1483_v48 = vor.u32 %v1781_v42, %v1482_v41  ;;  %v1539_v42 = vor.u32 %v1794_v33, %v1538_v32 }
  0x37   : > { %1738 = vmatmul.msk.bf16.gmra.mxu3 %vm797_vm1, %v1431_v51  ;;  %v1788_v51 = vld [vmem:[%s2027_s11 + $0x10c] sm:$0xf] }
  0x3c   : > { %863 = vmatmul.bf16.gmra.mxu0 %v1403_v52  ;;  %v1524_v52 = vld [vmem:[%s2027_s11 + $0x118] sm:$0xf0] }
  0x3d   : > { %952 = vmatmul.bf16.gmra.mxu1 %v1407_v53  ;;  %v1498_v53 = vld [vmem:[%s2027_s11 + $0xe0] sm:$0xf]  ;;  %v1527_v59 = vor.u32 %v1788_v51, %v1524_v52 }
  0x3e   : > { %1041 = vmatmul.bf16.gmra.mxu2 %v1411_v54  ;;  %v1785_v54 = vld [vmem:[%s2027_s11 + $0xec] sm:$0xf0] }
  0x3f   : > { %v1499_v60 = vor.u32 %v1785_v54, %v1498_v53 }
  0x47   : > { %1739 = vmatmul.msk.bf16.gmra.mxu3 %vm797_vm1, %v1447_v63 }
  0x4c   : > { %868 = vmatmul.bf16.gmra.mxu0 %v1419_v0  ;;  %v1792_v0 = vld [vmem:[%s2027_s11 + $0x12c] sm:$0xf] }
  0x4d   : > { %957 = vmatmul.bf16.gmra.mxu1 %v1423_v1  ;;  %v1540_v1 = vld [vmem:[%s2027_s11 + $0x138] sm:$0xf0] }
  0x4e   : > { %1046 = vmatmul.bf16.gmra.mxu2 %v1427_v2  ;;  %v1514_v2 = vld [vmem:[%s2027_s11 + $0x100] sm:$0xf]  ;;  %v1543_v10 = vor.u32 %v1792_v0, %v1540_v1  ;;  %v1575_v0 = vor.u32 %v1800_v55, %v1572_v56  ;;  %v1805_v55 = vld [vmem:[%s2027_s11 + $0x18c] sm:$0xf0]  ;;  %v1803_v56 = vld [vmem:[%s2027_s11 + $0x184] sm:$0xf] }
  0x57   : > { %1740 = vmatmul.msk.bf16.gmra.mxu3 %vm797_vm1, %v1463_v11  ;;  %v1515_v11 = vor.u32 %v1789_v3, %v1514_v2  ;;  %v1547_v3 = vor.u32 %v1797_v58, %v1546_v57  ;;  %v1580_v57 = vld [vmem:[%s2027_s11 + $0x190] sm:$0xf0] }
  0x5c   : > { %873 = vmatmul.bf16.gmra.mxu0 %v1435_v12  ;;  %v1519_v12 = vor.u32 %v1787_v4, %v1516_v5 }
  0x5d   : > { %962 = vmatmul.bf16.gmra.mxu1 %v1439_v13 }
  0x5e   : > { %1051 = vmatmul.bf16.gmra.mxu2 %v1443_v14 }
  0x67   : > { %1741 = vmatmul.msk.bf16.gmra.mxu3 %vm797_vm1, %v1479_v23 }
  0x6c   : > { %878 = vmatmul.bf16.gmra.mxu0 %v1451_v24 }
  0x6d   : > { %967 = vmatmul.bf16.gmra.mxu1 %v1455_v25  ;;  %v1796_v25 = vld [vmem:[%s2027_s11 + $0x14c] sm:$0xf] }
  0x6e   : > { %1056 = vmatmul.bf16.gmra.mxu2 %v1459_v26  ;;  %v1556_v26 = vld [vmem:[%s2027_s11 + $0x158] sm:$0xf0] }
  0x6f   : > { %v1559_v34 = vor.u32 %v1796_v25, %v1556_v26  ;;  %v1801_v25 = vld [vmem:[%s2027_s11 + $0x16c] sm:$0xf0]  ;;  %v1799_v26 = vld [vmem:[%s2027_s11 + $0x164] sm:$0xf] }
  0x77   : > { %1742 = vmatmul.msk.bf16.gmra.mxu3 %vm797_vm1, %v1495_v35 }
  0x7c   : > { %883 = vmatmul.bf16.gmra.mxu0 %v1467_v36 }
  0x7d   : > { %972 = vmatmul.bf16.gmra.mxu1 %v1471_v37  ;;  %v1531_v37 = vor.u32 %v1793_v28, %v1530_v27  ;;  %v1564_v27 = vld [vmem:[%s2027_s11 + $0x170] sm:$0xf0] }
  0x7e   : > { %1061 = vmatmul.bf16.gmra.mxu2 %v1475_v38  ;;  %v1535_v38 = vor.u32 %v1791_v29, %v1532_v30  ;;  %v1570_v29 = vld [vmem:[%s2027_s11 + $0x168] sm:$0xf]  ;;  %v1802_v30 = vld [vmem:[%s2027_s11 + $0x174] sm:$0xf0] }
  0x87   : > { %1743 = vmatmul.msk.bf16.gmra.mxu3 %vm797_vm1, %v1511_v47 }
  0x8c   : > { %888 = vmatmul.bf16.gmra.mxu0 %v1483_v48 }
  0x8d   : > { %977 = vmatmul.bf16.gmra.mxu1 %v1487_v49 }
  0x8e   : > { %1066 = vmatmul.bf16.gmra.mxu2 %v1491_v50 }
  0x97   : > { %1744 = vmatmul.msk.bf16.gmra.mxu3 %vm797_vm1, %v1527_v59  ;;  %v1795_v59 = vld [vmem:[%s2027_s11 + $0x144] sm:$0xf] }
  0x9a   : > { %v1126_v63 = vpop.f32.mrf.mxu3 }
  0x9c   : > { %893 = vmatmul.bf16.gmra.mxu0 %v1499_v60  ;;  %v1548_v60 = vld [vmem:[%s2027_s11 + $0x150] sm:$0xf0] }
  0x9d   : > { %982 = vmatmul.bf16.gmra.mxu1 %v1503_v61  ;;  %v1551_v4 = vor.u32 %v1795_v59, %v1548_v60  ;;  %v1586_v59 = vld [vmem:[%s2027_s11 + $0x188] sm:$0xf]  ;;  %v1806_v60 = vld [vmem:[%s2027_s11 + $0x194] sm:$0xf0] }
  0x9e   : > { %1071 = vmatmul.bf16.gmra.mxu2 %v1507_v62  ;;  %v1554_v62 = vld [vmem:[%s2027_s11 + $0x148] sm:$0xf] }
  0xa2   : > { %v1128_v6 = vpop.f32.mrf.mxu3 }
  0xa7   : > { %1745 = vmatmul.msk.bf16.gmra.mxu3 %vm797_vm1, %v1543_v10 }
  0xa9   : > { %v859_v13 = vpop.f32.mrf.mxu0 }
  0xaa   : > { %v948_v14 = vpop.f32.mrf.mxu1  ;;  %v860_v16 = vadd.f32 %v2161_v7, %v859_v13  ;;  %v1131_v18 = vpop.f32.mrf.mxu3 }
  0xac   : > { %898 = vmatmul.bf16.gmra.mxu0 %v1515_v11  ;;  %v949_v17 = vadd.f32 %v948_v14, %v860_v16 }
  0xad   : > { %987 = vmatmul.bf16.gmra.mxu1 %v1519_v12 }
  0xae   : > { %1076 = vmatmul.bf16.gmra.mxu2 %v1523_v15 }
  0xb1   : > { %v1037_v19 = vpop.f32.mrf.mxu2  ;;  %v861_v21 = vpop.f32.mrf.mxu0 }
  0xb2   : > { %v1038_v20 = vadd.f32 %v1037_v19, %v949_v17  ;;  %v950_v22 = vpop.f32.mrf.mxu1  ;;  %v862_v24 = vadd.f32 %v2161_v7, %v861_v21  ;;  %v1133_v31 = vpop.f32.mrf.mxu3 }
  0xb4   : > { %v1127_v23 = vadd.f32 %v1126_v63, %v1038_v20  ;;  %v951_v35 = vadd.f32 %v950_v22, %v862_v24  ;;  %v1798_v63 = vld [vmem:[%s2027_s11 + $0x154] sm:$0xf0]  ;;  %v1804_v22 = vld [vmem:[%s2027_s11 + $0x18c] sm:$0xf]  ;;  %v1562_v24 = vld [vmem:[%s2027_s11 + $0x160] sm:$0xf] }
  0xb5   : > { %v1555_v9 = vor.u32 %v1798_v63, %v1554_v62 }
  0xb6   : > { %1868 = vtanh.f32 %v1127_v23  ;;  %v1588_v23 = vld [vmem:[%s2027_s11 + $0x198] sm:$0xf0] }
  0xb7   : > { %1746 = vmatmul.msk.bf16.gmra.mxu3 %vm797_vm1, %v1559_v34  ;;  %v1563_v34 = vor.u32 %v1801_v25, %v1562_v24  ;;  %v1596_v24 = vld [vmem:[%s2027_s11 + $0x1b0] sm:$0xf0] }
  0xb9   : > { %v1039_v36 = vpop.f32.mrf.mxu2  ;;  %v864_v40 = vpop.f32.mrf.mxu0 }
  0xba   : > { %v1040_v39 = vadd.f32 %v1039_v36, %v951_v35  ;;  %v953_v41 = vpop.f32.mrf.mxu1  ;;  %v865_v43 = vadd.f32 %v2161_v7, %v864_v40  ;;  %v1136_v47 = vpop.f32.mrf.mxu3  ;;  %v1567_v35 = vor.u32 %v1799_v26, %v1564_v27  ;;  %v1602_v26 = vld [vmem:[%s2027_s11 + $0x1a8] sm:$0xf]  ;;  %v1810_v27 = vld [vmem:[%s2027_s11 + $0x1b4] sm:$0xf0] }
  0xbc   : > { %v1869_v44 = vpop.eup %1868  ;;  %v1129_v45 = vadd.f32 %v1128_v6, %v1040_v39  ;;  %903 = vmatmul.bf16.gmra.mxu0 %v1531_v37  ;;  %v954_v46 = vadd.f32 %v953_v41, %v865_v43  ;;  %v1571_v39 = vor.u32 %v1802_v30, %v1570_v29 }
  0xbd   : > { %1238 = vst [vmem:[%s2180_s4] sm:$0xff] %v1869_v44  ;;  %992 = vmatmul.bf16.gmra.mxu1 %v1535_v38 }
  0xbe   : > { %1870 = vtanh.f32 %v1129_v45  ;;  %1081 = vmatmul.bf16.gmra.mxu2 %v1539_v42 }
  0xc1   : > { %v1042_v48 = vpop.f32.mrf.mxu2  ;;  %v866_v50 = vpop.f32.mrf.mxu0 }
  0xc2   : > { %v1043_v49 = vadd.f32 %v1042_v48, %v954_v46  ;;  %v955_v51 = vpop.f32.mrf.mxu1  ;;  %v867_v54 = vadd.f32 %v2161_v7, %v866_v50  ;;  %v1138_v61 = vpop.f32.mrf.mxu3 }
  0xc4   : > { %v1871_v52 = vpop.eup %1870  ;;  %v1132_v53 = vadd.f32 %v1131_v18, %v1043_v49  ;;  %v956_v1 = vadd.f32 %v955_v51, %v867_v54  ;;  %v1578_v54 = vld [vmem:[%s2027_s11 + $0x180] sm:$0xf] }
  0xc5   : > { %1239 = vst [vmem:[%s2180_s4 + $0x8] sm:$0xff] %v1871_v52  ;;  %v1808_v52 = vld [vmem:[%s2027_s11 + $0x1ac] sm:$0xf] }
  0xc6   : > { %1872 = vtanh.f32 %v1132_v53  ;;  %v1604_v53 = vld [vmem:[%s2027_s11 + $0x1b8] sm:$0xf0] }
  0xc7   : > { %1747 = vmatmul.msk.bf16.gmra.mxu3 %vm797_vm1, %v1575_v0  ;;  %v1579_v0 = vor.u32 %v1805_v55, %v1578_v54  ;;  %v1612_v54 = vld [vmem:[%s2027_s11 + $0x1d0] sm:$0xf0] }
  0xc9   : > { %v1044_v2 = vpop.f32.mrf.mxu2  ;;  %v869_v6 = vpop.f32.mrf.mxu0 }
  0xca   : > { %v1045_v5 = vadd.f32 %v1044_v2, %v956_v1  ;;  %v958_v8 = vpop.f32.mrf.mxu1  ;;  %v870_v10 = vadd.f32 %v2161_v7, %v869_v6  ;;  %v1141_v14 = vpop.f32.mrf.mxu3  ;;  %v1583_v1 = vor.u32 %v1803_v56, %v1580_v57  ;;  %v1618_v56 = vld [vmem:[%s2027_s11 + $0x1c8] sm:$0xf]  ;;  %v1814_v57 = vld [vmem:[%s2027_s11 + $0x1d4] sm:$0xf0] }
  0xcc   : > { %v1873_v11 = vpop.eup %1872  ;;  %v1134_v12 = vadd.f32 %v1133_v31, %v1045_v5  ;;  %908 = vmatmul.bf16.gmra.mxu0 %v1547_v3  ;;  %v959_v13 = vadd.f32 %v958_v8, %v870_v10  ;;  %v1591_v31 = vor.u32 %v1804_v22, %v1588_v23  ;;  %v1587_v5 = vor.u32 %v1806_v60, %v1586_v59  ;;  %v1809_v22 = vld [vmem:[%s2027_s11 + $0x1ac] sm:$0xf0]  ;;  %v1807_v23 = vld [vmem:[%s2027_s11 + $0x1a4] sm:$0xf] }
  0xcd   : > { %1240 = vst [vmem:[%s2180_s4 + $0x10] sm:$0xff] %v1873_v11  ;;  %997 = vmatmul.bf16.gmra.mxu1 %v1551_v4 }
  0xce   : > { %1874 = vtanh.f32 %v1134_v12  ;;  %1086 = vmatmul.bf16.gmra.mxu2 %v1555_v9 }
  0xd1   : > { %v1047_v15 = vpop.f32.mrf.mxu2  ;;  %v871_v17 = vpop.f32.mrf.mxu0 }
  0xd2   : > { %v1048_v16 = vadd.f32 %v1047_v15, %v959_v13  ;;  %v960_v18 = vpop.f32.mrf.mxu1  ;;  %v872_v21 = vadd.f32 %v2161_v7, %v871_v17  ;;  %v1143_v28 = vpop.f32.mrf.mxu3 }
  0xd4   : > { %v1875_v19 = vpop.eup %1874  ;;  %v1137_v20 = vadd.f32 %v1136_v47, %v1048_v16  ;;  %v961_v32 = vadd.f32 %v960_v18, %v872_v21  ;;  %v1594_v21 = vld [vmem:[%s2027_s11 + $0x1a0] sm:$0xf] }
  0xd5   : > { %1241 = vst [vmem:[%s2180_s4 + $0x18] sm:$0xff] %v1875_v19  ;;  %v1812_v19 = vld [vmem:[%s2027_s11 + $0x1cc] sm:$0xf] }
  0xd6   : > { %1876 = vtanh.f32 %v1137_v20  ;;  %v1620_v20 = vld [vmem:[%s2027_s11 + $0x1d8] sm:$0xf0] }
  0xd7   : > { %1748 = vmatmul.msk.bf16.gmra.mxu3 %vm797_vm1, %v1591_v31  ;;  %v1595_v31 = vor.u32 %v1809_v22, %v1594_v21  ;;  %v1634_v21 = vld [vmem:[%s2027_s11 + $0x1e8] sm:$0xf]  ;;  %v1818_v22 = vld [vmem:[%s2027_s11 + $0x1f4] sm:$0xf0] }
  0xd9   : > { %v1049_v33 = vpop.f32.mrf.mxu2  ;;  %v874_v37 = vpop.f32.mrf.mxu0 }
  0xda   : > { %v1050_v36 = vadd.f32 %v1049_v33, %v961_v32  ;;  %v963_v38 = vpop.f32.mrf.mxu1  ;;  %v875_v40 = vadd.f32 %v2161_v7, %v874_v37  ;;  %v1146_v44 = vpop.f32.mrf.mxu3  ;;  %v1599_v32 = vor.u32 %v1807_v23, %v1596_v24 }
  0xdc   : > { %v1877_v41 = vpop.eup %1876  ;;  %v1139_v42 = vadd.f32 %v1138_v61, %v1050_v36  ;;  %913 = vmatmul.bf16.gmra.mxu0 %v1563_v34  ;;  %v964_v43 = vadd.f32 %v963_v38, %v875_v40  ;;  %v1607_v61 = vor.u32 %v1808_v52, %v1604_v53  ;;  %v1603_v36 = vor.u32 %v1810_v27, %v1602_v26  ;;  %v1813_v52 = vld [vmem:[%s2027_s11 + $0x1cc] sm:$0xf0]  ;;  %v1811_v53 = vld [vmem:[%s2027_s11 + $0x1c4] sm:$0xf] }
  0xdd   : > { %1242 = vst [vmem:[%s2180_s4 + $0x20] sm:$0xff] %v1877_v41  ;;  %1002 = vmatmul.bf16.gmra.mxu1 %v1567_v35 }
  0xde   : > { %1878 = vtanh.f32 %v1139_v42  ;;  %1091 = vmatmul.bf16.gmra.mxu2 %v1571_v39 }
  0xe1   : > { %v1052_v45 = vpop.f32.mrf.mxu2  ;;  %v876_v47 = vpop.f32.mrf.mxu0 }
  0xe2   : > { %v1053_v46 = vadd.f32 %v1052_v45, %v964_v43  ;;  %v965_v48 = vpop.f32.mrf.mxu1  ;;  %v877_v51 = vadd.f32 %v2161_v7, %v876_v47  ;;  %v1148_v58 = vpop.f32.mrf.mxu3 }
  0xe4   : > { %v1879_v49 = vpop.eup %1878  ;;  %v1142_v50 = vadd.f32 %v1141_v14, %v1053_v46  ;;  %v966_v62 = vadd.f32 %v965_v48, %v877_v51  ;;  %v1610_v51 = vld [vmem:[%s2027_s11 + $0x1c0] sm:$0xf] }
  0xe5   : > { %1243 = vst [vmem:[%s2180_s4 + $0x28] sm:$0xff] %v1879_v49  ;;  %v1816_v49 = vld [vmem:[%s2027_s11 + $0x1ec] sm:$0xf] }
  0xe6   : > { %1880 = vtanh.f32 %v1142_v50  ;;  %v1636_v50 = vld [vmem:[%s2027_s11 + $0x1f8] sm:$0xf0] }
  0xe7   : > { %1749 = vmatmul.msk.bf16.gmra.mxu3 %vm797_vm1, %v1607_v61  ;;  %v1611_v61 = vor.u32 %v1813_v52, %v1610_v51 }
  0xe9   : > { %v1054_v63 = vpop.f32.mrf.mxu2  ;;  %v879_v3 = vpop.f32.mrf.mxu0 }
  0xea   : > { %v1055_v2 = vadd.f32 %v1054_v63, %v966_v62  ;;  %v968_v4 = vpop.f32.mrf.mxu1  ;;  %v880_v6 = vadd.f32 %v2161_v7, %v879_v3  ;;  %v1151_v11 = vpop.f32.mrf.mxu3  ;;  %v1615_v62 = vor.u32 %v1811_v53, %v1612_v54 }
  0xec   : > { %v1881_v8 = vpop.eup %1880  ;;  %v1144_v9 = vadd.f32 %v1143_v28, %v1055_v2  ;;  %918 = vmatmul.bf16.gmra.mxu0 %v1579_v0  ;;  %v969_v10 = vadd.f32 %v968_v4, %v880_v6  ;;  %v1623_v28 = vor.u32 %v1812_v19, %v1620_v20  ;;  %v1619_v2 = vor.u32 %v1814_v57, %v1618_v56  ;;  %v1628_v19 = vld [vmem:[%s2027_s11 + $0x1f0] sm:$0xf0] }
  0xed   : > { %1244 = vst [vmem:[%s2180_s4 + $0x30] sm:$0xff] %v1881_v8  ;;  %1007 = vmatmul.bf16.gmra.mxu1 %v1583_v1 }
  0xee   : > { %1882 = vtanh.f32 %v1144_v9  ;;  %1096 = vmatmul.bf16.gmra.mxu2 %v1587_v5 }
  0xf1   : > { %v1057_v12 = vpop.f32.mrf.mxu2  ;;  %v881_v14 = vpop.f32.mrf.mxu0 }
  0xf2   : > { %v1058_v13 = vadd.f32 %v1057_v12, %v969_v10  ;;  %v970_v15 = vpop.f32.mrf.mxu1  ;;  %v882_v18 = vadd.f32 %v2161_v7, %v881_v14  ;;  %v1153_v25 = vpop.f32.mrf.mxu3 }
  0xf4   : > { %v1883_v16 = vpop.eup %1882  ;;  %v1147_v17 = vadd.f32 %v1146_v44, %v1058_v13  ;;  %v971_v29 = vadd.f32 %v970_v15, %v882_v18  ;;  %v1815_v18 = vld [vmem:[%s2027_s11 + $0x1e4] sm:$0xf] }
  0xf5   : > { %1245 = vst [vmem:[%s2180_s4 + $0x38] sm:$0xff] %v1883_v16  ;;  %v1626_v16 = vld [vmem:[%s2027_s11 + $0x1e0] sm:$0xf]  ;;  %v1631_v26 = vor.u32 %v1815_v18, %v1628_v19 }
  0xf6   : > { %1884 = vtanh.f32 %v1147_v17  ;;  %v1817_v17 = vld [vmem:[%s2027_s11 + $0x1ec] sm:$0xf0] }
  0xf7   : > { %1750 = vmatmul.msk.bf16.gmra.mxu3 %vm797_vm1, %v1623_v28 }
  0xf9   : > { %v1059_v30 = vpop.f32.mrf.mxu2  ;;  %v884_v34 = vpop.f32.mrf.mxu0 }
  0xfa   : > { %v1060_v33 = vadd.f32 %v1059_v30, %v971_v29  ;;  %v973_v35 = vpop.f32.mrf.mxu1  ;;  %v885_v37 = vadd.f32 %v2161_v7, %v884_v34  ;;  %v1156_v41 = vpop.f32.mrf.mxu3  ;;  %v1635_v30 = vor.u32 %v1818_v22, %v1634_v21 }
  0xfc   : > { %v1885_v38 = vpop.eup %1884  ;;  %v1149_v39 = vadd.f32 %v1148_v58, %v1060_v33  ;;  %923 = vmatmul.bf16.gmra.mxu0 %v1595_v31  ;;  %v974_v40 = vadd.f32 %v973_v35, %v885_v37  ;;  %v1639_v58 = vor.u32 %v1816_v49, %v1636_v50 }
  0xfd   : > { %1246 = vst [vmem:[%s2180_s4 + $0x40] sm:$0xff] %v1885_v38  ;;  %1012 = vmatmul.bf16.gmra.mxu1 %v1599_v32 }
  0xfe   : > { %1886 = vtanh.f32 %v1149_v39  ;;  %1101 = vmatmul.bf16.gmra.mxu2 %v1603_v36 }
 0x101   : > { %v1062_v42 = vpop.f32.mrf.mxu2  ;;  %v886_v44 = vpop.f32.mrf.mxu0 }
 0x102   : > { %v1063_v43 = vadd.f32 %v1062_v42, %v974_v40  ;;  %v975_v45 = vpop.f32.mrf.mxu1  ;;  %v887_v48 = vadd.f32 %v2161_v7, %v886_v44  ;;  %v1158_v55 = vpop.f32.mrf.mxu3 }
 0x104   : > { %v1887_v46 = vpop.eup %1886  ;;  %v1152_v47 = vadd.f32 %v1151_v11, %v1063_v43  ;;  %v976_v59 = vadd.f32 %v975_v45, %v887_v48 }
 0x105   : > { %1247 = vst [vmem:[%s2180_s4 + $0x48] sm:$0xff] %v1887_v46 }
 0x106   : > { %1888 = vtanh.f32 %v1152_v47 }
 0x107   : > { %1751 = vmatmul.msk.bf16.gmra.mxu3 %vm797_vm1, %v1639_v58 }
 0x109   : > { %v1064_v60 = vpop.f32.mrf.mxu2  ;;  %v889_v0 = vpop.f32.mrf.mxu0 }
 0x10a   : > { %v1065_v63 = vadd.f32 %v1064_v60, %v976_v59  ;;  %v978_v1 = vpop.f32.mrf.mxu1  ;;  %v890_v3 = vadd.f32 %v2161_v7, %v889_v0  ;;  %v1161_v8 = vpop.f32.mrf.mxu3 }
 0x10c   : > { %v1889_v4 = vpop.eup %1888  ;;  %v1154_v5 = vadd.f32 %v1153_v25, %v1065_v63  ;;  %928 = vmatmul.bf16.gmra.mxu0 %v1611_v61  ;;  %v979_v6 = vadd.f32 %v978_v1, %v890_v3  ;;  %v1627_v25 = vor.u32 %v1817_v17, %v1626_v16 }
 0x10d   : > { %1248 = vst [vmem:[%s2180_s4 + $0x50] sm:$0xff] %v1889_v4  ;;  %1017 = vmatmul.bf16.gmra.mxu1 %v1615_v62 }
 0x10e   : > { %1890 = vtanh.f32 %v1154_v5  ;;  %1106 = vmatmul.bf16.gmra.mxu2 %v1619_v2 }
 0x111   : > { %v1067_v9 = vpop.f32.mrf.mxu2  ;;  %v891_v11 = vpop.f32.mrf.mxu0 }
 0x112   : > { %v1068_v10 = vadd.f32 %v1067_v9, %v979_v6  ;;  %v980_v12 = vpop.f32.mrf.mxu1  ;;  %v892_v15 = vadd.f32 %v2161_v7, %v891_v11  ;;  %v1163_v20 = vpop.f32.mrf.mxu3 }
 0x114   : > { %v1891_v13 = vpop.eup %1890  ;;  %v1157_v14 = vadd.f32 %v1156_v41, %v1068_v10  ;;  %v981_v23 = vadd.f32 %v980_v12, %v892_v15 }
 0x115   : > { %1249 = vst [vmem:[%s2180_s4 + $0x58] sm:$0xff] %v1891_v13 }
 0x116   : > { %1892 = vtanh.f32 %v1157_v14 }
 0x119   : > { %v1069_v24 = vpop.f32.mrf.mxu2  ;;  %v894_v28 = vpop.f32.mrf.mxu0 }
 0x11a   : > { %v1070_v27 = vadd.f32 %v1069_v24, %v981_v23  ;;  %v983_v29 = vpop.f32.mrf.mxu1  ;;  %v895_v31 = vadd.f32 %v2161_v7, %v894_v28  ;;  %v1166_v35 = vpop.f32.mrf.mxu3 }
 0x11c   : > { %v1893_v32 = vpop.eup %1892  ;;  %v1159_v33 = vadd.f32 %v1158_v55, %v1070_v27  ;;  %933 = vmatmul.bf16.gmra.mxu0 %v1627_v25  ;;  %v984_v34 = vadd.f32 %v983_v29, %v895_v31 }
 0x11d   : > { %1250 = vst [vmem:[%s2180_s4 + $0x60] sm:$0xff] %v1893_v32  ;;  %1022 = vmatmul.bf16.gmra.mxu1 %v1631_v26 }
 0x11e   : > { %1894 = vtanh.f32 %v1159_v33  ;;  %1111 = vmatmul.bf16.gmra.mxu2 %v1635_v30 }
 0x121   : > { %v1072_v36 = vpop.f32.mrf.mxu2  ;;  %v896_v38 = vpop.f32.mrf.mxu0 }
 0x122   : > { %v1073_v37 = vadd.f32 %v1072_v36, %v984_v34  ;;  %v985_v39 = vpop.f32.mrf.mxu1  ;;  %v897_v42 = vadd.f32 %v2161_v7, %v896_v38  ;;  %v1168_v43 = vpop.f32.mrf.mxu3 }
 0x124   : > { %v1895_v40 = vpop.eup %1894  ;;  %v1162_v41 = vadd.f32 %v1161_v8, %v1073_v37  ;;  %v986_v44 = vadd.f32 %v985_v39, %v897_v42 }
 0x125   : > { %1251 = vst [vmem:[%s2180_s4 + $0x68] sm:$0xff] %v1895_v40 }
 0x126   : > { %1896 = vtanh.f32 %v1162_v41 }
 0x129   : > { %v1074_v45 = vpop.f32.mrf.mxu2  ;;  %v899_v47 = vpop.f32.mrf.mxu0 }
 0x12a   : > { %v1075_v46 = vadd.f32 %v1074_v45, %v986_v44  ;;  %v988_v48 = vpop.f32.mrf.mxu1  ;;  %v900_v49 = vadd.f32 %v2161_v7, %v899_v47  ;;  %v1171_v53 = vpop.f32.mrf.mxu3 }
 0x12c   : > { %v1897_v50 = vpop.eup %1896  ;;  %v1164_v51 = vadd.f32 %v1163_v20, %v1075_v46  ;;  %v989_v52 = vadd.f32 %v988_v48, %v900_v49 }
 0x12d   : > { %1252 = vst [vmem:[%s2180_s4 + $0x70] sm:$0xff] %v1897_v50 }
 0x12e   : > { %1898 = vtanh.f32 %v1164_v51 }
 0x131   : > { %v1077_v54 = vpop.f32.mrf.mxu2  ;;  %v901_v56 = vpop.f32.mrf.mxu0 }
 0x132   : > { %v1078_v55 = vadd.f32 %v1077_v54, %v989_v52  ;;  %v990_v57 = vpop.f32.mrf.mxu1  ;;  %v902_v60 = vadd.f32 %v2161_v7, %v901_v56  ;;  %v1173_v61 = vpop.f32.mrf.mxu3 }
 0x134   : > { %v1899_v58 = vpop.eup %1898  ;;  %v1167_v59 = vadd.f32 %v1166_v35, %v1078_v55  ;;  %v991_v62 = vadd.f32 %v990_v57, %v902_v60 }
 0x135   : > { %1253 = vst [vmem:[%s2180_s4 + $0x78] sm:$0xff] %v1899_v58 }
 0x136   : > { %1900 = vtanh.f32 %v1167_v59 }
 0x139   : > { %v1079_v63 = vpop.f32.mrf.mxu2  ;;  %v904_v1 = vpop.f32.mrf.mxu0 }
 0x13a   : > { %v1080_v0 = vadd.f32 %v1079_v63, %v991_v62  ;;  %v993_v2 = vpop.f32.mrf.mxu1  ;;  %v905_v3 = vadd.f32 %v2161_v7, %v904_v1  ;;  %v1176_v8 = vpop.f32.mrf.mxu3 }
 0x13c   : > { %v1901_v4 = vpop.eup %1900  ;;  %v1169_v5 = vadd.f32 %v1168_v43, %v1080_v0  ;;  %v994_v6 = vadd.f32 %v993_v2, %v905_v3 }
 0x13d   : > { %1254 = vst [vmem:[%s2180_s4 + $0x80] sm:$0xff] %v1901_v4 }
 0x13e   : > { %1902 = vtanh.f32 %v1169_v5 }
 0x141   : > { %v1082_v9 = vpop.f32.mrf.mxu2  ;;  %v906_v11 = vpop.f32.mrf.mxu0 }
 0x142   : > { %v1083_v10 = vadd.f32 %v1082_v9, %v994_v6  ;;  %v995_v12 = vpop.f32.mrf.mxu1  ;;  %v907_v15 = vadd.f32 %v2161_v7, %v906_v11  ;;  %v1178_v16 = vpop.f32.mrf.mxu3 }
 0x144   : > { %v1903_v13 = vpop.eup %1902  ;;  %v1172_v14 = vadd.f32 %v1171_v53, %v1083_v10  ;;  %v996_v17 = vadd.f32 %v995_v12, %v907_v15 }
 0x145   : > { %1255 = vst [vmem:[%s2180_s4 + $0x88] sm:$0xff] %v1903_v13 }
 0x146   : > { %1904 = vtanh.f32 %v1172_v14 }
 0x149   : > { %v1084_v18 = vpop.f32.mrf.mxu2  ;;  %v909_v20 = vpop.f32.mrf.mxu0 }
 0x14a   : > { %v1085_v19 = vadd.f32 %v1084_v18, %v996_v17  ;;  %v998_v21 = vpop.f32.mrf.mxu1  ;;  %v910_v22 = vadd.f32 %v2161_v7, %v909_v20  ;;  %v1181_v27 = vpop.f32.mrf.mxu3 }
 0x14c   : > { %v1905_v23 = vpop.eup %1904  ;;  %v1174_v24 = vadd.f32 %v1173_v61, %v1085_v19  ;;  %v999_v25 = vadd.f32 %v998_v21, %v910_v22 }
 0x14d   : > { %1256 = vst [vmem:[%s2180_s4 + $0x90] sm:$0xff] %v1905_v23 }
 0x14e   : > { %1906 = vtanh.f32 %v1174_v24 }
 0x151   : > { %v1087_v26 = vpop.f32.mrf.mxu2  ;;  %v911_v29 = vpop.f32.mrf.mxu0 }
 0x152   : > { %v1088_v28 = vadd.f32 %v1087_v26, %v999_v25  ;;  %v1000_v30 = vpop.f32.mrf.mxu1  ;;  %v912_v33 = vadd.f32 %v2161_v7, %v911_v29  ;;  %v1183_v40 = vpop.f32.mrf.mxu3 }
 0x154   : > { %v1907_v31 = vpop.eup %1906  ;;  %v1177_v32 = vadd.f32 %v1176_v8, %v1088_v28  ;;  %v1001_v34 = vadd.f32 %v1000_v30, %v912_v33 }
 0x155   : > { %1257 = vst [vmem:[%s2180_s4 + $0x98] sm:$0xff] %v1907_v31 }
 0x156   : > { %1908 = vtanh.f32 %v1177_v32 }
 0x159   : > { %v1089_v35 = vpop.f32.mrf.mxu2  ;;  %v914_v37 = vpop.f32.mrf.mxu0 }
 0x15a   : > { %v1090_v36 = vadd.f32 %v1089_v35, %v1001_v34  ;;  %v1003_v38 = vpop.f32.mrf.mxu1  ;;  %v915_v39 = vadd.f32 %v2161_v7, %v914_v37  ;;  %v1186_v51 = vpop.f32.mrf.mxu3 }
 0x15c   : > { %v1909_v41 = vpop.eup %1908  ;;  %v1179_v42 = vadd.f32 %v1178_v16, %v1090_v36  ;;  %v1004_v43 = vadd.f32 %v1003_v38, %v915_v39 }
 0x15d   : > { %1258 = vst [vmem:[%s2180_s4 + $0xa0] sm:$0xff] %v1909_v41 }
 0x15e   : > { %1910 = vtanh.f32 %v1179_v42 }
 0x161   : > { %v1092_v44 = vpop.f32.mrf.mxu2  ;;  %v916_v46 = vpop.f32.mrf.mxu0 }
 0x162   : > { %v1093_v45 = vadd.f32 %v1092_v44, %v1004_v43  ;;  %v1005_v47 = vpop.f32.mrf.mxu1  ;;  %v917_v50 = vadd.f32 %v2161_v7, %v916_v46  ;;  %v1188_v61 = vpop.f32.mrf.mxu3 }
 0x164   : > { %v1911_v48 = vpop.eup %1910  ;;  %v1182_v49 = vadd.f32 %v1181_v27, %v1093_v45  ;;  %v1006_v52 = vadd.f32 %v1005_v47, %v917_v50 }
 0x165   : > { %1259 = vst [vmem:[%s2180_s4 + $0xa8] sm:$0xff] %v1911_v48 }
 0x166   : > { %1912 = vtanh.f32 %v1182_v49 }
 0x169   : > { %v1094_v53 = vpop.f32.mrf.mxu2  ;;  %v919_v55 = vpop.f32.mrf.mxu0 }
 0x16a   : > { %v1095_v54 = vadd.f32 %v1094_v53, %v1006_v52  ;;  %v1008_v56 = vpop.f32.mrf.mxu1  ;;  %v920_v57 = vadd.f32 %v2161_v7, %v919_v55  ;;  %v1191_v8 = vpop.f32.mrf.mxu3 }
 0x16c   : > { %v1913_v58 = vpop.eup %1912  ;;  %v1184_v59 = vadd.f32 %v1183_v40, %v1095_v54  ;;  %v1009_v60 = vadd.f32 %v1008_v56, %v920_v57 }
 0x16d   : > { %1260 = vst [vmem:[%s2180_s4 + $0xb0] sm:$0xff] %v1913_v58 }
 0x16e   : > { %1914 = vtanh.f32 %v1184_v59 }
 0x171   : > { %v1097_v62 = vpop.f32.mrf.mxu2  ;;  %v921_v0 = vpop.f32.mrf.mxu0 }
 0x172   : > { %v1098_v63 = vadd.f32 %v1097_v62, %v1009_v60  ;;  %v1010_v1 = vpop.f32.mrf.mxu1  ;;  %v922_v4 = vadd.f32 %v2161_v7, %v921_v0  ;;  %v1193_v20 = vpop.f32.mrf.mxu3 }
 0x174   : > { %v1915_v2 = vpop.eup %1914  ;;  %v1187_v3 = vadd.f32 %v1186_v51, %v1098_v63  ;;  %v1011_v5 = vadd.f32 %v1010_v1, %v922_v4 }
 0x175   : > { %1261 = vst [vmem:[%s2180_s4 + $0xb8] sm:$0xff] %v1915_v2 }
 0x176   : > { %1916 = vtanh.f32 %v1187_v3 }
 0x179   : > { %v1099_v6 = vpop.f32.mrf.mxu2  ;;  %v924_v10 = vpop.f32.mrf.mxu0 }
 0x17a   : > { %v1100_v9 = vadd.f32 %v1099_v6, %v1011_v5  ;;  %v1013_v11 = vpop.f32.mrf.mxu1  ;;  %v925_v12 = vadd.f32 %v2161_v7, %v924_v10  ;;  %v1196_v32 = vpop.f32.mrf.mxu3 }
 0x17c   : > { %v1917_v13 = vpop.eup %1916  ;;  %v1189_v14 = vadd.f32 %v1188_v61, %v1100_v9  ;;  %v1014_v15 = vadd.f32 %v1013_v11, %v925_v12 }
 0x17d   : > { %1262 = vst [vmem:[%s2180_s4 + $0xc0] sm:$0xff] %v1917_v13 }
 0x17e   : > { %1918 = vtanh.f32 %v1189_v14 }
 0x181   : > { %v1102_v16 = vpop.f32.mrf.mxu2  ;;  %v926_v18 = vpop.f32.mrf.mxu0 }
 0x182   : > { %v1103_v17 = vadd.f32 %v1102_v16, %v1014_v15  ;;  %v1015_v19 = vpop.f32.mrf.mxu1  ;;  %v927_v23 = vadd.f32 %v2161_v7, %v926_v18  ;;  %v1198_v41 = vpop.f32.mrf.mxu3 }
 0x184   : > { %v1919_v21 = vpop.eup %1918  ;;  %v1192_v22 = vadd.f32 %v1191_v8, %v1103_v17  ;;  %v1016_v24 = vadd.f32 %v1015_v19, %v927_v23 }
 0x185   : > { %1263 = vst [vmem:[%s2180_s4 + $0xc8] sm:$0xff] %v1919_v21 }
 0x186   : > { %1920 = vtanh.f32 %v1192_v22 }
 0x189   : > { %v1104_v25 = vpop.f32.mrf.mxu2  ;;  %v929_v27 = vpop.f32.mrf.mxu0 }
 0x18a   : > { %v1105_v26 = vadd.f32 %v1104_v25, %v1016_v24  ;;  %v1018_v28 = vpop.f32.mrf.mxu1  ;;  %v930_v29 = vadd.f32 %v2161_v7, %v929_v27  ;;  %v1201_v51 = vpop.f32.mrf.mxu3 }
 0x18c   : > { %v1921_v30 = vpop.eup %1920  ;;  %v1194_v31 = vadd.f32 %v1193_v20, %v1105_v26  ;;  %v1019_v33 = vadd.f32 %v1018_v28, %v930_v29 }
 0x18d   : > { %1264 = vst [vmem:[%s2180_s4 + $0xd0] sm:$0xff] %v1921_v30 }
 0x18e   : > { %1922 = vtanh.f32 %v1194_v31 }
 0x191   : > { %v1107_v34 = vpop.f32.mrf.mxu2  ;;  %v931_v36 = vpop.f32.mrf.mxu0 }
 0x192   : > { %v1108_v35 = vadd.f32 %v1107_v34, %v1019_v33  ;;  %v1020_v37 = vpop.f32.mrf.mxu1  ;;  %v932_v40 = vadd.f32 %v2161_v7, %v931_v36  ;;  %v1203_v62 = vpop.f32.mrf.mxu3 }
 0x194   : > { %v1923_v38 = vpop.eup %1922  ;;  %v1197_v39 = vadd.f32 %v1196_v32, %v1108_v35  ;;  %v1021_v42 = vadd.f32 %v1020_v37, %v932_v40 }
 0x195   : > { %1265 = vst [vmem:[%s2180_s4 + $0xd8] sm:$0xff] %v1923_v38 }
 0x196   : > { %1924 = vtanh.f32 %v1197_v39 }
 0x199   : > { %v1109_v43 = vpop.f32.mrf.mxu2  ;;  %v934_v45 = vpop.f32.mrf.mxu0 }
 0x19a   : > { %v1110_v44 = vadd.f32 %v1109_v43, %v1021_v42  ;;  %v935_v46 = vadd.f32 %v2161_v7, %v934_v45  ;;  %v1023_v49 = vpop.f32.mrf.mxu1 }
 0x19c   : > { %v1925_v47 = vpop.eup %1924  ;;  %v1199_v48 = vadd.f32 %v1198_v41, %v1110_v44  ;;  %v1024_v50 = vadd.f32 %v1023_v49, %v935_v46 }
 0x19d   : > { %1266 = vst [vmem:[%s2180_s4 + $0xe0] sm:$0xff] %v1925_v47 }
 0x19e   : > { %1926 = vtanh.f32 %v1199_v48 }
 0x1a1   : > { %v1112_v52 = vpop.f32.mrf.mxu2  ;;  %v936_v54 = vpop.f32.mrf.mxu0 }
 0x1a2   : > { %v1113_v53 = vadd.f32 %v1112_v52, %v1024_v50  ;;  %v937_v57 = vadd.f32 %v2161_v7, %v936_v54  ;;  %v1025_v58 = vpop.f32.mrf.mxu1 }
 0x1a4   : > { %v1927_v55 = vpop.eup %1926  ;;  %v1202_v56 = vadd.f32 %v1201_v51, %v1113_v53  ;;  %v1026_v59 = vadd.f32 %v1025_v58, %v937_v57 }
 0x1a5   : > { %1267 = vst [vmem:[%s2180_s4 + $0xe8] sm:$0xff] %v1927_v55 }
 0x1a6   : > { %1928 = vtanh.f32 %v1202_v56 }
 0x1a9   : > { %v1114_v60 = vpop.f32.mrf.mxu2 }
 0x1aa   : > { %v1115_v61 = vadd.f32 %v1114_v60, %v1026_v59 }
 0x1ac   : > { %v1929_v63 = vpop.eup %1928  ;;  %v1204_v0 = vadd.f32 %v1203_v62, %v1115_v61 }
 0x1ad   : > { %1268 = vst [vmem:[%s2180_s4 + $0xf0] sm:$0xff] %v1929_v63 }
 0x1ae   : > { %1930 = vtanh.f32 %v1204_v0 }
 0x1b4   : > { %v1931_v1 = vpop.eup %1930 }
 0x1b5   : > { %1269 = vst [vmem:[%s2180_s4 + $0xf8] sm:$0xff] %v1931_v1 }
 0x1b6 PF: > { %s13_s14 = sadd.s32 1, %s1954_s14   ;;  %s2309_s12 = smov %s1950_s13 }
 0x1b7   : > { %p10_p5 = scmp.ge.s32.totalorder %s13_s14, 4   ;;  %s2310_s13 = smov %s2312_s15 }
 0x1b9   :  { %12 = sbr.rel (!%p10_p5) target bundleno = 2 (0x2), region = 68 }

</bundles_post_ra>
